<compile_context>
chip_gen: v7x
topology: tpu7x:2x2x1
jax: 0.10.0
libtpu: 0.0.40
codegen_flags: <defaults>
</compile_context>

<pallas_src>
import jax
import jax.numpy as jnp
from jax import lax
from jax.experimental import pallas as pl
from jax.experimental.pallas import tpu as pltpu


# ----------------------------------------------------------------------------
# Fused kernel
# ----------------------------------------------------------------------------

def _driver_net_kernel(
    # activations (batch already padded to Bp = multiple of 8)
    s_tm_ref,                     # (T*Bp, C)  time-major flattened sequence
    p_ref, v_ref, vn_ref,         # (Bp, P), (Bp, V), (Bp, V)
    # f_mlp
    fw1_ref, fb1_ref, fw2_ref, fb2_ref,
    # LSTM (stacked over layers): gate column order [i, f, g, o]
    wih_ref, whh_ref, lbias_ref,  # (L, Hr, 4Hr), (L, Hr, 4Hr), (L, 1, 4Hr)
    # b_mlp
    bw1_ref, bb1_ref, bw2_ref, bb2_ref, bw3_ref, bb3_ref,
    # encoder Linear, weight pre-split by input block [s_enc | p | v | v_next]
    ew_s_ref, ew_p_ref, ew_v_ref, ew_vn_ref, eb_ref,
    # rezero residual stack
    rw_ref, rb_ref, rsw_ref,      # (D, Hd, Hd), (D, 1, Hd), (D, 1, Hd)
    # output head
    ow_ref, ob_ref,               # (Hd, A), (1, A)
    # output
    o_ref,                        # (Bp, A)
    # scratch
    seq_ref,                      # (T*Bp, Hr) per-layer hidden history (time-major)
):
    f32 = jnp.float32
    Bp = p_ref.shape[0]
    Hr = wih_ref.shape[1]
    H4 = 4 * Hr
    T = s_tm_ref.shape[0] // Bp
    Hd = bw1_ref.shape[1]
    n_layers = wih_ref.shape[0]
    depth = rw_ref.shape[0]

    def mm(a, b):
        return jnp.dot(a, b, preferred_element_type=f32)

    # ----------------- f_mlp (rows are time-major (t, b)) -------------------
    x = s_tm_ref[...]
    h = jnp.maximum(mm(x, fw1_ref[...]) + fb1_ref[...], 0.0)
    x_prev = jnp.maximum(mm(h, fw2_ref[...]) + fb2_ref[...], 0.0)       # (T*Bp, Hr)

    # Hoisted lane mask selecting the candidate ("g") gate columns [2Hr, 3Hr).
    lane = lax.broadcasted_iota(jnp.int32, (Bp, H4), 1)
    g_lane = (lane >= 2 * Hr) & (lane < 3 * Hr)

    # Accumulator for the fused flatten + b_mlp.l1 matmul (filled by the top
    # LSTM layer's timestep loop):  flat @ W1 == sum_t h_t @ W1[t*Hr:(t+1)*Hr].
    b1_acc = jnp.zeros((Bp, Hd), f32)

    # ----------------- 4 stacked LSTM layers --------------------------------
    for l in range(n_layers):
        wih = wih_ref[l]                          # (Hr, 4Hr)  hoisted loads
        whh = whh_ref[l]                          # (Hr, 4Hr)
        # Input projection + combined (b_ih + b_hh) bias for ALL timesteps.
        gx = mm(x_prev, wih) + lbias_ref[l]       # (T*Bp, 4Hr)

        h_t = jnp.zeros((Bp, Hr), f32)
        c_t = jnp.zeros((Bp, Hr), f32)
        for t in range(T):                        # fully unrolled, static slices
            g = gx[t * Bp:(t + 1) * Bp, :] + mm(h_t, whh)               # (Bp, 4Hr)
            # Full-vreg transcendentals + one select instead of 4 narrow calls.
            act = jnp.where(g_lane, jnp.tanh(g), jax.nn.sigmoid(g))
            i_g = act[:, 0 * Hr:1 * Hr]
            f_g = act[:, 1 * Hr:2 * Hr]
            g_g = act[:, 2 * Hr:3 * Hr]
            o_g = act[:, 3 * Hr:4 * Hr]
            c_t = f_g * c_t + i_g * g_g
            h_t = o_g * jnp.tanh(c_t)
            if l < n_layers - 1:
                # 8-row-aligned store (Bp is a multiple of 8): clean vst.
                seq_ref[t * Bp:(t + 1) * Bp, :] = h_t
            else:
                # Fused torch view(b,-1) + b_mlp.l1: per-timestep partial matmul.
                b1_acc = b1_acc + mm(h_t, bw1_ref[t * Hr:(t + 1) * Hr, :])
        if l < n_layers - 1:
            x_prev = seq_ref[...]

    # ----------------- b_mlp on the flattened hidden history ----------------
    hb = jnp.maximum(b1_acc + bb1_ref[...], 0.0)                         # (Bp, Hd)
    hb = jnp.maximum(mm(hb, bw2_ref[...]) + bb2_ref[...], 0.0)
    s_enc = jnp.tanh(mm(hb, bw3_ref[...]) + bb3_ref[...])                # (Bp, Hd)

    # ----------------- encoder: Linear(cat([s_enc,p,v,v_next])) + ReLU ------
    # cat(...) @ W  ==  s_enc@W_s + p@W_p + v@W_v + v_next@W_vn   (concat-free)
    enc = (mm(s_enc, ew_s_ref[...]) + mm(p_ref[...], ew_p_ref[...])
           + mm(v_ref[...], ew_v_ref[...]) + mm(vn_ref[...], ew_vn_ref[...])
           + eb_ref[...])
    out = jnp.maximum(enc, 0.0)                                          # (Bp, Hd)

    # ----------------- rezero residual stack --------------------------------
    for i in range(depth):
        z = mm(out, rw_ref[i]) + rb_ref[i]
        out = out + rsw_ref[i] * jnp.maximum(z, 0.0)

    # ----------------- output head ------------------------------------------
    # NOTE: (Bp, a_dim) with a_dim < 128 is a masked partial store; trivial
    # bytes here, wrapper slices the padded batch rows back off.
    o_ref[...] = mm(out, ow_ref[...]) + ob_ref[...]


# ----------------------------------------------------------------------------
# Wrapper
# ----------------------------------------------------------------------------

_VMEM = pl.BlockSpec(memory_space=pltpu.MemorySpace.VMEM)


def _pad_rows(x, rows):
    b = x.shape[0]
    if b == rows:
        return x
    return jnp.pad(x, ((0, rows - b),) + ((0, 0),) * (x.ndim - 1))


def driver_net_forward(p, s, v, v_next, params):
    """Fused Driver_Net_Cat forward. p:(B,P), s:(B,T,C), v/v_next:(B,V) -> (B,A)."""
    B, T, C = s.shape
    Hr = params["lstm_wih"].shape[1]
    a_dim = params["out_w"].shape[1]

    # Pad batch to a multiple of 8 sublanes (no cross-batch interaction, so the
    # extra rows are pure padding and get sliced off below).
    Bp = ((B + 7) // 8) * 8
    p_p = _pad_rows(p, Bp)
    v_p = _pad_rows(v, Bp)
    vn_p = _pad_rows(v_next, Bp)
    s_p = _pad_rows(s, Bp)

    # Only wrapper-side layout op: time-major flatten of the tiny s input.
    s_tm = jnp.transpose(s_p, (1, 0, 2)).reshape(T * Bp, C)

    args = (
        s_tm, p_p, v_p, vn_p,
        params["f_w1"], params["f_b1"], params["f_w2"], params["f_b2"],
        params["lstm_wih"], params["lstm_whh"], params["lstm_b"],
        params["b_w1"], params["b_b1"], params["b_w2"], params["b_b2"],
        params["b_w3"], params["b_b3"],
        params["enc_w_s"], params["enc_w_p"], params["enc_w_v"],
        params["enc_w_vn"], params["enc_b"],
        params["res_w"], params["res_b"], params["res_scale"],
        params["out_w"], params["out_b"],
    )

    out = pl.pallas_call(
        _driver_net_kernel,
        out_shape=jax.ShapeDtypeStruct((Bp, a_dim), jnp.float32),
        in_specs=[_VMEM] * len(args),
        out_specs=_VMEM,
        scratch_shapes=[
            pltpu.VMEM((T * Bp, Hr), jnp.float32),   # time-major hidden history
        ],
    )(*args)
    return out[:B]


# ----------------------------------------------------------------------------
# Deterministic synthetic parameters (structural match to the PyTorch module)
# ----------------------------------------------------------------------------

def init_params(key, *, s_dim, p_dim, v_dim, a_dim, hidden_dim, rnn_hidden, depth):
    T, C = s_dim
    Hr = rnn_hidden            # mlp_rnn internal hidden (torch default 512)
    Hd = hidden_dim            # Driver_Net_Cat hidden_dim (= mlp_rnn output_dim)
    scale = 0.1

    def dense(k, fan_in, fan_out):
        kw, kb = jax.random.split(k)
        return (scale * jax.random.normal(kw, (fan_in, fan_out), jnp.float32),
                scale * jax.random.normal(kb, (1, fan_out), jnp.float32))

    keys = jax.random.split(key, 12 + depth)

    # f_mlp: Linear(C, 2Hr) -> Linear(2Hr, Hr)
    f_w1, f_b1 = dense(keys[0], C, 2 * Hr)
    f_w2, f_b2 = dense(keys[1], 2 * Hr, Hr)

    # LSTM: 4 layers, input=hidden=Hr; weights stored transposed (Hin, 4H),
    # gate column order [i, f, g, o]; bias = b_ih + b_hh combined.
    wih, whh, lb = [], [], []
    for l in range(4):
        kih, khh, kb = jax.random.split(keys[2 + l], 3)
        wih.append(scale * jax.random.normal(kih, (Hr, 4 * Hr), jnp.float32))
        whh.append(scale * jax.random.normal(khh, (Hr, 4 * Hr), jnp.float32))
        lb.append(scale * jax.random.normal(kb, (1, 4 * Hr), jnp.float32))

    # b_mlp: Linear(Hr*T, Hd) -> Linear(Hd, Hd) -> Linear(Hd, Hd)
    b_w1, b_b1 = dense(keys[6], Hr * T, Hd)
    b_w2, b_b2 = dense(keys[7], Hd, Hd)
    b_w3, b_b3 = dense(keys[8], Hd, Hd)

    # encoder Linear(Hd + P + 2V, Hd), weight pre-split into row blocks.
    enc_w, enc_b = dense(keys[9], Hd + p_dim + 2 * v_dim, Hd)
    o0, o1, o2 = Hd, Hd + p_dim, Hd + p_dim + v_dim
    enc_w_s, enc_w_p = enc_w[:o0], enc_w[o0:o1]
    enc_w_v, enc_w_vn = enc_w[o1:o2], enc_w[o2:]

    # rezero residual stack: depth x Linear(Hd, Hd) plus resweight scalars.
    rw, rb = [], []
    for i in range(depth):
        w, b = dense(keys[10 + i], Hd, Hd)
        rw.append(w)
        rb.append(b)
    # Torch inits resweight to zeros; use small nonzero values so the residual
    # path is actually exercised numerically.
    resweight = scale * jax.random.normal(keys[10 + depth], (depth,), jnp.float32)
    res_scale = jnp.broadcast_to(resweight[:, None, None], (depth, 1, Hd))

    # output head Linear(Hd, A)
    out_w, out_b = dense(keys[11 + depth], Hd, a_dim)

    return {
        "f_w1": f_w1, "f_b1": f_b1, "f_w2": f_w2, "f_b2": f_b2,
        "lstm_wih": jnp.stack(wih), "lstm_whh": jnp.stack(whh),
        "lstm_b": jnp.stack(lb),
        "b_w1": b_w1, "b_b1": b_b1, "b_w2": b_w2, "b_b2": b_b2,
        "b_w3": b_w3, "b_b3": b_b3,
        "enc_w_s": enc_w_s, "enc_w_p": enc_w_p, "enc_w_v": enc_w_v,
        "enc_w_vn": enc_w_vn, "enc_b": enc_b,
        "res_w": jnp.stack(rw), "res_b": jnp.stack(rb),
        "res_scale": jnp.asarray(res_scale),
        "out_w": out_w, "out_b": out_b,
    }


# ----------------------------------------------------------------------------

if __name__ == "__main__":
    # Small, forward-consistent shapes:
    #   s_dim = (T, C) = (8, 16), p_dim = v_dim = 8, a_dim = 16,
    #   Driver hidden_dim = 32, mlp_rnn hidden = 32, depth = 10, batch = 2.
    B = 2
    T, C = 8, 16
    p_dim, v_dim, a_dim = 8, 8, 16
    hidden_dim, rnn_hidden, depth = 32, 32, 10

    key = jax.random.PRNGKey(0)
    kp, ks, kv, kvn, kpar = jax.random.split(key, 5)
    p = jax.random.normal(kp, (B, p_dim), jnp.float32)
    s = jax.random.normal(ks, (B, T, C), jnp.float32)
    v = jax.random.normal(kv, (B, v_dim), jnp.float32)
    v_next = jax.random.normal(kvn, (B, v_dim), jnp.float32)

    params = init_params(kpar, s_dim=(T, C), p_dim=p_dim, v_dim=v_dim,
                         a_dim=a_dim, hidden_dim=hidden_dim,
                         rnn_hidden=rnn_hidden, depth=depth)

    fwd = jax.jit(driver_net_forward)
    out = jax.block_until_ready(fwd(p, s, v, v_next, params))

    assert out.shape == (B, a_dim), out.shape
    assert bool(jnp.all(jnp.isfinite(out))), "non-finite output"
    print("KERNEL_OK")
</pallas_src>

<mosaic_0001>
module attributes {stable_mosaic.version = 11 : i64} {
  func.func @_driver_net_kernel(%arg0: memref<64x16xf32, #tpu.memory_space<vmem>>, %arg1: memref<8x8xf32, #tpu.memory_space<vmem>>, %arg2: memref<8x8xf32, #tpu.memory_space<vmem>>, %arg3: memref<8x8xf32, #tpu.memory_space<vmem>>, %arg4: memref<16x64xf32, #tpu.memory_space<vmem>>, %arg5: memref<1x64xf32, #tpu.memory_space<vmem>>, %arg6: memref<64x32xf32, #tpu.memory_space<vmem>>, %arg7: memref<1x32xf32, #tpu.memory_space<vmem>>, %arg8: memref<4x32x128xf32, #tpu.memory_space<vmem>>, %arg9: memref<4x32x128xf32, #tpu.memory_space<vmem>>, %arg10: memref<4x1x128xf32, #tpu.memory_space<vmem>>, %arg11: memref<256x32xf32, #tpu.memory_space<vmem>>, %arg12: memref<1x32xf32, #tpu.memory_space<vmem>>, %arg13: memref<32x32xf32, #tpu.memory_space<vmem>>, %arg14: memref<1x32xf32, #tpu.memory_space<vmem>>, %arg15: memref<32x32xf32, #tpu.memory_space<vmem>>, %arg16: memref<1x32xf32, #tpu.memory_space<vmem>>, %arg17: memref<32x32xf32, #tpu.memory_space<vmem>>, %arg18: memref<8x32xf32, #tpu.memory_space<vmem>>, %arg19: memref<8x32xf32, #tpu.memory_space<vmem>>, %arg20: memref<8x32xf32, #tpu.memory_space<vmem>>, %arg21: memref<1x32xf32, #tpu.memory_space<vmem>>, %arg22: memref<10x32x32xf32, #tpu.memory_space<vmem>>, %arg23: memref<10x1x32xf32, #tpu.memory_space<vmem>>, %arg24: memref<10x1x32xf32, #tpu.memory_space<vmem>>, %arg25: memref<32x16xf32, #tpu.memory_space<vmem>>, %arg26: memref<1x16xf32, #tpu.memory_space<vmem>>, %arg27: memref<8x16xf32, #tpu.memory_space<vmem>>, %arg28: memref<64x32xf32, #tpu.memory_space<vmem>>) attributes {dimension_semantics = [], scalar_prefetch = 0 : i64, scratch_operands = 1 : i64, tpu.core_type = #tpu.core_type<tc>} {
    %c0 = arith.constant 0 : index
    %c0_0 = arith.constant 0 : index
    %0 = vector.load %arg0[%c0, %c0_0] : memref<64x16xf32, #tpu.memory_space<vmem>>, vector<64x16xf32>
    %c0_1 = arith.constant 0 : index
    %c0_2 = arith.constant 0 : index
    %1 = vector.load %arg4[%c0_1, %c0_2] : memref<16x64xf32, #tpu.memory_space<vmem>>, vector<16x64xf32>
    %cst = arith.constant dense<0.000000e+00> : vector<64x64xf32>
    %2 = tpu.matmul %0, %1, %cst {dimension_numbers = #tpu.dot_dimension_numbers<[1], [0], [0], [1], [0, 0, 1, 1], [], []>} : vector<64x16xf32>, vector<16x64xf32>, vector<64x64xf32> -> vector<64x64xf32>
    %c0_3 = arith.constant 0 : index
    %c0_4 = arith.constant 0 : index
    %3 = vector.load %arg5[%c0_3, %c0_4] : memref<1x64xf32, #tpu.memory_space<vmem>>, vector<1x64xf32>
    %4 = vector.broadcast %3 : vector<1x64xf32> to vector<64x64xf32>
    %5 = arith.addf %2, %4 : vector<64x64xf32>
    %cst_5 = arith.constant 0.000000e+00 : f32
    %6 = vector.broadcast %cst_5 : f32 to vector<64x64xf32>
    %7 = arith.maximumf %5, %6 : vector<64x64xf32>
    %c0_6 = arith.constant 0 : index
    %c0_7 = arith.constant 0 : index
    %8 = vector.load %arg6[%c0_6, %c0_7] : memref<64x32xf32, #tpu.memory_space<vmem>>, vector<64x32xf32>
    %cst_8 = arith.constant dense<0.000000e+00> : vector<64x32xf32>
    %9 = tpu.matmul %7, %8, %cst_8 {dimension_numbers = #tpu.dot_dimension_numbers<[1], [0], [0], [1], [0, 0, 1, 1], [], []>} : vector<64x64xf32>, vector<64x32xf32>, vector<64x32xf32> -> vector<64x32xf32>
    %c0_9 = arith.constant 0 : index
    %c0_10 = arith.constant 0 : index
    %10 = vector.load %arg7[%c0_9, %c0_10] : memref<1x32xf32, #tpu.memory_space<vmem>>, vector<1x32xf32>
    %11 = vector.broadcast %10 : vector<1x32xf32> to vector<64x32xf32>
    %12 = arith.addf %9, %11 : vector<64x32xf32>
    %cst_11 = arith.constant 0.000000e+00 : f32
    %13 = vector.broadcast %cst_11 : f32 to vector<64x32xf32>
    %14 = arith.maximumf %12, %13 : vector<64x32xf32>
    %15 = tpu.iota {dimensions = array<i32: 1>} : vector<8x128xi32>
    %c64_i32 = arith.constant 64 : i32
    %16 = vector.broadcast %c64_i32 : i32 to vector<8x128xi32>
    %17 = arith.cmpi sge, %15, %16 : vector<8x128xi32>
    %c96_i32 = arith.constant 96 : i32
    %18 = vector.broadcast %c96_i32 : i32 to vector<8x128xi32>
    %19 = arith.cmpi slt, %15, %18 : vector<8x128xi32>
    %20 = arith.andi %17, %19 : vector<8x128xi1>
    %cst_12 = arith.constant 0.000000e+00 : f32
    %21 = vector.broadcast %cst_12 : f32 to vector<8x32xf32>
    %c0_13 = arith.constant 0 : index
    %c0_14 = arith.constant 0 : index
    %c0_15 = arith.constant 0 : index
    %22 = vector.load %arg8[%c0_13, %c0_14, %c0_15] : memref<4x32x128xf32, #tpu.memory_space<vmem>>, vector<1x32x128xf32>
    %23 = vector.shape_cast %22 : vector<1x32x128xf32> to vector<32x128xf32>
    %c0_16 = arith.constant 0 : index
    %c0_17 = arith.constant 0 : index
    %c0_18 = arith.constant 0 : index
    %24 = vector.load %arg9[%c0_16, %c0_17, %c0_18] : memref<4x32x128xf32, #tpu.memory_space<vmem>>, vector<1x32x128xf32>
    %25 = vector.shape_cast %24 : vector<1x32x128xf32> to vector<32x128xf32>
    %cst_19 = arith.constant dense<0.000000e+00> : vector<64x128xf32>
    %26 = tpu.matmul %14, %23, %cst_19 {dimension_numbers = #tpu.dot_dimension_numbers<[1], [0], [0], [1], [0, 0, 1, 1], [], []>} : vector<64x32xf32>, vector<32x128xf32>, vector<64x128xf32> -> vector<64x128xf32>
    %c0_20 = arith.constant 0 : index
    %c0_21 = arith.constant 0 : index
    %c0_22 = arith.constant 0 : index
    %27 = vector.load %arg10[%c0_20, %c0_21, %c0_22] : memref<4x1x128xf32, #tpu.memory_space<vmem>>, vector<1x1x128xf32>
    %28 = vector.shape_cast %27 : vector<1x1x128xf32> to vector<1x128xf32>
    %29 = vector.broadcast %28 : vector<1x128xf32> to vector<64x128xf32>
    %30 = arith.addf %26, %29 : vector<64x128xf32>
    %cst_23 = arith.constant 0.000000e+00 : f32
    %31 = vector.broadcast %cst_23 : f32 to vector<8x32xf32>
    %cst_24 = arith.constant 0.000000e+00 : f32
    %32 = vector.broadcast %cst_24 : f32 to vector<8x32xf32>
    %33 = vector.extract_strided_slice %30 {offsets = [0, 0], sizes = [8, 128], strides = [1, 1]} : vector<64x128xf32> to vector<8x128xf32>
    %cst_25 = arith.constant dense<0.000000e+00> : vector<8x128xf32>
    %34 = tpu.matmul %31, %25, %cst_25 {dimension_numbers = #tpu.dot_dimension_numbers<[1], [0], [0], [1], [0, 0, 1, 1], [], []>} : vector<8x32xf32>, vector<32x128xf32>, vector<8x128xf32> -> vector<8x128xf32>
    %35 = arith.addf %33, %34 : vector<8x128xf32>
    %36 = math.tanh %35 : vector<8x128xf32>
    %37 = arith.negf %35 : vector<8x128xf32>
    %38 = math.exp %37 : vector<8x128xf32>
    %cst_26 = arith.constant 1.000000e+00 : f32
    %39 = vector.broadcast %cst_26 : f32 to vector<8x128xf32>
    %40 = arith.addf %39, %38 : vector<8x128xf32>
    %41 = arith.divf %39, %40 : vector<8x128xf32>
    %42 = arith.select %20, %36, %41 : vector<8x128xi1>, vector<8x128xf32>
    %43 = vector.extract_strided_slice %42 {offsets = [0, 0], sizes = [8, 32], strides = [1, 1]} : vector<8x128xf32> to vector<8x32xf32>
    %44 = vector.extract_strided_slice %42 {offsets = [0, 32], sizes = [8, 32], strides = [1, 1]} : vector<8x128xf32> to vector<8x32xf32>
    %45 = vector.extract_strided_slice %42 {offsets = [0, 64], sizes = [8, 32], strides = [1, 1]} : vector<8x128xf32> to vector<8x32xf32>
    %46 = vector.extract_strided_slice %42 {offsets = [0, 96], sizes = [8, 32], strides = [1, 1]} : vector<8x128xf32> to vector<8x32xf32>
    %47 = arith.mulf %44, %32 : vector<8x32xf32>
    %48 = arith.mulf %43, %45 : vector<8x32xf32>
    %49 = arith.addf %47, %48 : vector<8x32xf32>
    %50 = math.tanh %49 : vector<8x32xf32>
    %51 = arith.mulf %46, %50 : vector<8x32xf32>
    %c0_27 = arith.constant 0 : index
    %c0_28 = arith.constant 0 : index
    %52 = vector.load %arg28[%c0_27, %c0_28] : memref<64x32xf32, #tpu.memory_space<vmem>>, vector<8x32xf32>
    tpu.vector_store %arg28[%c0_27, %c0_28], %51 {strides = array<i32>} : memref<64x32xf32, #tpu.memory_space<vmem>>, vector<8x32xf32>,
    %53 = vector.extract_strided_slice %30 {offsets = [8, 0], sizes = [8, 128], strides = [1, 1]} : vector<64x128xf32> to vector<8x128xf32>
    %cst_29 = arith.constant dense<0.000000e+00> : vector<8x128xf32>
    %54 = tpu.matmul %51, %25, %cst_29 {dimension_numbers = #tpu.dot_dimension_numbers<[1], [0], [0], [1], [0, 0, 1, 1], [], []>} : vector<8x32xf32>, vector<32x128xf32>, vector<8x128xf32> -> vector<8x128xf32>
    %55 = arith.addf %53, %54 : vector<8x128xf32>
    %56 = math.tanh %55 : vector<8x128xf32>
    %57 = arith.negf %55 : vector<8x128xf32>
    %58 = math.exp %57 : vector<8x128xf32>
    %cst_30 = arith.constant 1.000000e+00 : f32
    %59 = vector.broadcast %cst_30 : f32 to vector<8x128xf32>
    %60 = arith.addf %59, %58 : vector<8x128xf32>
    %61 = arith.divf %59, %60 : vector<8x128xf32>
    %62 = arith.select %20, %56, %61 : vector<8x128xi1>, vector<8x128xf32>
    %63 = vector.extract_strided_slice %62 {offsets = [0, 0], sizes = [8, 32], strides = [1, 1]} : vector<8x128xf32> to vector<8x32xf32>
    %64 = vector.extract_strided_slice %62 {offsets = [0, 32], sizes = [8, 32], strides = [1, 1]} : vector<8x128xf32> to vector<8x32xf32>
    %65 = vector.extract_strided_slice %62 {offsets = [0, 64], sizes = [8, 32], strides = [1, 1]} : vector<8x128xf32> to vector<8x32xf32>
    %66 = vector.extract_strided_slice %62 {offsets = [0, 96], sizes = [8, 32], strides = [1, 1]} : vector<8x128xf32> to vector<8x32xf32>
    %67 = arith.mulf %64, %49 : vector<8x32xf32>
    %68 = arith.mulf %63, %65 : vector<8x32xf32>
    %69 = arith.addf %67, %68 : vector<8x32xf32>
    %70 = math.tanh %69 : vector<8x32xf32>
    %71 = arith.mulf %66, %70 : vector<8x32xf32>
    %c8 = arith.constant 8 : index
    %c0_31 = arith.constant 0 : index
    %72 = vector.load %arg28[%c8, %c0_31] : memref<64x32xf32, #tpu.memory_space<vmem>>, vector<8x32xf32>
    tpu.vector_store %arg28[%c8, %c0_31], %71 {strides = array<i32>} : memref<64x32xf32, #tpu.memory_space<vmem>>, vector<8x32xf32>,
    %73 = vector.extract_strided_slice %30 {offsets = [16, 0], sizes = [8, 128], strides = [1, 1]} : vector<64x128xf32> to vector<8x128xf32>
    %cst_32 = arith.constant dense<0.000000e+00> : vector<8x128xf32>
    %74 = tpu.matmul %71, %25, %cst_32 {dimension_numbers = #tpu.dot_dimension_numbers<[1], [0], [0], [1], [0, 0, 1, 1], [], []>} : vector<8x32xf32>, vector<32x128xf32>, vector<8x128xf32> -> vector<8x128xf32>
    %75 = arith.addf %73, %74 : vector<8x128xf32>
    %76 = math.tanh %75 : vector<8x128xf32>
    %77 = arith.negf %75 : vector<8x128xf32>
    %78 = math.exp %77 : vector<8x128xf32>
    %cst_33 = arith.constant 1.000000e+00 : f32
    %79 = vector.broadcast %cst_33 : f32 to vector<8x128xf32>
    %80 = arith.addf %79, %78 : vector<8x128xf32>
    %81 = arith.divf %79, %80 : vector<8x128xf32>
    %82 = arith.select %20, %76, %81 : vector<8x128xi1>, vector<8x128xf32>
    %83 = vector.extract_strided_slice %82 {offsets = [0, 0], sizes = [8, 32], strides = [1, 1]} : vector<8x128xf32> to vector<8x32xf32>
    %84 = vector.extract_strided_slice %82 {offsets = [0, 32], sizes = [8, 32], strides = [1, 1]} : vector<8x128xf32> to vector<8x32xf32>
    %85 = vector.extract_strided_slice %82 {offsets = [0, 64], sizes = [8, 32], strides = [1, 1]} : vector<8x128xf32> to vector<8x32xf32>
    %86 = vector.extract_strided_slice %82 {offsets = [0, 96], sizes = [8, 32], strides = [1, 1]} : vector<8x128xf32> to vector<8x32xf32>
    %87 = arith.mulf %84, %69 : vector<8x32xf32>
    %88 = arith.mulf %83, %85 : vector<8x32xf32>
    %89 = arith.addf %87, %88 : vector<8x32xf32>
    %90 = math.tanh %89 : vector<8x32xf32>
    %91 = arith.mulf %86, %90 : vector<8x32xf32>
    %c16 = arith.constant 16 : index
    %c0_34 = arith.constant 0 : index
    %92 = vector.load %arg28[%c16, %c0_34] : memref<64x32xf32, #tpu.memory_space<vmem>>, vector<8x32xf32>
    tpu.vector_store %arg28[%c16, %c0_34], %91 {strides = array<i32>} : memref<64x32xf32, #tpu.memory_space<vmem>>, vector<8x32xf32>,
    %93 = vector.extract_strided_slice %30 {offsets = [24, 0], sizes = [8, 128], strides = [1, 1]} : vector<64x128xf32> to vector<8x128xf32>
    %cst_35 = arith.constant dense<0.000000e+00> : vector<8x128xf32>
    %94 = tpu.matmul %91, %25, %cst_35 {dimension_numbers = #tpu.dot_dimension_numbers<[1], [0], [0], [1], [0, 0, 1, 1], [], []>} : vector<8x32xf32>, vector<32x128xf32>, vector<8x128xf32> -> vector<8x128xf32>
    %95 = arith.addf %93, %94 : vector<8x128xf32>
    %96 = math.tanh %95 : vector<8x128xf32>
    %97 = arith.negf %95 : vector<8x128xf32>
    %98 = math.exp %97 : vector<8x128xf32>
    %cst_36 = arith.constant 1.000000e+00 : f32
    %99 = vector.broadcast %cst_36 : f32 to vector<8x128xf32>
    %100 = arith.addf %99, %98 : vector<8x128xf32>
    %101 = arith.divf %99, %100 : vector<8x128xf32>
    %102 = arith.select %20, %96, %101 : vector<8x128xi1>, vector<8x128xf32>
    %103 = vector.extract_strided_slice %102 {offsets = [0, 0], sizes = [8, 32], strides = [1, 1]} : vector<8x128xf32> to vector<8x32xf32>
    %104 = vector.extract_strided_slice %102 {offsets = [0, 32], sizes = [8, 32], strides = [1, 1]} : vector<8x128xf32> to vector<8x32xf32>
    %105 = vector.extract_strided_slice %102 {offsets = [0, 64], sizes = [8, 32], strides = [1, 1]} : vector<8x128xf32> to vector<8x32xf32>
    %106 = vector.extract_strided_slice %102 {offsets = [0, 96], sizes = [8, 32], strides = [1, 1]} : vector<8x128xf32> to vector<8x32xf32>
    %107 = arith.mulf %104, %89 : vector<8x32xf32>
    %108 = arith.mulf %103, %105 : vector<8x32xf32>
    %109 = arith.addf %107, %108 : vector<8x32xf32>
    %110 = math.tanh %109 : vector<8x32xf32>
    %111 = arith.mulf %106, %110 : vector<8x32xf32>
    %c24 = arith.constant 24 : index
    %c0_37 = arith.constant 0 : index
    %112 = vector.load %arg28[%c24, %c0_37] : memref<64x32xf32, #tpu.memory_space<vmem>>, vector<8x32xf32>
    tpu.vector_store %arg28[%c24, %c0_37], %111 {strides = array<i32>} : memref<64x32xf32, #tpu.memory_space<vmem>>, vector<8x32xf32>,
    %113 = vector.extract_strided_slice %30 {offsets = [32, 0], sizes = [8, 128], strides = [1, 1]} : vector<64x128xf32> to vector<8x128xf32>
    %cst_38 = arith.constant dense<0.000000e+00> : vector<8x128xf32>
    %114 = tpu.matmul %111, %25, %cst_38 {dimension_numbers = #tpu.dot_dimension_numbers<[1], [0], [0], [1], [0, 0, 1, 1], [], []>} : vector<8x32xf32>, vector<32x128xf32>, vector<8x128xf32> -> vector<8x128xf32>
    %115 = arith.addf %113, %114 : vector<8x128xf32>
    %116 = math.tanh %115 : vector<8x128xf32>
    %117 = arith.negf %115 : vector<8x128xf32>
    %118 = math.exp %117 : vector<8x128xf32>
    %cst_39 = arith.constant 1.000000e+00 : f32
    %119 = vector.broadcast %cst_39 : f32 to vector<8x128xf32>
    %120 = arith.addf %119, %118 : vector<8x128xf32>
    %121 = arith.divf %119, %120 : vector<8x128xf32>
    %122 = arith.select %20, %116, %121 : vector<8x128xi1>, vector<8x128xf32>
    %123 = vector.extract_strided_slice %122 {offsets = [0, 0], sizes = [8, 32], strides = [1, 1]} : vector<8x128xf32> to vector<8x32xf32>
    %124 = vector.extract_strided_slice %122 {offsets = [0, 32], sizes = [8, 32], strides = [1, 1]} : vector<8x128xf32> to vector<8x32xf32>
    %125 = vector.extract_strided_slice %122 {offsets = [0, 64], sizes = [8, 32], strides = [1, 1]} : vector<8x128xf32> to vector<8x32xf32>
    %126 = vector.extract_strided_slice %122 {offsets = [0, 96], sizes = [8, 32], strides = [1, 1]} : vector<8x128xf32> to vector<8x32xf32>
    %127 = arith.mulf %124, %109 : vector<8x32xf32>
    %128 = arith.mulf %123, %125 : vector<8x32xf32>
    %129 = arith.addf %127, %128 : vector<8x32xf32>
    %130 = math.tanh %129 : vector<8x32xf32>
    %131 = arith.mulf %126, %130 : vector<8x32xf32>
    %c32 = arith.constant 32 : index
    %c0_40 = arith.constant 0 : index
    %132 = vector.load %arg28[%c32, %c0_40] : memref<64x32xf32, #tpu.memory_space<vmem>>, vector<8x32xf32>
    tpu.vector_store %arg28[%c32, %c0_40], %131 {strides = array<i32>} : memref<64x32xf32, #tpu.memory_space<vmem>>, vector<8x32xf32>,
    %133 = vector.extract_strided_slice %30 {offsets = [40, 0], sizes = [8, 128], strides = [1, 1]} : vector<64x128xf32> to vector<8x128xf32>
    %cst_41 = arith.constant dense<0.000000e+00> : vector<8x128xf32>
    %134 = tpu.matmul %131, %25, %cst_41 {dimension_numbers = #tpu.dot_dimension_numbers<[1], [0], [0], [1], [0, 0, 1, 1], [], []>} : vector<8x32xf32>, vector<32x128xf32>, vector<8x128xf32> -> vector<8x128xf32>
    %135 = arith.addf %133, %134 : vector<8x128xf32>
    %136 = math.tanh %135 : vector<8x128xf32>
    %137 = arith.negf %135 : vector<8x128xf32>
    %138 = math.exp %137 : vector<8x128xf32>
    %cst_42 = arith.constant 1.000000e+00 : f32
    %139 = vector.broadcast %cst_42 : f32 to vector<8x128xf32>
    %140 = arith.addf %139, %138 : vector<8x128xf32>
    %141 = arith.divf %139, %140 : vector<8x128xf32>
    %142 = arith.select %20, %136, %141 : vector<8x128xi1>, vector<8x128xf32>
    %143 = vector.extract_strided_slice %142 {offsets = [0, 0], sizes = [8, 32], strides = [1, 1]} : vector<8x128xf32> to vector<8x32xf32>
    %144 = vector.extract_strided_slice %142 {offsets = [0, 32], sizes = [8, 32], strides = [1, 1]} : vector<8x128xf32> to vector<8x32xf32>
    %145 = vector.extract_strided_slice %142 {offsets = [0, 64], sizes = [8, 32], strides = [1, 1]} : vector<8x128xf32> to vector<8x32xf32>
    %146 = vector.extract_strided_slice %142 {offsets = [0, 96], sizes = [8, 32], strides = [1, 1]} : vector<8x128xf32> to vector<8x32xf32>
    %147 = arith.mulf %144, %129 : vector<8x32xf32>
    %148 = arith.mulf %143, %145 : vector<8x32xf32>
    %149 = arith.addf %147, %148 : vector<8x32xf32>
    %150 = math.tanh %149 : vector<8x32xf32>
    %151 = arith.mulf %146, %150 : vector<8x32xf32>
    %c40 = arith.constant 40 : index
    %c0_43 = arith.constant 0 : index
    %152 = vector.load %arg28[%c40, %c0_43] : memref<64x32xf32, #tpu.memory_space<vmem>>, vector<8x32xf32>
    tpu.vector_store %arg28[%c40, %c0_43], %151 {strides = array<i32>} : memref<64x32xf32, #tpu.memory_space<vmem>>, vector<8x32xf32>,
    %153 = vector.extract_strided_slice %30 {offsets = [48, 0], sizes = [8, 128], strides = [1, 1]} : vector<64x128xf32> to vector<8x128xf32>
    %cst_44 = arith.constant dense<0.000000e+00> : vector<8x128xf32>
    %154 = tpu.matmul %151, %25, %cst_44 {dimension_numbers = #tpu.dot_dimension_numbers<[1], [0], [0], [1], [0, 0, 1, 1], [], []>} : vector<8x32xf32>, vector<32x128xf32>, vector<8x128xf32> -> vector<8x128xf32>
    %155 = arith.addf %153, %154 : vector<8x128xf32>
    %156 = math.tanh %155 : vector<8x128xf32>
    %157 = arith.negf %155 : vector<8x128xf32>
    %158 = math.exp %157 : vector<8x128xf32>
    %cst_45 = arith.constant 1.000000e+00 : f32
    %159 = vector.broadcast %cst_45 : f32 to vector<8x128xf32>
    %160 = arith.addf %159, %158 : vector<8x128xf32>
    %161 = arith.divf %159, %160 : vector<8x128xf32>
    %162 = arith.select %20, %156, %161 : vector<8x128xi1>, vector<8x128xf32>
    %163 = vector.extract_strided_slice %162 {offsets = [0, 0], sizes = [8, 32], strides = [1, 1]} : vector<8x128xf32> to vector<8x32xf32>
    %164 = vector.extract_strided_slice %162 {offsets = [0, 32], sizes = [8, 32], strides = [1, 1]} : vector<8x128xf32> to vector<8x32xf32>
    %165 = vector.extract_strided_slice %162 {offsets = [0, 64], sizes = [8, 32], strides = [1, 1]} : vector<8x128xf32> to vector<8x32xf32>
    %166 = vector.extract_strided_slice %162 {offsets = [0, 96], sizes = [8, 32], strides = [1, 1]} : vector<8x128xf32> to vector<8x32xf32>
    %167 = arith.mulf %164, %149 : vector<8x32xf32>
    %168 = arith.mulf %163, %165 : vector<8x32xf32>
    %169 = arith.addf %167, %168 : vector<8x32xf32>
    %170 = math.tanh %169 : vector<8x32xf32>
    %171 = arith.mulf %166, %170 : vector<8x32xf32>
    %c48 = arith.constant 48 : index
    %c0_46 = arith.constant 0 : index
    %172 = vector.load %arg28[%c48, %c0_46] : memref<64x32xf32, #tpu.memory_space<vmem>>, vector<8x32xf32>
    tpu.vector_store %arg28[%c48, %c0_46], %171 {strides = array<i32>} : memref<64x32xf32, #tpu.memory_space<vmem>>, vector<8x32xf32>,
    %173 = vector.extract_strided_slice %30 {offsets = [56, 0], sizes = [8, 128], strides = [1, 1]} : vector<64x128xf32> to vector<8x128xf32>
    %cst_47 = arith.constant dense<0.000000e+00> : vector<8x128xf32>
    %174 = tpu.matmul %171, %25, %cst_47 {dimension_numbers = #tpu.dot_dimension_numbers<[1], [0], [0], [1], [0, 0, 1, 1], [], []>} : vector<8x32xf32>, vector<32x128xf32>, vector<8x128xf32> -> vector<8x128xf32>
    %175 = arith.addf %173, %174 : vector<8x128xf32>
    %176 = math.tanh %175 : vector<8x128xf32>
    %177 = arith.negf %175 : vector<8x128xf32>
    %178 = math.exp %177 : vector<8x128xf32>
    %cst_48 = arith.constant 1.000000e+00 : f32
    %179 = vector.broadcast %cst_48 : f32 to vector<8x128xf32>
    %180 = arith.addf %179, %178 : vector<8x128xf32>
    %181 = arith.divf %179, %180 : vector<8x128xf32>
    %182 = arith.select %20, %176, %181 : vector<8x128xi1>, vector<8x128xf32>
    %183 = vector.extract_strided_slice %182 {offsets = [0, 0], sizes = [8, 32], strides = [1, 1]} : vector<8x128xf32> to vector<8x32xf32>
    %184 = vector.extract_strided_slice %182 {offsets = [0, 32], sizes = [8, 32], strides = [1, 1]} : vector<8x128xf32> to vector<8x32xf32>
    %185 = vector.extract_strided_slice %182 {offsets = [0, 64], sizes = [8, 32], strides = [1, 1]} : vector<8x128xf32> to vector<8x32xf32>
    %186 = vector.extract_strided_slice %182 {offsets = [0, 96], sizes = [8, 32], strides = [1, 1]} : vector<8x128xf32> to vector<8x32xf32>
    %187 = arith.mulf %184, %169 : vector<8x32xf32>
    %188 = arith.mulf %183, %185 : vector<8x32xf32>
    %189 = arith.addf %187, %188 : vector<8x32xf32>
    %190 = math.tanh %189 : vector<8x32xf32>
    %191 = arith.mulf %186, %190 : vector<8x32xf32>
    %c56 = arith.constant 56 : index
    %c0_49 = arith.constant 0 : index
    %192 = vector.load %arg28[%c56, %c0_49] : memref<64x32xf32, #tpu.memory_space<vmem>>, vector<8x32xf32>
    tpu.vector_store %arg28[%c56, %c0_49], %191 {strides = array<i32>} : memref<64x32xf32, #tpu.memory_space<vmem>>, vector<8x32xf32>,
    %c0_50 = arith.constant 0 : index
    %c0_51 = arith.constant 0 : index
    %193 = vector.load %arg28[%c0_50, %c0_51] : memref<64x32xf32, #tpu.memory_space<vmem>>, vector<64x32xf32>
    %c1 = arith.constant 1 : index
    %c0_52 = arith.constant 0 : index
    %c0_53 = arith.constant 0 : index
    %194 = vector.load %arg8[%c1, %c0_52, %c0_53] : memref<4x32x128xf32, #tpu.memory_space<vmem>>, vector<1x32x128xf32>
    %195 = vector.shape_cast %194 : vector<1x32x128xf32> to vector<32x128xf32>
    %c1_54 = arith.constant 1 : index
    %c0_55 = arith.constant 0 : index
    %c0_56 = arith.constant 0 : index
    %196 = vector.load %arg9[%c1_54, %c0_55, %c0_56] : memref<4x32x128xf32, #tpu.memory_space<vmem>>, vector<1x32x128xf32>
    %197 = vector.shape_cast %196 : vector<1x32x128xf32> to vector<32x128xf32>
    %cst_57 = arith.constant dense<0.000000e+00> : vector<64x128xf32>
    %198 = tpu.matmul %193, %195, %cst_57 {dimension_numbers = #tpu.dot_dimension_numbers<[1], [0], [0], [1], [0, 0, 1, 1], [], []>} : vector<64x32xf32>, vector<32x128xf32>, vector<64x128xf32> -> vector<64x128xf32>
    %c1_58 = arith.constant 1 : index
    %c0_59 = arith.constant 0 : index
    %c0_60 = arith.constant 0 : index
    %199 = vector.load %arg10[%c1_58, %c0_59, %c0_60] : memref<4x1x128xf32, #tpu.memory_space<vmem>>, vector<1x1x128xf32>
    %200 = vector.shape_cast %199 : vector<1x1x128xf32> to vector<1x128xf32>
    %201 = vector.broadcast %200 : vector<1x128xf32> to vector<64x128xf32>
    %202 = arith.addf %198, %201 : vector<64x128xf32>
    %cst_61 = arith.constant 0.000000e+00 : f32
    %203 = vector.broadcast %cst_61 : f32 to vector<8x32xf32>
    %cst_62 = arith.constant 0.000000e+00 : f32
    %204 = vector.broadcast %cst_62 : f32 to vector<8x32xf32>
    %205 = vector.extract_strided_slice %202 {offsets = [0, 0], sizes = [8, 128], strides = [1, 1]} : vector<64x128xf32> to vector<8x128xf32>
    %cst_63 = arith.constant dense<0.000000e+00> : vector<8x128xf32>
    %206 = tpu.matmul %203, %197, %cst_63 {dimension_numbers = #tpu.dot_dimension_numbers<[1], [0], [0], [1], [0, 0, 1, 1], [], []>} : vector<8x32xf32>, vector<32x128xf32>, vector<8x128xf32> -> vector<8x128xf32>
    %207 = arith.addf %205, %206 : vector<8x128xf32>
    %208 = math.tanh %207 : vector<8x128xf32>
    %209 = arith.negf %207 : vector<8x128xf32>
    %210 = math.exp %209 : vector<8x128xf32>
    %cst_64 = arith.constant 1.000000e+00 : f32
    %211 = vector.broadcast %cst_64 : f32 to vector<8x128xf32>
    %212 = arith.addf %211, %210 : vector<8x128xf32>
    %213 = arith.divf %211, %212 : vector<8x128xf32>
    %214 = arith.select %20, %208, %213 : vector<8x128xi1>, vector<8x128xf32>
    %215 = vector.extract_strided_slice %214 {offsets = [0, 0], sizes = [8, 32], strides = [1, 1]} : vector<8x128xf32> to vector<8x32xf32>
    %216 = vector.extract_strided_slice %214 {offsets = [0, 32], sizes = [8, 32], strides = [1, 1]} : vector<8x128xf32> to vector<8x32xf32>
    %217 = vector.extract_strided_slice %214 {offsets = [0, 64], sizes = [8, 32], strides = [1, 1]} : vector<8x128xf32> to vector<8x32xf32>
    %218 = vector.extract_strided_slice %214 {offsets = [0, 96], sizes = [8, 32], strides = [1, 1]} : vector<8x128xf32> to vector<8x32xf32>
    %219 = arith.mulf %216, %204 : vector<8x32xf32>
    %220 = arith.mulf %215, %217 : vector<8x32xf32>
    %221 = arith.addf %219, %220 : vector<8x32xf32>
    %222 = math.tanh %221 : vector<8x32xf32>
    %223 = arith.mulf %218, %222 : vector<8x32xf32>
    %c0_65 = arith.constant 0 : index
    %c0_66 = arith.constant 0 : index
    %224 = vector.load %arg28[%c0_65, %c0_66] : memref<64x32xf32, #tpu.memory_space<vmem>>, vector<8x32xf32>
    tpu.vector_store %arg28[%c0_65, %c0_66], %223 {strides = array<i32>} : memref<64x32xf32, #tpu.memory_space<vmem>>, vector<8x32xf32>,
    %225 = vector.extract_strided_slice %202 {offsets = [8, 0], sizes = [8, 128], strides = [1, 1]} : vector<64x128xf32> to vector<8x128xf32>
    %cst_67 = arith.constant dense<0.000000e+00> : vector<8x128xf32>
    %226 = tpu.matmul %223, %197, %cst_67 {dimension_numbers = #tpu.dot_dimension_numbers<[1], [0], [0], [1], [0, 0, 1, 1], [], []>} : vector<8x32xf32>, vector<32x128xf32>, vector<8x128xf32> -> vector<8x128xf32>
    %227 = arith.addf %225, %226 : vector<8x128xf32>
    %228 = math.tanh %227 : vector<8x128xf32>
    %229 = arith.negf %227 : vector<8x128xf32>
    %230 = math.exp %229 : vector<8x128xf32>
    %cst_68 = arith.constant 1.000000e+00 : f32
    %231 = vector.broadcast %cst_68 : f32 to vector<8x128xf32>
    %232 = arith.addf %231, %230 : vector<8x128xf32>
    %233 = arith.divf %231, %232 : vector<8x128xf32>
    %234 = arith.select %20, %228, %233 : vector<8x128xi1>, vector<8x128xf32>
    %235 = vector.extract_strided_slice %234 {offsets = [0, 0], sizes = [8, 32], strides = [1, 1]} : vector<8x128xf32> to vector<8x32xf32>
    %236 = vector.extract_strided_slice %234 {offsets = [0, 32], sizes = [8, 32], strides = [1, 1]} : vector<8x128xf32> to vector<8x32xf32>
    %237 = vector.extract_strided_slice %234 {offsets = [0, 64], sizes = [8, 32], strides = [1, 1]} : vector<8x128xf32> to vector<8x32xf32>
    %238 = vector.extract_strided_slice %234 {offsets = [0, 96], sizes = [8, 32], strides = [1, 1]} : vector<8x128xf32> to vector<8x32xf32>
    %239 = arith.mulf %236, %221 : vector<8x32xf32>
    %240 = arith.mulf %235, %237 : vector<8x32xf32>
    %241 = arith.addf %239, %240 : vector<8x32xf32>
    %242 = math.tanh %241 : vector<8x32xf32>
    %243 = arith.mulf %238, %242 : vector<8x32xf32>
    %c8_69 = arith.constant 8 : index
    %c0_70 = arith.constant 0 : index
    %244 = vector.load %arg28[%c8_69, %c0_70] : memref<64x32xf32, #tpu.memory_space<vmem>>, vector<8x32xf32>
    tpu.vector_store %arg28[%c8_69, %c0_70], %243 {strides = array<i32>} : memref<64x32xf32, #tpu.memory_space<vmem>>, vector<8x32xf32>,
    %245 = vector.extract_strided_slice %202 {offsets = [16, 0], sizes = [8, 128], strides = [1, 1]} : vector<64x128xf32> to vector<8x128xf32>
    %cst_71 = arith.constant dense<0.000000e+00> : vector<8x128xf32>
    %246 = tpu.matmul %243, %197, %cst_71 {dimension_numbers = #tpu.dot_dimension_numbers<[1], [0], [0], [1], [0, 0, 1, 1], [], []>} : vector<8x32xf32>, vector<32x128xf32>, vector<8x128xf32> -> vector<8x128xf32>
    %247 = arith.addf %245, %246 : vector<8x128xf32>
    %248 = math.tanh %247 : vector<8x128xf32>
    %249 = arith.negf %247 : vector<8x128xf32>
    %250 = math.exp %249 : vector<8x128xf32>
    %cst_72 = arith.constant 1.000000e+00 : f32
    %251 = vector.broadcast %cst_72 : f32 to vector<8x128xf32>
    %252 = arith.addf %251, %250 : vector<8x128xf32>
    %253 = arith.divf %251, %252 : vector<8x128xf32>
    %254 = arith.select %20, %248, %253 : vector<8x128xi1>, vector<8x128xf32>
    %255 = vector.extract_strided_slice %254 {offsets = [0, 0], sizes = [8, 32], strides = [1, 1]} : vector<8x128xf32> to vector<8x32xf32>
    %256 = vector.extract_strided_slice %254 {offsets = [0, 32], sizes = [8, 32], strides = [1, 1]} : vector<8x128xf32> to vector<8x32xf32>
    %257 = vector.extract_strided_slice %254 {offsets = [0, 64], sizes = [8, 32], strides = [1, 1]} : vector<8x128xf32> to vector<8x32xf32>
    %258 = vector.extract_strided_slice %254 {offsets = [0, 96], sizes = [8, 32], strides = [1, 1]} : vector<8x128xf32> to vector<8x32xf32>
    %259 = arith.mulf %256, %241 : vector<8x32xf32>
    %260 = arith.mulf %255, %257 : vector<8x32xf32>
    %261 = arith.addf %259, %260 : vector<8x32xf32>
    %262 = math.tanh %261 : vector<8x32xf32>
    %263 = arith.mulf %258, %262 : vector<8x32xf32>
    %c16_73 = arith.constant 16 : index
    %c0_74 = arith.constant 0 : index
    %264 = vector.load %arg28[%c16_73, %c0_74] : memref<64x32xf32, #tpu.memory_space<vmem>>, vector<8x32xf32>
    tpu.vector_store %arg28[%c16_73, %c0_74], %263 {strides = array<i32>} : memref<64x32xf32, #tpu.memory_space<vmem>>, vector<8x32xf32>,
    %265 = vector.extract_strided_slice %202 {offsets = [24, 0], sizes = [8, 128], strides = [1, 1]} : vector<64x128xf32> to vector<8x128xf32>
    %cst_75 = arith.constant dense<0.000000e+00> : vector<8x128xf32>
    %266 = tpu.matmul %263, %197, %cst_75 {dimension_numbers = #tpu.dot_dimension_numbers<[1], [0], [0], [1], [0, 0, 1, 1], [], []>} : vector<8x32xf32>, vector<32x128xf32>, vector<8x128xf32> -> vector<8x128xf32>
    %267 = arith.addf %265, %266 : vector<8x128xf32>
    %268 = math.tanh %267 : vector<8x128xf32>
    %269 = arith.negf %267 : vector<8x128xf32>
    %270 = math.exp %269 : vector<8x128xf32>
    %cst_76 = arith.constant 1.000000e+00 : f32
    %271 = vector.broadcast %cst_76 : f32 to vector<8x128xf32>
    %272 = arith.addf %271, %270 : vector<8x128xf32>
    %273 = arith.divf %271, %272 : vector<8x128xf32>
    %274 = arith.select %20, %268, %273 : vector<8x128xi1>, vector<8x128xf32>
    %275 = vector.extract_strided_slice %274 {offsets = [0, 0], sizes = [8, 32], strides = [1, 1]} : vector<8x128xf32> to vector<8x32xf32>
    %276 = vector.extract_strided_slice %274 {offsets = [0, 32], sizes = [8, 32], strides = [1, 1]} : vector<8x128xf32> to vector<8x32xf32>
    %277 = vector.extract_strided_slice %274 {offsets = [0, 64], sizes = [8, 32], strides = [1, 1]} : vector<8x128xf32> to vector<8x32xf32>
    %278 = vector.extract_strided_slice %274 {offsets = [0, 96], sizes = [8, 32], strides = [1, 1]} : vector<8x128xf32> to vector<8x32xf32>
    %279 = arith.mulf %276, %261 : vector<8x32xf32>
    %280 = arith.mulf %275, %277 : vector<8x32xf32>
    %281 = arith.addf %279, %280 : vector<8x32xf32>
    %282 = math.tanh %281 : vector<8x32xf32>
    %283 = arith.mulf %278, %282 : vector<8x32xf32>
    %c24_77 = arith.constant 24 : index
    %c0_78 = arith.constant 0 : index
    %284 = vector.load %arg28[%c24_77, %c0_78] : memref<64x32xf32, #tpu.memory_space<vmem>>, vector<8x32xf32>
    tpu.vector_store %arg28[%c24_77, %c0_78], %283 {strides = array<i32>} : memref<64x32xf32, #tpu.memory_space<vmem>>, vector<8x32xf32>,
    %285 = vector.extract_strided_slice %202 {offsets = [32, 0], sizes = [8, 128], strides = [1, 1]} : vector<64x128xf32> to vector<8x128xf32>
    %cst_79 = arith.constant dense<0.000000e+00> : vector<8x128xf32>
    %286 = tpu.matmul %283, %197, %cst_79 {dimension_numbers = #tpu.dot_dimension_numbers<[1], [0], [0], [1], [0, 0, 1, 1], [], []>} : vector<8x32xf32>, vector<32x128xf32>, vector<8x128xf32> -> vector<8x128xf32>
    %287 = arith.addf %285, %286 : vector<8x128xf32>
    %288 = math.tanh %287 : vector<8x128xf32>
    %289 = arith.negf %287 : vector<8x128xf32>
    %290 = math.exp %289 : vector<8x128xf32>
    %cst_80 = arith.constant 1.000000e+00 : f32
    %291 = vector.broadcast %cst_80 : f32 to vector<8x128xf32>
    %292 = arith.addf %291, %290 : vector<8x128xf32>
    %293 = arith.divf %291, %292 : vector<8x128xf32>
    %294 = arith.select %20, %288, %293 : vector<8x128xi1>, vector<8x128xf32>
    %295 = vector.extract_strided_slice %294 {offsets = [0, 0], sizes = [8, 32], strides = [1, 1]} : vector<8x128xf32> to vector<8x32xf32>
    %296 = vector.extract_strided_slice %294 {offsets = [0, 32], sizes = [8, 32], strides = [1, 1]} : vector<8x128xf32> to vector<8x32xf32>
    %297 = vector.extract_strided_slice %294 {offsets = [0, 64], sizes = [8, 32], strides = [1, 1]} : vector<8x128xf32> to vector<8x32xf32>
    %298 = vector.extract_strided_slice %294 {offsets = [0, 96], sizes = [8, 32], strides = [1, 1]} : vector<8x128xf32> to vector<8x32xf32>
    %299 = arith.mulf %296, %281 : vector<8x32xf32>
    %300 = arith.mulf %295, %297 : vector<8x32xf32>
    %301 = arith.addf %299, %300 : vector<8x32xf32>
    %302 = math.tanh %301 : vector<8x32xf32>
    %303 = arith.mulf %298, %302 : vector<8x32xf32>
    %c32_81 = arith.constant 32 : index
    %c0_82 = arith.constant 0 : index
    %304 = vector.load %arg28[%c32_81, %c0_82] : memref<64x32xf32, #tpu.memory_space<vmem>>, vector<8x32xf32>
    tpu.vector_store %arg28[%c32_81, %c0_82], %303 {strides = array<i32>} : memref<64x32xf32, #tpu.memory_space<vmem>>, vector<8x32xf32>,
    %305 = vector.extract_strided_slice %202 {offsets = [40, 0], sizes = [8, 128], strides = [1, 1]} : vector<64x128xf32> to vector<8x128xf32>
    %cst_83 = arith.constant dense<0.000000e+00> : vector<8x128xf32>
    %306 = tpu.matmul %303, %197, %cst_83 {dimension_numbers = #tpu.dot_dimension_numbers<[1], [0], [0], [1], [0, 0, 1, 1], [], []>} : vector<8x32xf32>, vector<32x128xf32>, vector<8x128xf32> -> vector<8x128xf32>
    %307 = arith.addf %305, %306 : vector<8x128xf32>
    %308 = math.tanh %307 : vector<8x128xf32>
    %309 = arith.negf %307 : vector<8x128xf32>
    %310 = math.exp %309 : vector<8x128xf32>
    %cst_84 = arith.constant 1.000000e+00 : f32
    %311 = vector.broadcast %cst_84 : f32 to vector<8x128xf32>
    %312 = arith.addf %311, %310 : vector<8x128xf32>
    %313 = arith.divf %311, %312 : vector<8x128xf32>
    %314 = arith.select %20, %308, %313 : vector<8x128xi1>, vector<8x128xf32>
    %315 = vector.extract_strided_slice %314 {offsets = [0, 0], sizes = [8, 32], strides = [1, 1]} : vector<8x128xf32> to vector<8x32xf32>
    %316 = vector.extract_strided_slice %314 {offsets = [0, 32], sizes = [8, 32], strides = [1, 1]} : vector<8x128xf32> to vector<8x32xf32>
    %317 = vector.extract_strided_slice %314 {offsets = [0, 64], sizes = [8, 32], strides = [1, 1]} : vector<8x128xf32> to vector<8x32xf32>
    %318 = vector.extract_strided_slice %314 {offsets = [0, 96], sizes = [8, 32], strides = [1, 1]} : vector<8x128xf32> to vector<8x32xf32>
    %319 = arith.mulf %316, %301 : vector<8x32xf32>
    %320 = arith.mulf %315, %317 : vector<8x32xf32>
    %321 = arith.addf %319, %320 : vector<8x32xf32>
    %322 = math.tanh %321 : vector<8x32xf32>
    %323 = arith.mulf %318, %322 : vector<8x32xf32>
    %c40_85 = arith.constant 40 : index
    %c0_86 = arith.constant 0 : index
    %324 = vector.load %arg28[%c40_85, %c0_86] : memref<64x32xf32, #tpu.memory_space<vmem>>, vector<8x32xf32>
    tpu.vector_store %arg28[%c40_85, %c0_86], %323 {strides = array<i32>} : memref<64x32xf32, #tpu.memory_space<vmem>>, vector<8x32xf32>,
    %325 = vector.extract_strided_slice %202 {offsets = [48, 0], sizes = [8, 128], strides = [1, 1]} : vector<64x128xf32> to vector<8x128xf32>
    %cst_87 = arith.constant dense<0.000000e+00> : vector<8x128xf32>
    %326 = tpu.matmul %323, %197, %cst_87 {dimension_numbers = #tpu.dot_dimension_numbers<[1], [0], [0], [1], [0, 0, 1, 1], [], []>} : vector<8x32xf32>, vector<32x128xf32>, vector<8x128xf32> -> vector<8x128xf32>
    %327 = arith.addf %325, %326 : vector<8x128xf32>
    %328 = math.tanh %327 : vector<8x128xf32>
    %329 = arith.negf %327 : vector<8x128xf32>
    %330 = math.exp %329 : vector<8x128xf32>
    %cst_88 = arith.constant 1.000000e+00 : f32
    %331 = vector.broadcast %cst_88 : f32 to vector<8x128xf32>
    %332 = arith.addf %331, %330 : vector<8x128xf32>
    %333 = arith.divf %331, %332 : vector<8x128xf32>
    %334 = arith.select %20, %328, %333 : vector<8x128xi1>, vector<8x128xf32>
    %335 = vector.extract_strided_slice %334 {offsets = [0, 0], sizes = [8, 32], strides = [1, 1]} : vector<8x128xf32> to vector<8x32xf32>
    %336 = vector.extract_strided_slice %334 {offsets = [0, 32], sizes = [8, 32], strides = [1, 1]} : vector<8x128xf32> to vector<8x32xf32>
    %337 = vector.extract_strided_slice %334 {offsets = [0, 64], sizes = [8, 32], strides = [1, 1]} : vector<8x128xf32> to vector<8x32xf32>
    %338 = vector.extract_strided_slice %334 {offsets = [0, 96], sizes = [8, 32], strides = [1, 1]} : vector<8x128xf32> to vector<8x32xf32>
    %339 = arith.mulf %336, %321 : vector<8x32xf32>
    %340 = arith.mulf %335, %337 : vector<8x32xf32>
    %341 = arith.addf %339, %340 : vector<8x32xf32>
    %342 = math.tanh %341 : vector<8x32xf32>
    %343 = arith.mulf %338, %342 : vector<8x32xf32>
    %c48_89 = arith.constant 48 : index
    %c0_90 = arith.constant 0 : index
    %344 = vector.load %arg28[%c48_89, %c0_90] : memref<64x32xf32, #tpu.memory_space<vmem>>, vector<8x32xf32>
    tpu.vector_store %arg28[%c48_89, %c0_90], %343 {strides = array<i32>} : memref<64x32xf32, #tpu.memory_space<vmem>>, vector<8x32xf32>,
    %345 = vector.extract_strided_slice %202 {offsets = [56, 0], sizes = [8, 128], strides = [1, 1]} : vector<64x128xf32> to vector<8x128xf32>
    %cst_91 = arith.constant dense<0.000000e+00> : vector<8x128xf32>
    %346 = tpu.matmul %343, %197, %cst_91 {dimension_numbers = #tpu.dot_dimension_numbers<[1], [0], [0], [1], [0, 0, 1, 1], [], []>} : vector<8x32xf32>, vector<32x128xf32>, vector<8x128xf32> -> vector<8x128xf32>
    %347 = arith.addf %345, %346 : vector<8x128xf32>
    %348 = math.tanh %347 : vector<8x128xf32>
    %349 = arith.negf %347 : vector<8x128xf32>
    %350 = math.exp %349 : vector<8x128xf32>
    %cst_92 = arith.constant 1.000000e+00 : f32
    %351 = vector.broadcast %cst_92 : f32 to vector<8x128xf32>
    %352 = arith.addf %351, %350 : vector<8x128xf32>
    %353 = arith.divf %351, %352 : vector<8x128xf32>
    %354 = arith.select %20, %348, %353 : vector<8x128xi1>, vector<8x128xf32>
    %355 = vector.extract_strided_slice %354 {offsets = [0, 0], sizes = [8, 32], strides = [1, 1]} : vector<8x128xf32> to vector<8x32xf32>
    %356 = vector.extract_strided_slice %354 {offsets = [0, 32], sizes = [8, 32], strides = [1, 1]} : vector<8x128xf32> to vector<8x32xf32>
    %357 = vector.extract_strided_slice %354 {offsets = [0, 64], sizes = [8, 32], strides = [1, 1]} : vector<8x128xf32> to vector<8x32xf32>
    %358 = vector.extract_strided_slice %354 {offsets = [0, 96], sizes = [8, 32], strides = [1, 1]} : vector<8x128xf32> to vector<8x32xf32>
    %359 = arith.mulf %356, %341 : vector<8x32xf32>
    %360 = arith.mulf %355, %357 : vector<8x32xf32>
    %361 = arith.addf %359, %360 : vector<8x32xf32>
    %362 = math.tanh %361 : vector<8x32xf32>
    %363 = arith.mulf %358, %362 : vector<8x32xf32>
    %c56_93 = arith.constant 56 : index
    %c0_94 = arith.constant 0 : index
    %364 = vector.load %arg28[%c56_93, %c0_94] : memref<64x32xf32, #tpu.memory_space<vmem>>, vector<8x32xf32>
    tpu.vector_store %arg28[%c56_93, %c0_94], %363 {strides = array<i32>} : memref<64x32xf32, #tpu.memory_space<vmem>>, vector<8x32xf32>,
    %c0_95 = arith.constant 0 : index
    %c0_96 = arith.constant 0 : index
    %365 = vector.load %arg28[%c0_95, %c0_96] : memref<64x32xf32, #tpu.memory_space<vmem>>, vector<64x32xf32>
    %c2 = arith.constant 2 : index
    %c0_97 = arith.constant 0 : index
    %c0_98 = arith.constant 0 : index
    %366 = vector.load %arg8[%c2, %c0_97, %c0_98] : memref<4x32x128xf32, #tpu.memory_space<vmem>>, vector<1x32x128xf32>
    %367 = vector.shape_cast %366 : vector<1x32x128xf32> to vector<32x128xf32>
    %c2_99 = arith.constant 2 : index
    %c0_100 = arith.constant 0 : index
    %c0_101 = arith.constant 0 : index
    %368 = vector.load %arg9[%c2_99, %c0_100, %c0_101] : memref<4x32x128xf32, #tpu.memory_space<vmem>>, vector<1x32x128xf32>
    %369 = vector.shape_cast %368 : vector<1x32x128xf32> to vector<32x128xf32>
    %cst_102 = arith.constant dense<0.000000e+00> : vector<64x128xf32>
    %370 = tpu.matmul %365, %367, %cst_102 {dimension_numbers = #tpu.dot_dimension_numbers<[1], [0], [0], [1], [0, 0, 1, 1], [], []>} : vector<64x32xf32>, vector<32x128xf32>, vector<64x128xf32> -> vector<64x128xf32>
    %c2_103 = arith.constant 2 : index
    %c0_104 = arith.constant 0 : index
    %c0_105 = arith.constant 0 : index
    %371 = vector.load %arg10[%c2_103, %c0_104, %c0_105] : memref<4x1x128xf32, #tpu.memory_space<vmem>>, vector<1x1x128xf32>
    %372 = vector.shape_cast %371 : vector<1x1x128xf32> to vector<1x128xf32>
    %373 = vector.broadcast %372 : vector<1x128xf32> to vector<64x128xf32>
    %374 = arith.addf %370, %373 : vector<64x128xf32>
    %cst_106 = arith.constant 0.000000e+00 : f32
    %375 = vector.broadcast %cst_106 : f32 to vector<8x32xf32>
    %cst_107 = arith.constant 0.000000e+00 : f32
    %376 = vector.broadcast %cst_107 : f32 to vector<8x32xf32>
    %377 = vector.extract_strided_slice %374 {offsets = [0, 0], sizes = [8, 128], strides = [1, 1]} : vector<64x128xf32> to vector<8x128xf32>
    %cst_108 = arith.constant dense<0.000000e+00> : vector<8x128xf32>
    %378 = tpu.matmul %375, %369, %cst_108 {dimension_numbers = #tpu.dot_dimension_numbers<[1], [0], [0], [1], [0, 0, 1, 1], [], []>} : vector<8x32xf32>, vector<32x128xf32>, vector<8x128xf32> -> vector<8x128xf32>
    %379 = arith.addf %377, %378 : vector<8x128xf32>
    %380 = math.tanh %379 : vector<8x128xf32>
    %381 = arith.negf %379 : vector<8x128xf32>
    %382 = math.exp %381 : vector<8x128xf32>
    %cst_109 = arith.constant 1.000000e+00 : f32
    %383 = vector.broadcast %cst_109 : f32 to vector<8x128xf32>
    %384 = arith.addf %383, %382 : vector<8x128xf32>
    %385 = arith.divf %383, %384 : vector<8x128xf32>
    %386 = arith.select %20, %380, %385 : vector<8x128xi1>, vector<8x128xf32>
    %387 = vector.extract_strided_slice %386 {offsets = [0, 0], sizes = [8, 32], strides = [1, 1]} : vector<8x128xf32> to vector<8x32xf32>
    %388 = vector.extract_strided_slice %386 {offsets = [0, 32], sizes = [8, 32], strides = [1, 1]} : vector<8x128xf32> to vector<8x32xf32>
    %389 = vector.extract_strided_slice %386 {offsets = [0, 64], sizes = [8, 32], strides = [1, 1]} : vector<8x128xf32> to vector<8x32xf32>
    %390 = vector.extract_strided_slice %386 {offsets = [0, 96], sizes = [8, 32], strides = [1, 1]} : vector<8x128xf32> to vector<8x32xf32>
    %391 = arith.mulf %388, %376 : vector<8x32xf32>
    %392 = arith.mulf %387, %389 : vector<8x32xf32>
    %393 = arith.addf %391, %392 : vector<8x32xf32>
    %394 = math.tanh %393 : vector<8x32xf32>
    %395 = arith.mulf %390, %394 : vector<8x32xf32>
    %c0_110 = arith.constant 0 : index
    %c0_111 = arith.constant 0 : index
    %396 = vector.load %arg28[%c0_110, %c0_111] : memref<64x32xf32, #tpu.memory_space<vmem>>, vector<8x32xf32>
    tpu.vector_store %arg28[%c0_110, %c0_111], %395 {strides = array<i32>} : memref<64x32xf32, #tpu.memory_space<vmem>>, vector<8x32xf32>,
    %397 = vector.extract_strided_slice %374 {offsets = [8, 0], sizes = [8, 128], strides = [1, 1]} : vector<64x128xf32> to vector<8x128xf32>
    %cst_112 = arith.constant dense<0.000000e+00> : vector<8x128xf32>
    %398 = tpu.matmul %395, %369, %cst_112 {dimension_numbers = #tpu.dot_dimension_numbers<[1], [0], [0], [1], [0, 0, 1, 1], [], []>} : vector<8x32xf32>, vector<32x128xf32>, vector<8x128xf32> -> vector<8x128xf32>
    %399 = arith.addf %397, %398 : vector<8x128xf32>
    %400 = math.tanh %399 : vector<8x128xf32>
    %401 = arith.negf %399 : vector<8x128xf32>
    %402 = math.exp %401 : vector<8x128xf32>
    %cst_113 = arith.constant 1.000000e+00 : f32
    %403 = vector.broadcast %cst_113 : f32 to vector<8x128xf32>
    %404 = arith.addf %403, %402 : vector<8x128xf32>
    %405 = arith.divf %403, %404 : vector<8x128xf32>
    %406 = arith.select %20, %400, %405 : vector<8x128xi1>, vector<8x128xf32>
    %407 = vector.extract_strided_slice %406 {offsets = [0, 0], sizes = [8, 32], strides = [1, 1]} : vector<8x128xf32> to vector<8x32xf32>
    %408 = vector.extract_strided_slice %406 {offsets = [0, 32], sizes = [8, 32], strides = [1, 1]} : vector<8x128xf32> to vector<8x32xf32>
    %409 = vector.extract_strided_slice %406 {offsets = [0, 64], sizes = [8, 32], strides = [1, 1]} : vector<8x128xf32> to vector<8x32xf32>
    %410 = vector.extract_strided_slice %406 {offsets = [0, 96], sizes = [8, 32], strides = [1, 1]} : vector<8x128xf32> to vector<8x32xf32>
    %411 = arith.mulf %408, %393 : vector<8x32xf32>
    %412 = arith.mulf %407, %409 : vector<8x32xf32>
    %413 = arith.addf %411, %412 : vector<8x32xf32>
    %414 = math.tanh %413 : vector<8x32xf32>
    %415 = arith.mulf %410, %414 : vector<8x32xf32>
    %c8_114 = arith.constant 8 : index
    %c0_115 = arith.constant 0 : index
    %416 = vector.load %arg28[%c8_114, %c0_115] : memref<64x32xf32, #tpu.memory_space<vmem>>, vector<8x32xf32>
    tpu.vector_store %arg28[%c8_114, %c0_115], %415 {strides = array<i32>} : memref<64x32xf32, #tpu.memory_space<vmem>>, vector<8x32xf32>,
    %417 = vector.extract_strided_slice %374 {offsets = [16, 0], sizes = [8, 128], strides = [1, 1]} : vector<64x128xf32> to vector<8x128xf32>
    %cst_116 = arith.constant dense<0.000000e+00> : vector<8x128xf32>
    %418 = tpu.matmul %415, %369, %cst_116 {dimension_numbers = #tpu.dot_dimension_numbers<[1], [0], [0], [1], [0, 0, 1, 1], [], []>} : vector<8x32xf32>, vector<32x128xf32>, vector<8x128xf32> -> vector<8x128xf32>
    %419 = arith.addf %417, %418 : vector<8x128xf32>
    %420 = math.tanh %419 : vector<8x128xf32>
    %421 = arith.negf %419 : vector<8x128xf32>
    %422 = math.exp %421 : vector<8x128xf32>
    %cst_117 = arith.constant 1.000000e+00 : f32
    %423 = vector.broadcast %cst_117 : f32 to vector<8x128xf32>
    %424 = arith.addf %423, %422 : vector<8x128xf32>
    %425 = arith.divf %423, %424 : vector<8x128xf32>
    %426 = arith.select %20, %420, %425 : vector<8x128xi1>, vector<8x128xf32>
    %427 = vector.extract_strided_slice %426 {offsets = [0, 0], sizes = [8, 32], strides = [1, 1]} : vector<8x128xf32> to vector<8x32xf32>
    %428 = vector.extract_strided_slice %426 {offsets = [0, 32], sizes = [8, 32], strides = [1, 1]} : vector<8x128xf32> to vector<8x32xf32>
    %429 = vector.extract_strided_slice %426 {offsets = [0, 64], sizes = [8, 32], strides = [1, 1]} : vector<8x128xf32> to vector<8x32xf32>
    %430 = vector.extract_strided_slice %426 {offsets = [0, 96], sizes = [8, 32], strides = [1, 1]} : vector<8x128xf32> to vector<8x32xf32>
    %431 = arith.mulf %428, %413 : vector<8x32xf32>
    %432 = arith.mulf %427, %429 : vector<8x32xf32>
    %433 = arith.addf %431, %432 : vector<8x32xf32>
    %434 = math.tanh %433 : vector<8x32xf32>
    %435 = arith.mulf %430, %434 : vector<8x32xf32>
    %c16_118 = arith.constant 16 : index
    %c0_119 = arith.constant 0 : index
    %436 = vector.load %arg28[%c16_118, %c0_119] : memref<64x32xf32, #tpu.memory_space<vmem>>, vector<8x32xf32>
    tpu.vector_store %arg28[%c16_118, %c0_119], %435 {strides = array<i32>} : memref<64x32xf32, #tpu.memory_space<vmem>>, vector<8x32xf32>,
    %437 = vector.extract_strided_slice %374 {offsets = [24, 0], sizes = [8, 128], strides = [1, 1]} : vector<64x128xf32> to vector<8x128xf32>
    %cst_120 = arith.constant dense<0.000000e+00> : vector<8x128xf32>
    %438 = tpu.matmul %435, %369, %cst_120 {dimension_numbers = #tpu.dot_dimension_numbers<[1], [0], [0], [1], [0, 0, 1, 1], [], []>} : vector<8x32xf32>, vector<32x128xf32>, vector<8x128xf32> -> vector<8x128xf32>
    %439 = arith.addf %437, %438 : vector<8x128xf32>
    %440 = math.tanh %439 : vector<8x128xf32>
    %441 = arith.negf %439 : vector<8x128xf32>
    %442 = math.exp %441 : vector<8x128xf32>
    %cst_121 = arith.constant 1.000000e+00 : f32
    %443 = vector.broadcast %cst_121 : f32 to vector<8x128xf32>
    %444 = arith.addf %443, %442 : vector<8x128xf32>
    %445 = arith.divf %443, %444 : vector<8x128xf32>
    %446 = arith.select %20, %440, %445 : vector<8x128xi1>, vector<8x128xf32>
    %447 = vector.extract_strided_slice %446 {offsets = [0, 0], sizes = [8, 32], strides = [1, 1]} : vector<8x128xf32> to vector<8x32xf32>
    %448 = vector.extract_strided_slice %446 {offsets = [0, 32], sizes = [8, 32], strides = [1, 1]} : vector<8x128xf32> to vector<8x32xf32>
    %449 = vector.extract_strided_slice %446 {offsets = [0, 64], sizes = [8, 32], strides = [1, 1]} : vector<8x128xf32> to vector<8x32xf32>
    %450 = vector.extract_strided_slice %446 {offsets = [0, 96], sizes = [8, 32], strides = [1, 1]} : vector<8x128xf32> to vector<8x32xf32>
    %451 = arith.mulf %448, %433 : vector<8x32xf32>
    %452 = arith.mulf %447, %449 : vector<8x32xf32>
    %453 = arith.addf %451, %452 : vector<8x32xf32>
    %454 = math.tanh %453 : vector<8x32xf32>
    %455 = arith.mulf %450, %454 : vector<8x32xf32>
    %c24_122 = arith.constant 24 : index
    %c0_123 = arith.constant 0 : index
    %456 = vector.load %arg28[%c24_122, %c0_123] : memref<64x32xf32, #tpu.memory_space<vmem>>, vector<8x32xf32>
    tpu.vector_store %arg28[%c24_122, %c0_123], %455 {strides = array<i32>} : memref<64x32xf32, #tpu.memory_space<vmem>>, vector<8x32xf32>,
    %457 = vector.extract_strided_slice %374 {offsets = [32, 0], sizes = [8, 128], strides = [1, 1]} : vector<64x128xf32> to vector<8x128xf32>
    %cst_124 = arith.constant dense<0.000000e+00> : vector<8x128xf32>
    %458 = tpu.matmul %455, %369, %cst_124 {dimension_numbers = #tpu.dot_dimension_numbers<[1], [0], [0], [1], [0, 0, 1, 1], [], []>} : vector<8x32xf32>, vector<32x128xf32>, vector<8x128xf32> -> vector<8x128xf32>
    %459 = arith.addf %457, %458 : vector<8x128xf32>
    %460 = math.tanh %459 : vector<8x128xf32>
    %461 = arith.negf %459 : vector<8x128xf32>
    %462 = math.exp %461 : vector<8x128xf32>
    %cst_125 = arith.constant 1.000000e+00 : f32
    %463 = vector.broadcast %cst_125 : f32 to vector<8x128xf32>
    %464 = arith.addf %463, %462 : vector<8x128xf32>
    %465 = arith.divf %463, %464 : vector<8x128xf32>
    %466 = arith.select %20, %460, %465 : vector<8x128xi1>, vector<8x128xf32>
    %467 = vector.extract_strided_slice %466 {offsets = [0, 0], sizes = [8, 32], strides = [1, 1]} : vector<8x128xf32> to vector<8x32xf32>
    %468 = vector.extract_strided_slice %466 {offsets = [0, 32], sizes = [8, 32], strides = [1, 1]} : vector<8x128xf32> to vector<8x32xf32>
    %469 = vector.extract_strided_slice %466 {offsets = [0, 64], sizes = [8, 32], strides = [1, 1]} : vector<8x128xf32> to vector<8x32xf32>
    %470 = vector.extract_strided_slice %466 {offsets = [0, 96], sizes = [8, 32], strides = [1, 1]} : vector<8x128xf32> to vector<8x32xf32>
    %471 = arith.mulf %468, %453 : vector<8x32xf32>
    %472 = arith.mulf %467, %469 : vector<8x32xf32>
    %473 = arith.addf %471, %472 : vector<8x32xf32>
    %474 = math.tanh %473 : vector<8x32xf32>
    %475 = arith.mulf %470, %474 : vector<8x32xf32>
    %c32_126 = arith.constant 32 : index
    %c0_127 = arith.constant 0 : index
    %476 = vector.load %arg28[%c32_126, %c0_127] : memref<64x32xf32, #tpu.memory_space<vmem>>, vector<8x32xf32>
    tpu.vector_store %arg28[%c32_126, %c0_127], %475 {strides = array<i32>} : memref<64x32xf32, #tpu.memory_space<vmem>>, vector<8x32xf32>,
    %477 = vector.extract_strided_slice %374 {offsets = [40, 0], sizes = [8, 128], strides = [1, 1]} : vector<64x128xf32> to vector<8x128xf32>
    %cst_128 = arith.constant dense<0.000000e+00> : vector<8x128xf32>
    %478 = tpu.matmul %475, %369, %cst_128 {dimension_numbers = #tpu.dot_dimension_numbers<[1], [0], [0], [1], [0, 0, 1, 1], [], []>} : vector<8x32xf32>, vector<32x128xf32>, vector<8x128xf32> -> vector<8x128xf32>
    %479 = arith.addf %477, %478 : vector<8x128xf32>
    %480 = math.tanh %479 : vector<8x128xf32>
    %481 = arith.negf %479 : vector<8x128xf32>
    %482 = math.exp %481 : vector<8x128xf32>
    %cst_129 = arith.constant 1.000000e+00 : f32
    %483 = vector.broadcast %cst_129 : f32 to vector<8x128xf32>
    %484 = arith.addf %483, %482 : vector<8x128xf32>
    %485 = arith.divf %483, %484 : vector<8x128xf32>
    %486 = arith.select %20, %480, %485 : vector<8x128xi1>, vector<8x128xf32>
    %487 = vector.extract_strided_slice %486 {offsets = [0, 0], sizes = [8, 32], strides = [1, 1]} : vector<8x128xf32> to vector<8x32xf32>
    %488 = vector.extract_strided_slice %486 {offsets = [0, 32], sizes = [8, 32], strides = [1, 1]} : vector<8x128xf32> to vector<8x32xf32>
    %489 = vector.extract_strided_slice %486 {offsets = [0, 64], sizes = [8, 32], strides = [1, 1]} : vector<8x128xf32> to vector<8x32xf32>
    %490 = vector.extract_strided_slice %486 {offsets = [0, 96], sizes = [8, 32], strides = [1, 1]} : vector<8x128xf32> to vector<8x32xf32>
    %491 = arith.mulf %488, %473 : vector<8x32xf32>
    %492 = arith.mulf %487, %489 : vector<8x32xf32>
    %493 = arith.addf %491, %492 : vector<8x32xf32>
    %494 = math.tanh %493 : vector<8x32xf32>
    %495 = arith.mulf %490, %494 : vector<8x32xf32>
    %c40_130 = arith.constant 40 : index
    %c0_131 = arith.constant 0 : index
    %496 = vector.load %arg28[%c40_130, %c0_131] : memref<64x32xf32, #tpu.memory_space<vmem>>, vector<8x32xf32>
    tpu.vector_store %arg28[%c40_130, %c0_131], %495 {strides = array<i32>} : memref<64x32xf32, #tpu.memory_space<vmem>>, vector<8x32xf32>,
    %497 = vector.extract_strided_slice %374 {offsets = [48, 0], sizes = [8, 128], strides = [1, 1]} : vector<64x128xf32> to vector<8x128xf32>
    %cst_132 = arith.constant dense<0.000000e+00> : vector<8x128xf32>
    %498 = tpu.matmul %495, %369, %cst_132 {dimension_numbers = #tpu.dot_dimension_numbers<[1], [0], [0], [1], [0, 0, 1, 1], [], []>} : vector<8x32xf32>, vector<32x128xf32>, vector<8x128xf32> -> vector<8x128xf32>
    %499 = arith.addf %497, %498 : vector<8x128xf32>
    %500 = math.tanh %499 : vector<8x128xf32>
    %501 = arith.negf %499 : vector<8x128xf32>
    %502 = math.exp %501 : vector<8x128xf32>
    %cst_133 = arith.constant 1.000000e+00 : f32
    %503 = vector.broadcast %cst_133 : f32 to vector<8x128xf32>
    %504 = arith.addf %503, %502 : vector<8x128xf32>
    %505 = arith.divf %503, %504 : vector<8x128xf32>
    %506 = arith.select %20, %500, %505 : vector<8x128xi1>, vector<8x128xf32>
    %507 = vector.extract_strided_slice %506 {offsets = [0, 0], sizes = [8, 32], strides = [1, 1]} : vector<8x128xf32> to vector<8x32xf32>
    %508 = vector.extract_strided_slice %506 {offsets = [0, 32], sizes = [8, 32], strides = [1, 1]} : vector<8x128xf32> to vector<8x32xf32>
    %509 = vector.extract_strided_slice %506 {offsets = [0, 64], sizes = [8, 32], strides = [1, 1]} : vector<8x128xf32> to vector<8x32xf32>
    %510 = vector.extract_strided_slice %506 {offsets = [0, 96], sizes = [8, 32], strides = [1, 1]} : vector<8x128xf32> to vector<8x32xf32>
    %511 = arith.mulf %508, %493 : vector<8x32xf32>
    %512 = arith.mulf %507, %509 : vector<8x32xf32>
    %513 = arith.addf %511, %512 : vector<8x32xf32>
    %514 = math.tanh %513 : vector<8x32xf32>
    %515 = arith.mulf %510, %514 : vector<8x32xf32>
    %c48_134 = arith.constant 48 : index
    %c0_135 = arith.constant 0 : index
    %516 = vector.load %arg28[%c48_134, %c0_135] : memref<64x32xf32, #tpu.memory_space<vmem>>, vector<8x32xf32>
    tpu.vector_store %arg28[%c48_134, %c0_135], %515 {strides = array<i32>} : memref<64x32xf32, #tpu.memory_space<vmem>>, vector<8x32xf32>,
    %517 = vector.extract_strided_slice %374 {offsets = [56, 0], sizes = [8, 128], strides = [1, 1]} : vector<64x128xf32> to vector<8x128xf32>
    %cst_136 = arith.constant dense<0.000000e+00> : vector<8x128xf32>
    %518 = tpu.matmul %515, %369, %cst_136 {dimension_numbers = #tpu.dot_dimension_numbers<[1], [0], [0], [1], [0, 0, 1, 1], [], []>} : vector<8x32xf32>, vector<32x128xf32>, vector<8x128xf32> -> vector<8x128xf32>
    %519 = arith.addf %517, %518 : vector<8x128xf32>
    %520 = math.tanh %519 : vector<8x128xf32>
    %521 = arith.negf %519 : vector<8x128xf32>
    %522 = math.exp %521 : vector<8x128xf32>
    %cst_137 = arith.constant 1.000000e+00 : f32
    %523 = vector.broadcast %cst_137 : f32 to vector<8x128xf32>
    %524 = arith.addf %523, %522 : vector<8x128xf32>
    %525 = arith.divf %523, %524 : vector<8x128xf32>
    %526 = arith.select %20, %520, %525 : vector<8x128xi1>, vector<8x128xf32>
    %527 = vector.extract_strided_slice %526 {offsets = [0, 0], sizes = [8, 32], strides = [1, 1]} : vector<8x128xf32> to vector<8x32xf32>
    %528 = vector.extract_strided_slice %526 {offsets = [0, 32], sizes = [8, 32], strides = [1, 1]} : vector<8x128xf32> to vector<8x32xf32>
    %529 = vector.extract_strided_slice %526 {offsets = [0, 64], sizes = [8, 32], strides = [1, 1]} : vector<8x128xf32> to vector<8x32xf32>
    %530 = vector.extract_strided_slice %526 {offsets = [0, 96], sizes = [8, 32], strides = [1, 1]} : vector<8x128xf32> to vector<8x32xf32>
    %531 = arith.mulf %528, %513 : vector<8x32xf32>
    %532 = arith.mulf %527, %529 : vector<8x32xf32>
    %533 = arith.addf %531, %532 : vector<8x32xf32>
    %534 = math.tanh %533 : vector<8x32xf32>
    %535 = arith.mulf %530, %534 : vector<8x32xf32>
    %c56_138 = arith.constant 56 : index
    %c0_139 = arith.constant 0 : index
    %536 = vector.load %arg28[%c56_138, %c0_139] : memref<64x32xf32, #tpu.memory_space<vmem>>, vector<8x32xf32>
    tpu.vector_store %arg28[%c56_138, %c0_139], %535 {strides = array<i32>} : memref<64x32xf32, #tpu.memory_space<vmem>>, vector<8x32xf32>,
    %c0_140 = arith.constant 0 : index
    %c0_141 = arith.constant 0 : index
    %537 = vector.load %arg28[%c0_140, %c0_141] : memref<64x32xf32, #tpu.memory_space<vmem>>, vector<64x32xf32>
    %c3 = arith.constant 3 : index
    %c0_142 = arith.constant 0 : index
    %c0_143 = arith.constant 0 : index
    %538 = vector.load %arg8[%c3, %c0_142, %c0_143] : memref<4x32x128xf32, #tpu.memory_space<vmem>>, vector<1x32x128xf32>
    %539 = vector.shape_cast %538 : vector<1x32x128xf32> to vector<32x128xf32>
    %c3_144 = arith.constant 3 : index
    %c0_145 = arith.constant 0 : index
    %c0_146 = arith.constant 0 : index
    %540 = vector.load %arg9[%c3_144, %c0_145, %c0_146] : memref<4x32x128xf32, #tpu.memory_space<vmem>>, vector<1x32x128xf32>
    %541 = vector.shape_cast %540 : vector<1x32x128xf32> to vector<32x128xf32>
    %cst_147 = arith.constant dense<0.000000e+00> : vector<64x128xf32>
    %542 = tpu.matmul %537, %539, %cst_147 {dimension_numbers = #tpu.dot_dimension_numbers<[1], [0], [0], [1], [0, 0, 1, 1], [], []>} : vector<64x32xf32>, vector<32x128xf32>, vector<64x128xf32> -> vector<64x128xf32>
    %c3_148 = arith.constant 3 : index
    %c0_149 = arith.constant 0 : index
    %c0_150 = arith.constant 0 : index
    %543 = vector.load %arg10[%c3_148, %c0_149, %c0_150] : memref<4x1x128xf32, #tpu.memory_space<vmem>>, vector<1x1x128xf32>
    %544 = vector.shape_cast %543 : vector<1x1x128xf32> to vector<1x128xf32>
    %545 = vector.broadcast %544 : vector<1x128xf32> to vector<64x128xf32>
    %546 = arith.addf %542, %545 : vector<64x128xf32>
    %cst_151 = arith.constant 0.000000e+00 : f32
    %547 = vector.broadcast %cst_151 : f32 to vector<8x32xf32>
    %cst_152 = arith.constant 0.000000e+00 : f32
    %548 = vector.broadcast %cst_152 : f32 to vector<8x32xf32>
    %549 = vector.extract_strided_slice %546 {offsets = [0, 0], sizes = [8, 128], strides = [1, 1]} : vector<64x128xf32> to vector<8x128xf32>
    %cst_153 = arith.constant dense<0.000000e+00> : vector<8x128xf32>
    %550 = tpu.matmul %547, %541, %cst_153 {dimension_numbers = #tpu.dot_dimension_numbers<[1], [0], [0], [1], [0, 0, 1, 1], [], []>} : vector<8x32xf32>, vector<32x128xf32>, vector<8x128xf32> -> vector<8x128xf32>
    %551 = arith.addf %549, %550 : vector<8x128xf32>
    %552 = math.tanh %551 : vector<8x128xf32>
    %553 = arith.negf %551 : vector<8x128xf32>
    %554 = math.exp %553 : vector<8x128xf32>
    %cst_154 = arith.constant 1.000000e+00 : f32
    %555 = vector.broadcast %cst_154 : f32 to vector<8x128xf32>
    %556 = arith.addf %555, %554 : vector<8x128xf32>
    %557 = arith.divf %555, %556 : vector<8x128xf32>
    %558 = arith.select %20, %552, %557 : vector<8x128xi1>, vector<8x128xf32>
    %559 = vector.extract_strided_slice %558 {offsets = [0, 0], sizes = [8, 32], strides = [1, 1]} : vector<8x128xf32> to vector<8x32xf32>
    %560 = vector.extract_strided_slice %558 {offsets = [0, 32], sizes = [8, 32], strides = [1, 1]} : vector<8x128xf32> to vector<8x32xf32>
    %561 = vector.extract_strided_slice %558 {offsets = [0, 64], sizes = [8, 32], strides = [1, 1]} : vector<8x128xf32> to vector<8x32xf32>
    %562 = vector.extract_strided_slice %558 {offsets = [0, 96], sizes = [8, 32], strides = [1, 1]} : vector<8x128xf32> to vector<8x32xf32>
    %563 = arith.mulf %560, %548 : vector<8x32xf32>
    %564 = arith.mulf %559, %561 : vector<8x32xf32>
    %565 = arith.addf %563, %564 : vector<8x32xf32>
    %566 = math.tanh %565 : vector<8x32xf32>
    %567 = arith.mulf %562, %566 : vector<8x32xf32>
    %c0_155 = arith.constant 0 : index
    %c0_156 = arith.constant 0 : index
    %568 = vector.load %arg11[%c0_155, %c0_156] : memref<256x32xf32, #tpu.memory_space<vmem>>, vector<32x32xf32>
    %cst_157 = arith.constant dense<0.000000e+00> : vector<8x32xf32>
    %569 = tpu.matmul %567, %568, %cst_157 {dimension_numbers = #tpu.dot_dimension_numbers<[1], [0], [0], [1], [0, 0, 1, 1], [], []>} : vector<8x32xf32>, vector<32x32xf32>, vector<8x32xf32> -> vector<8x32xf32>
    %570 = arith.addf %21, %569 : vector<8x32xf32>
    %571 = vector.extract_strided_slice %546 {offsets = [8, 0], sizes = [8, 128], strides = [1, 1]} : vector<64x128xf32> to vector<8x128xf32>
    %cst_158 = arith.constant dense<0.000000e+00> : vector<8x128xf32>
    %572 = tpu.matmul %567, %541, %cst_158 {dimension_numbers = #tpu.dot_dimension_numbers<[1], [0], [0], [1], [0, 0, 1, 1], [], []>} : vector<8x32xf32>, vector<32x128xf32>, vector<8x128xf32> -> vector<8x128xf32>
    %573 = arith.addf %571, %572 : vector<8x128xf32>
    %574 = math.tanh %573 : vector<8x128xf32>
    %575 = arith.negf %573 : vector<8x128xf32>
    %576 = math.exp %575 : vector<8x128xf32>
    %cst_159 = arith.constant 1.000000e+00 : f32
    %577 = vector.broadcast %cst_159 : f32 to vector<8x128xf32>
    %578 = arith.addf %577, %576 : vector<8x128xf32>
    %579 = arith.divf %577, %578 : vector<8x128xf32>
    %580 = arith.select %20, %574, %579 : vector<8x128xi1>, vector<8x128xf32>
    %581 = vector.extract_strided_slice %580 {offsets = [0, 0], sizes = [8, 32], strides = [1, 1]} : vector<8x128xf32> to vector<8x32xf32>
    %582 = vector.extract_strided_slice %580 {offsets = [0, 32], sizes = [8, 32], strides = [1, 1]} : vector<8x128xf32> to vector<8x32xf32>
    %583 = vector.extract_strided_slice %580 {offsets = [0, 64], sizes = [8, 32], strides = [1, 1]} : vector<8x128xf32> to vector<8x32xf32>
    %584 = vector.extract_strided_slice %580 {offsets = [0, 96], sizes = [8, 32], strides = [1, 1]} : vector<8x128xf32> to vector<8x32xf32>
    %585 = arith.mulf %582, %565 : vector<8x32xf32>
    %586 = arith.mulf %581, %583 : vector<8x32xf32>
    %587 = arith.addf %585, %586 : vector<8x32xf32>
    %588 = math.tanh %587 : vector<8x32xf32>
    %589 = arith.mulf %584, %588 : vector<8x32xf32>
    %c32_160 = arith.constant 32 : index
    %c0_161 = arith.constant 0 : index
    %590 = vector.load %arg11[%c32_160, %c0_161] : memref<256x32xf32, #tpu.memory_space<vmem>>, vector<32x32xf32>
    %cst_162 = arith.constant dense<0.000000e+00> : vector<8x32xf32>
    %591 = tpu.matmul %589, %590, %cst_162 {dimension_numbers = #tpu.dot_dimension_numbers<[1], [0], [0], [1], [0, 0, 1, 1], [], []>} : vector<8x32xf32>, vector<32x32xf32>, vector<8x32xf32> -> vector<8x32xf32>
    %592 = arith.addf %570, %591 : vector<8x32xf32>
    %593 = vector.extract_strided_slice %546 {offsets = [16, 0], sizes = [8, 128], strides = [1, 1]} : vector<64x128xf32> to vector<8x128xf32>
    %cst_163 = arith.constant dense<0.000000e+00> : vector<8x128xf32>
    %594 = tpu.matmul %589, %541, %cst_163 {dimension_numbers = #tpu.dot_dimension_numbers<[1], [0], [0], [1], [0, 0, 1, 1], [], []>} : vector<8x32xf32>, vector<32x128xf32>, vector<8x128xf32> -> vector<8x128xf32>
    %595 = arith.addf %593, %594 : vector<8x128xf32>
    %596 = math.tanh %595 : vector<8x128xf32>
    %597 = arith.negf %595 : vector<8x128xf32>
    %598 = math.exp %597 : vector<8x128xf32>
    %cst_164 = arith.constant 1.000000e+00 : f32
    %599 = vector.broadcast %cst_164 : f32 to vector<8x128xf32>
    %600 = arith.addf %599, %598 : vector<8x128xf32>
    %601 = arith.divf %599, %600 : vector<8x128xf32>
    %602 = arith.select %20, %596, %601 : vector<8x128xi1>, vector<8x128xf32>
    %603 = vector.extract_strided_slice %602 {offsets = [0, 0], sizes = [8, 32], strides = [1, 1]} : vector<8x128xf32> to vector<8x32xf32>
    %604 = vector.extract_strided_slice %602 {offsets = [0, 32], sizes = [8, 32], strides = [1, 1]} : vector<8x128xf32> to vector<8x32xf32>
    %605 = vector.extract_strided_slice %602 {offsets = [0, 64], sizes = [8, 32], strides = [1, 1]} : vector<8x128xf32> to vector<8x32xf32>
    %606 = vector.extract_strided_slice %602 {offsets = [0, 96], sizes = [8, 32], strides = [1, 1]} : vector<8x128xf32> to vector<8x32xf32>
    %607 = arith.mulf %604, %587 : vector<8x32xf32>
    %608 = arith.mulf %603, %605 : vector<8x32xf32>
    %609 = arith.addf %607, %608 : vector<8x32xf32>
    %610 = math.tanh %609 : vector<8x32xf32>
    %611 = arith.mulf %606, %610 : vector<8x32xf32>
    %c64 = arith.constant 64 : index
    %c0_165 = arith.constant 0 : index
    %612 = vector.load %arg11[%c64, %c0_165] : memref<256x32xf32, #tpu.memory_space<vmem>>, vector<32x32xf32>
    %cst_166 = arith.constant dense<0.000000e+00> : vector<8x32xf32>
    %613 = tpu.matmul %611, %612, %cst_166 {dimension_numbers = #tpu.dot_dimension_numbers<[1], [0], [0], [1], [0, 0, 1, 1], [], []>} : vector<8x32xf32>, vector<32x32xf32>, vector<8x32xf32> -> vector<8x32xf32>
    %614 = arith.addf %592, %613 : vector<8x32xf32>
    %615 = vector.extract_strided_slice %546 {offsets = [24, 0], sizes = [8, 128], strides = [1, 1]} : vector<64x128xf32> to vector<8x128xf32>
    %cst_167 = arith.constant dense<0.000000e+00> : vector<8x128xf32>
    %616 = tpu.matmul %611, %541, %cst_167 {dimension_numbers = #tpu.dot_dimension_numbers<[1], [0], [0], [1], [0, 0, 1, 1], [], []>} : vector<8x32xf32>, vector<32x128xf32>, vector<8x128xf32> -> vector<8x128xf32>
    %617 = arith.addf %615, %616 : vector<8x128xf32>
    %618 = math.tanh %617 : vector<8x128xf32>
    %619 = arith.negf %617 : vector<8x128xf32>
    %620 = math.exp %619 : vector<8x128xf32>
    %cst_168 = arith.constant 1.000000e+00 : f32
    %621 = vector.broadcast %cst_168 : f32 to vector<8x128xf32>
    %622 = arith.addf %621, %620 : vector<8x128xf32>
    %623 = arith.divf %621, %622 : vector<8x128xf32>
    %624 = arith.select %20, %618, %623 : vector<8x128xi1>, vector<8x128xf32>
    %625 = vector.extract_strided_slice %624 {offsets = [0, 0], sizes = [8, 32], strides = [1, 1]} : vector<8x128xf32> to vector<8x32xf32>
    %626 = vector.extract_strided_slice %624 {offsets = [0, 32], sizes = [8, 32], strides = [1, 1]} : vector<8x128xf32> to vector<8x32xf32>
    %627 = vector.extract_strided_slice %624 {offsets = [0, 64], sizes = [8, 32], strides = [1, 1]} : vector<8x128xf32> to vector<8x32xf32>
    %628 = vector.extract_strided_slice %624 {offsets = [0, 96], sizes = [8, 32], strides = [1, 1]} : vector<8x128xf32> to vector<8x32xf32>
    %629 = arith.mulf %626, %609 : vector<8x32xf32>
    %630 = arith.mulf %625, %627 : vector<8x32xf32>
    %631 = arith.addf %629, %630 : vector<8x32xf32>
    %632 = math.tanh %631 : vector<8x32xf32>
    %633 = arith.mulf %628, %632 : vector<8x32xf32>
    %c96 = arith.constant 96 : index
    %c0_169 = arith.constant 0 : index
    %634 = vector.load %arg11[%c96, %c0_169] : memref<256x32xf32, #tpu.memory_space<vmem>>, vector<32x32xf32>
    %cst_170 = arith.constant dense<0.000000e+00> : vector<8x32xf32>
    %635 = tpu.matmul %633, %634, %cst_170 {dimension_numbers = #tpu.dot_dimension_numbers<[1], [0], [0], [1], [0, 0, 1, 1], [], []>} : vector<8x32xf32>, vector<32x32xf32>, vector<8x32xf32> -> vector<8x32xf32>
    %636 = arith.addf %614, %635 : vector<8x32xf32>
    %637 = vector.extract_strided_slice %546 {offsets = [32, 0], sizes = [8, 128], strides = [1, 1]} : vector<64x128xf32> to vector<8x128xf32>
    %cst_171 = arith.constant dense<0.000000e+00> : vector<8x128xf32>
    %638 = tpu.matmul %633, %541, %cst_171 {dimension_numbers = #tpu.dot_dimension_numbers<[1], [0], [0], [1], [0, 0, 1, 1], [], []>} : vector<8x32xf32>, vector<32x128xf32>, vector<8x128xf32> -> vector<8x128xf32>
    %639 = arith.addf %637, %638 : vector<8x128xf32>
    %640 = math.tanh %639 : vector<8x128xf32>
    %641 = arith.negf %639 : vector<8x128xf32>
    %642 = math.exp %641 : vector<8x128xf32>
    %cst_172 = arith.constant 1.000000e+00 : f32
    %643 = vector.broadcast %cst_172 : f32 to vector<8x128xf32>
    %644 = arith.addf %643, %642 : vector<8x128xf32>
    %645 = arith.divf %643, %644 : vector<8x128xf32>
    %646 = arith.select %20, %640, %645 : vector<8x128xi1>, vector<8x128xf32>
    %647 = vector.extract_strided_slice %646 {offsets = [0, 0], sizes = [8, 32], strides = [1, 1]} : vector<8x128xf32> to vector<8x32xf32>
    %648 = vector.extract_strided_slice %646 {offsets = [0, 32], sizes = [8, 32], strides = [1, 1]} : vector<8x128xf32> to vector<8x32xf32>
    %649 = vector.extract_strided_slice %646 {offsets = [0, 64], sizes = [8, 32], strides = [1, 1]} : vector<8x128xf32> to vector<8x32xf32>
    %650 = vector.extract_strided_slice %646 {offsets = [0, 96], sizes = [8, 32], strides = [1, 1]} : vector<8x128xf32> to vector<8x32xf32>
    %651 = arith.mulf %648, %631 : vector<8x32xf32>
    %652 = arith.mulf %647, %649 : vector<8x32xf32>
    %653 = arith.addf %651, %652 : vector<8x32xf32>
    %654 = math.tanh %653 : vector<8x32xf32>
    %655 = arith.mulf %650, %654 : vector<8x32xf32>
    %c128 = arith.constant 128 : index
    %c0_173 = arith.constant 0 : index
    %656 = vector.load %arg11[%c128, %c0_173] : memref<256x32xf32, #tpu.memory_space<vmem>>, vector<32x32xf32>
    %cst_174 = arith.constant dense<0.000000e+00> : vector<8x32xf32>
    %657 = tpu.matmul %655, %656, %cst_174 {dimension_numbers = #tpu.dot_dimension_numbers<[1], [0], [0], [1], [0, 0, 1, 1], [], []>} : vector<8x32xf32>, vector<32x32xf32>, vector<8x32xf32> -> vector<8x32xf32>
    %658 = arith.addf %636, %657 : vector<8x32xf32>
    %659 = vector.extract_strided_slice %546 {offsets = [40, 0], sizes = [8, 128], strides = [1, 1]} : vector<64x128xf32> to vector<8x128xf32>
    %cst_175 = arith.constant dense<0.000000e+00> : vector<8x128xf32>
    %660 = tpu.matmul %655, %541, %cst_175 {dimension_numbers = #tpu.dot_dimension_numbers<[1], [0], [0], [1], [0, 0, 1, 1], [], []>} : vector<8x32xf32>, vector<32x128xf32>, vector<8x128xf32> -> vector<8x128xf32>
    %661 = arith.addf %659, %660 : vector<8x128xf32>
    %662 = math.tanh %661 : vector<8x128xf32>
    %663 = arith.negf %661 : vector<8x128xf32>
    %664 = math.exp %663 : vector<8x128xf32>
    %cst_176 = arith.constant 1.000000e+00 : f32
    %665 = vector.broadcast %cst_176 : f32 to vector<8x128xf32>
    %666 = arith.addf %665, %664 : vector<8x128xf32>
    %667 = arith.divf %665, %666 : vector<8x128xf32>
    %668 = arith.select %20, %662, %667 : vector<8x128xi1>, vector<8x128xf32>
    %669 = vector.extract_strided_slice %668 {offsets = [0, 0], sizes = [8, 32], strides = [1, 1]} : vector<8x128xf32> to vector<8x32xf32>
    %670 = vector.extract_strided_slice %668 {offsets = [0, 32], sizes = [8, 32], strides = [1, 1]} : vector<8x128xf32> to vector<8x32xf32>
    %671 = vector.extract_strided_slice %668 {offsets = [0, 64], sizes = [8, 32], strides = [1, 1]} : vector<8x128xf32> to vector<8x32xf32>
    %672 = vector.extract_strided_slice %668 {offsets = [0, 96], sizes = [8, 32], strides = [1, 1]} : vector<8x128xf32> to vector<8x32xf32>
    %673 = arith.mulf %670, %653 : vector<8x32xf32>
    %674 = arith.mulf %669, %671 : vector<8x32xf32>
    %675 = arith.addf %673, %674 : vector<8x32xf32>
    %676 = math.tanh %675 : vector<8x32xf32>
    %677 = arith.mulf %672, %676 : vector<8x32xf32>
    %c160 = arith.constant 160 : index
    %c0_177 = arith.constant 0 : index
    %678 = vector.load %arg11[%c160, %c0_177] : memref<256x32xf32, #tpu.memory_space<vmem>>, vector<32x32xf32>
    %cst_178 = arith.constant dense<0.000000e+00> : vector<8x32xf32>
    %679 = tpu.matmul %677, %678, %cst_178 {dimension_numbers = #tpu.dot_dimension_numbers<[1], [0], [0], [1], [0, 0, 1, 1], [], []>} : vector<8x32xf32>, vector<32x32xf32>, vector<8x32xf32> -> vector<8x32xf32>
    %680 = arith.addf %658, %679 : vector<8x32xf32>
    %681 = vector.extract_strided_slice %546 {offsets = [48, 0], sizes = [8, 128], strides = [1, 1]} : vector<64x128xf32> to vector<8x128xf32>
    %cst_179 = arith.constant dense<0.000000e+00> : vector<8x128xf32>
    %682 = tpu.matmul %677, %541, %cst_179 {dimension_numbers = #tpu.dot_dimension_numbers<[1], [0], [0], [1], [0, 0, 1, 1], [], []>} : vector<8x32xf32>, vector<32x128xf32>, vector<8x128xf32> -> vector<8x128xf32>
    %683 = arith.addf %681, %682 : vector<8x128xf32>
    %684 = math.tanh %683 : vector<8x128xf32>
    %685 = arith.negf %683 : vector<8x128xf32>
    %686 = math.exp %685 : vector<8x128xf32>
    %cst_180 = arith.constant 1.000000e+00 : f32
    %687 = vector.broadcast %cst_180 : f32 to vector<8x128xf32>
    %688 = arith.addf %687, %686 : vector<8x128xf32>
    %689 = arith.divf %687, %688 : vector<8x128xf32>
    %690 = arith.select %20, %684, %689 : vector<8x128xi1>, vector<8x128xf32>
    %691 = vector.extract_strided_slice %690 {offsets = [0, 0], sizes = [8, 32], strides = [1, 1]} : vector<8x128xf32> to vector<8x32xf32>
    %692 = vector.extract_strided_slice %690 {offsets = [0, 32], sizes = [8, 32], strides = [1, 1]} : vector<8x128xf32> to vector<8x32xf32>
    %693 = vector.extract_strided_slice %690 {offsets = [0, 64], sizes = [8, 32], strides = [1, 1]} : vector<8x128xf32> to vector<8x32xf32>
    %694 = vector.extract_strided_slice %690 {offsets = [0, 96], sizes = [8, 32], strides = [1, 1]} : vector<8x128xf32> to vector<8x32xf32>
    %695 = arith.mulf %692, %675 : vector<8x32xf32>
    %696 = arith.mulf %691, %693 : vector<8x32xf32>
    %697 = arith.addf %695, %696 : vector<8x32xf32>
    %698 = math.tanh %697 : vector<8x32xf32>
    %699 = arith.mulf %694, %698 : vector<8x32xf32>
    %c192 = arith.constant 192 : index
    %c0_181 = arith.constant 0 : index
    %700 = vector.load %arg11[%c192, %c0_181] : memref<256x32xf32, #tpu.memory_space<vmem>>, vector<32x32xf32>
    %cst_182 = arith.constant dense<0.000000e+00> : vector<8x32xf32>
    %701 = tpu.matmul %699, %700, %cst_182 {dimension_numbers = #tpu.dot_dimension_numbers<[1], [0], [0], [1], [0, 0, 1, 1], [], []>} : vector<8x32xf32>, vector<32x32xf32>, vector<8x32xf32> -> vector<8x32xf32>
    %702 = arith.addf %680, %701 : vector<8x32xf32>
    %703 = vector.extract_strided_slice %546 {offsets = [56, 0], sizes = [8, 128], strides = [1, 1]} : vector<64x128xf32> to vector<8x128xf32>
    %cst_183 = arith.constant dense<0.000000e+00> : vector<8x128xf32>
    %704 = tpu.matmul %699, %541, %cst_183 {dimension_numbers = #tpu.dot_dimension_numbers<[1], [0], [0], [1], [0, 0, 1, 1], [], []>} : vector<8x32xf32>, vector<32x128xf32>, vector<8x128xf32> -> vector<8x128xf32>
    %705 = arith.addf %703, %704 : vector<8x128xf32>
    %706 = math.tanh %705 : vector<8x128xf32>
    %707 = arith.negf %705 : vector<8x128xf32>
    %708 = math.exp %707 : vector<8x128xf32>
    %cst_184 = arith.constant 1.000000e+00 : f32
    %709 = vector.broadcast %cst_184 : f32 to vector<8x128xf32>
    %710 = arith.addf %709, %708 : vector<8x128xf32>
    %711 = arith.divf %709, %710 : vector<8x128xf32>
    %712 = arith.select %20, %706, %711 : vector<8x128xi1>, vector<8x128xf32>
    %713 = vector.extract_strided_slice %712 {offsets = [0, 0], sizes = [8, 32], strides = [1, 1]} : vector<8x128xf32> to vector<8x32xf32>
    %714 = vector.extract_strided_slice %712 {offsets = [0, 32], sizes = [8, 32], strides = [1, 1]} : vector<8x128xf32> to vector<8x32xf32>
    %715 = vector.extract_strided_slice %712 {offsets = [0, 64], sizes = [8, 32], strides = [1, 1]} : vector<8x128xf32> to vector<8x32xf32>
    %716 = vector.extract_strided_slice %712 {offsets = [0, 96], sizes = [8, 32], strides = [1, 1]} : vector<8x128xf32> to vector<8x32xf32>
    %717 = arith.mulf %714, %697 : vector<8x32xf32>
    %718 = arith.mulf %713, %715 : vector<8x32xf32>
    %719 = arith.addf %717, %718 : vector<8x32xf32>
    %720 = math.tanh %719 : vector<8x32xf32>
    %721 = arith.mulf %716, %720 : vector<8x32xf32>
    %c224 = arith.constant 224 : index
    %c0_185 = arith.constant 0 : index
    %722 = vector.load %arg11[%c224, %c0_185] : memref<256x32xf32, #tpu.memory_space<vmem>>, vector<32x32xf32>
    %cst_186 = arith.constant dense<0.000000e+00> : vector<8x32xf32>
    %723 = tpu.matmul %721, %722, %cst_186 {dimension_numbers = #tpu.dot_dimension_numbers<[1], [0], [0], [1], [0, 0, 1, 1], [], []>} : vector<8x32xf32>, vector<32x32xf32>, vector<8x32xf32> -> vector<8x32xf32>
    %724 = arith.addf %702, %723 : vector<8x32xf32>
    %c0_187 = arith.constant 0 : index
    %c0_188 = arith.constant 0 : index
    %725 = vector.load %arg12[%c0_187, %c0_188] : memref<1x32xf32, #tpu.memory_space<vmem>>, vector<1x32xf32>
    %726 = vector.broadcast %725 : vector<1x32xf32> to vector<8x32xf32>
    %727 = arith.addf %724, %726 : vector<8x32xf32>
    %cst_189 = arith.constant 0.000000e+00 : f32
    %728 = vector.broadcast %cst_189 : f32 to vector<8x32xf32>
    %729 = arith.maximumf %727, %728 : vector<8x32xf32>
    %c0_190 = arith.constant 0 : index
    %c0_191 = arith.constant 0 : index
    %730 = vector.load %arg13[%c0_190, %c0_191] : memref<32x32xf32, #tpu.memory_space<vmem>>, vector<32x32xf32>
    %cst_192 = arith.constant dense<0.000000e+00> : vector<8x32xf32>
    %731 = tpu.matmul %729, %730, %cst_192 {dimension_numbers = #tpu.dot_dimension_numbers<[1], [0], [0], [1], [0, 0, 1, 1], [], []>} : vector<8x32xf32>, vector<32x32xf32>, vector<8x32xf32> -> vector<8x32xf32>
    %c0_193 = arith.constant 0 : index
    %c0_194 = arith.constant 0 : index
    %732 = vector.load %arg14[%c0_193, %c0_194] : memref<1x32xf32, #tpu.memory_space<vmem>>, vector<1x32xf32>
    %733 = vector.broadcast %732 : vector<1x32xf32> to vector<8x32xf32>
    %734 = arith.addf %731, %733 : vector<8x32xf32>
    %cst_195 = arith.constant 0.000000e+00 : f32
    %735 = vector.broadcast %cst_195 : f32 to vector<8x32xf32>
    %736 = arith.maximumf %734, %735 : vector<8x32xf32>
    %c0_196 = arith.constant 0 : index
    %c0_197 = arith.constant 0 : index
    %737 = vector.load %arg15[%c0_196, %c0_197] : memref<32x32xf32, #tpu.memory_space<vmem>>, vector<32x32xf32>
    %cst_198 = arith.constant dense<0.000000e+00> : vector<8x32xf32>
    %738 = tpu.matmul %736, %737, %cst_198 {dimension_numbers = #tpu.dot_dimension_numbers<[1], [0], [0], [1], [0, 0, 1, 1], [], []>} : vector<8x32xf32>, vector<32x32xf32>, vector<8x32xf32> -> vector<8x32xf32>
    %c0_199 = arith.constant 0 : index
    %c0_200 = arith.constant 0 : index
    %739 = vector.load %arg16[%c0_199, %c0_200] : memref<1x32xf32, #tpu.memory_space<vmem>>, vector<1x32xf32>
    %740 = vector.broadcast %739 : vector<1x32xf32> to vector<8x32xf32>
    %741 = arith.addf %738, %740 : vector<8x32xf32>
    %742 = math.tanh %741 : vector<8x32xf32>
    %c0_201 = arith.constant 0 : index
    %c0_202 = arith.constant 0 : index
    %743 = vector.load %arg17[%c0_201, %c0_202] : memref<32x32xf32, #tpu.memory_space<vmem>>, vector<32x32xf32>
    %cst_203 = arith.constant dense<0.000000e+00> : vector<8x32xf32>
    %744 = tpu.matmul %742, %743, %cst_203 {dimension_numbers = #tpu.dot_dimension_numbers<[1], [0], [0], [1], [0, 0, 1, 1], [], []>} : vector<8x32xf32>, vector<32x32xf32>, vector<8x32xf32> -> vector<8x32xf32>
    %c0_204 = arith.constant 0 : index
    %c0_205 = arith.constant 0 : index
    %745 = vector.load %arg1[%c0_204, %c0_205] : memref<8x8xf32, #tpu.memory_space<vmem>>, vector<8x8xf32>
    %c0_206 = arith.constant 0 : index
    %c0_207 = arith.constant 0 : index
    %746 = vector.load %arg18[%c0_206, %c0_207] : memref<8x32xf32, #tpu.memory_space<vmem>>, vector<8x32xf32>
    %cst_208 = arith.constant dense<0.000000e+00> : vector<8x32xf32>
    %747 = tpu.matmul %745, %746, %cst_208 {dimension_numbers = #tpu.dot_dimension_numbers<[1], [0], [0], [1], [0, 0, 1, 1], [], []>} : vector<8x8xf32>, vector<8x32xf32>, vector<8x32xf32> -> vector<8x32xf32>
    %748 = arith.addf %744, %747 : vector<8x32xf32>
    %c0_209 = arith.constant 0 : index
    %c0_210 = arith.constant 0 : index
    %749 = vector.load %arg2[%c0_209, %c0_210] : memref<8x8xf32, #tpu.memory_space<vmem>>, vector<8x8xf32>
    %c0_211 = arith.constant 0 : index
    %c0_212 = arith.constant 0 : index
    %750 = vector.load %arg19[%c0_211, %c0_212] : memref<8x32xf32, #tpu.memory_space<vmem>>, vector<8x32xf32>
    %cst_213 = arith.constant dense<0.000000e+00> : vector<8x32xf32>
    %751 = tpu.matmul %749, %750, %cst_213 {dimension_numbers = #tpu.dot_dimension_numbers<[1], [0], [0], [1], [0, 0, 1, 1], [], []>} : vector<8x8xf32>, vector<8x32xf32>, vector<8x32xf32> -> vector<8x32xf32>
    %752 = arith.addf %748, %751 : vector<8x32xf32>
    %c0_214 = arith.constant 0 : index
    %c0_215 = arith.constant 0 : index
    %753 = vector.load %arg3[%c0_214, %c0_215] : memref<8x8xf32, #tpu.memory_space<vmem>>, vector<8x8xf32>
    %c0_216 = arith.constant 0 : index
    %c0_217 = arith.constant 0 : index
    %754 = vector.load %arg20[%c0_216, %c0_217] : memref<8x32xf32, #tpu.memory_space<vmem>>, vector<8x32xf32>
    %cst_218 = arith.constant dense<0.000000e+00> : vector<8x32xf32>
    %755 = tpu.matmul %753, %754, %cst_218 {dimension_numbers = #tpu.dot_dimension_numbers<[1], [0], [0], [1], [0, 0, 1, 1], [], []>} : vector<8x8xf32>, vector<8x32xf32>, vector<8x32xf32> -> vector<8x32xf32>
    %756 = arith.addf %752, %755 : vector<8x32xf32>
    %c0_219 = arith.constant 0 : index
    %c0_220 = arith.constant 0 : index
    %757 = vector.load %arg21[%c0_219, %c0_220] : memref<1x32xf32, #tpu.memory_space<vmem>>, vector<1x32xf32>
    %758 = vector.broadcast %757 : vector<1x32xf32> to vector<8x32xf32>
    %759 = arith.addf %756, %758 : vector<8x32xf32>
    %cst_221 = arith.constant 0.000000e+00 : f32
    %760 = vector.broadcast %cst_221 : f32 to vector<8x32xf32>
    %761 = arith.maximumf %759, %760 : vector<8x32xf32>
    %c0_222 = arith.constant 0 : index
    %c0_223 = arith.constant 0 : index
    %c0_224 = arith.constant 0 : index
    %762 = vector.load %arg22[%c0_222, %c0_223, %c0_224] : memref<10x32x32xf32, #tpu.memory_space<vmem>>, vector<1x32x32xf32>
    %763 = vector.shape_cast %762 : vector<1x32x32xf32> to vector<32x32xf32>
    %cst_225 = arith.constant dense<0.000000e+00> : vector<8x32xf32>
    %764 = tpu.matmul %761, %763, %cst_225 {dimension_numbers = #tpu.dot_dimension_numbers<[1], [0], [0], [1], [0, 0, 1, 1], [], []>} : vector<8x32xf32>, vector<32x32xf32>, vector<8x32xf32> -> vector<8x32xf32>
    %c0_226 = arith.constant 0 : index
    %c0_227 = arith.constant 0 : index
    %c0_228 = arith.constant 0 : index
    %765 = vector.load %arg23[%c0_226, %c0_227, %c0_228] : memref<10x1x32xf32, #tpu.memory_space<vmem>>, vector<1x1x32xf32>
    %766 = vector.shape_cast %765 : vector<1x1x32xf32> to vector<1x32xf32>
    %767 = vector.broadcast %766 : vector<1x32xf32> to vector<8x32xf32>
    %768 = arith.addf %764, %767 : vector<8x32xf32>
    %c0_229 = arith.constant 0 : index
    %c0_230 = arith.constant 0 : index
    %c0_231 = arith.constant 0 : index
    %769 = vector.load %arg24[%c0_229, %c0_230, %c0_231] : memref<10x1x32xf32, #tpu.memory_space<vmem>>, vector<1x1x32xf32>
    %770 = vector.shape_cast %769 : vector<1x1x32xf32> to vector<1x32xf32>
    %cst_232 = arith.constant 0.000000e+00 : f32
    %771 = vector.broadcast %cst_232 : f32 to vector<8x32xf32>
    %772 = arith.maximumf %768, %771 : vector<8x32xf32>
    %773 = vector.broadcast %770 : vector<1x32xf32> to vector<8x32xf32>
    %774 = arith.mulf %773, %772 : vector<8x32xf32>
    %775 = arith.addf %761, %774 : vector<8x32xf32>
    %c1_233 = arith.constant 1 : index
    %c0_234 = arith.constant 0 : index
    %c0_235 = arith.constant 0 : index
    %776 = vector.load %arg22[%c1_233, %c0_234, %c0_235] : memref<10x32x32xf32, #tpu.memory_space<vmem>>, vector<1x32x32xf32>
    %777 = vector.shape_cast %776 : vector<1x32x32xf32> to vector<32x32xf32>
    %cst_236 = arith.constant dense<0.000000e+00> : vector<8x32xf32>
    %778 = tpu.matmul %775, %777, %cst_236 {dimension_numbers = #tpu.dot_dimension_numbers<[1], [0], [0], [1], [0, 0, 1, 1], [], []>} : vector<8x32xf32>, vector<32x32xf32>, vector<8x32xf32> -> vector<8x32xf32>
    %c1_237 = arith.constant 1 : index
    %c0_238 = arith.constant 0 : index
    %c0_239 = arith.constant 0 : index
    %779 = vector.load %arg23[%c1_237, %c0_238, %c0_239] : memref<10x1x32xf32, #tpu.memory_space<vmem>>, vector<1x1x32xf32>
    %780 = vector.shape_cast %779 : vector<1x1x32xf32> to vector<1x32xf32>
    %781 = vector.broadcast %780 : vector<1x32xf32> to vector<8x32xf32>
    %782 = arith.addf %778, %781 : vector<8x32xf32>
    %c1_240 = arith.constant 1 : index
    %c0_241 = arith.constant 0 : index
    %c0_242 = arith.constant 0 : index
    %783 = vector.load %arg24[%c1_240, %c0_241, %c0_242] : memref<10x1x32xf32, #tpu.memory_space<vmem>>, vector<1x1x32xf32>
    %784 = vector.shape_cast %783 : vector<1x1x32xf32> to vector<1x32xf32>
    %cst_243 = arith.constant 0.000000e+00 : f32
    %785 = vector.broadcast %cst_243 : f32 to vector<8x32xf32>
    %786 = arith.maximumf %782, %785 : vector<8x32xf32>
    %787 = vector.broadcast %784 : vector<1x32xf32> to vector<8x32xf32>
    %788 = arith.mulf %787, %786 : vector<8x32xf32>
    %789 = arith.addf %775, %788 : vector<8x32xf32>
    %c2_244 = arith.constant 2 : index
    %c0_245 = arith.constant 0 : index
    %c0_246 = arith.constant 0 : index
    %790 = vector.load %arg22[%c2_244, %c0_245, %c0_246] : memref<10x32x32xf32, #tpu.memory_space<vmem>>, vector<1x32x32xf32>
    %791 = vector.shape_cast %790 : vector<1x32x32xf32> to vector<32x32xf32>
    %cst_247 = arith.constant dense<0.000000e+00> : vector<8x32xf32>
    %792 = tpu.matmul %789, %791, %cst_247 {dimension_numbers = #tpu.dot_dimension_numbers<[1], [0], [0], [1], [0, 0, 1, 1], [], []>} : vector<8x32xf32>, vector<32x32xf32>, vector<8x32xf32> -> vector<8x32xf32>
    %c2_248 = arith.constant 2 : index
    %c0_249 = arith.constant 0 : index
    %c0_250 = arith.constant 0 : index
    %793 = vector.load %arg23[%c2_248, %c0_249, %c0_250] : memref<10x1x32xf32, #tpu.memory_space<vmem>>, vector<1x1x32xf32>
    %794 = vector.shape_cast %793 : vector<1x1x32xf32> to vector<1x32xf32>
    %795 = vector.broadcast %794 : vector<1x32xf32> to vector<8x32xf32>
    %796 = arith.addf %792, %795 : vector<8x32xf32>
    %c2_251 = arith.constant 2 : index
    %c0_252 = arith.constant 0 : index
    %c0_253 = arith.constant 0 : index
    %797 = vector.load %arg24[%c2_251, %c0_252, %c0_253] : memref<10x1x32xf32, #tpu.memory_space<vmem>>, vector<1x1x32xf32>
    %798 = vector.shape_cast %797 : vector<1x1x32xf32> to vector<1x32xf32>
    %cst_254 = arith.constant 0.000000e+00 : f32
    %799 = vector.broadcast %cst_254 : f32 to vector<8x32xf32>
    %800 = arith.maximumf %796, %799 : vector<8x32xf32>
    %801 = vector.broadcast %798 : vector<1x32xf32> to vector<8x32xf32>
    %802 = arith.mulf %801, %800 : vector<8x32xf32>
    %803 = arith.addf %789, %802 : vector<8x32xf32>
    %c3_255 = arith.constant 3 : index
    %c0_256 = arith.constant 0 : index
    %c0_257 = arith.constant 0 : index
    %804 = vector.load %arg22[%c3_255, %c0_256, %c0_257] : memref<10x32x32xf32, #tpu.memory_space<vmem>>, vector<1x32x32xf32>
    %805 = vector.shape_cast %804 : vector<1x32x32xf32> to vector<32x32xf32>
    %cst_258 = arith.constant dense<0.000000e+00> : vector<8x32xf32>
    %806 = tpu.matmul %803, %805, %cst_258 {dimension_numbers = #tpu.dot_dimension_numbers<[1], [0], [0], [1], [0, 0, 1, 1], [], []>} : vector<8x32xf32>, vector<32x32xf32>, vector<8x32xf32> -> vector<8x32xf32>
    %c3_259 = arith.constant 3 : index
    %c0_260 = arith.constant 0 : index
    %c0_261 = arith.constant 0 : index
    %807 = vector.load %arg23[%c3_259, %c0_260, %c0_261] : memref<10x1x32xf32, #tpu.memory_space<vmem>>, vector<1x1x32xf32>
    %808 = vector.shape_cast %807 : vector<1x1x32xf32> to vector<1x32xf32>
    %809 = vector.broadcast %808 : vector<1x32xf32> to vector<8x32xf32>
    %810 = arith.addf %806, %809 : vector<8x32xf32>
    %c3_262 = arith.constant 3 : index
    %c0_263 = arith.constant 0 : index
    %c0_264 = arith.constant 0 : index
    %811 = vector.load %arg24[%c3_262, %c0_263, %c0_264] : memref<10x1x32xf32, #tpu.memory_space<vmem>>, vector<1x1x32xf32>
    %812 = vector.shape_cast %811 : vector<1x1x32xf32> to vector<1x32xf32>
    %cst_265 = arith.constant 0.000000e+00 : f32
    %813 = vector.broadcast %cst_265 : f32 to vector<8x32xf32>
    %814 = arith.maximumf %810, %813 : vector<8x32xf32>
    %815 = vector.broadcast %812 : vector<1x32xf32> to vector<8x32xf32>
    %816 = arith.mulf %815, %814 : vector<8x32xf32>
    %817 = arith.addf %803, %816 : vector<8x32xf32>
    %c4 = arith.constant 4 : index
    %c0_266 = arith.constant 0 : index
    %c0_267 = arith.constant 0 : index
    %818 = vector.load %arg22[%c4, %c0_266, %c0_267] : memref<10x32x32xf32, #tpu.memory_space<vmem>>, vector<1x32x32xf32>
    %819 = vector.shape_cast %818 : vector<1x32x32xf32> to vector<32x32xf32>
    %cst_268 = arith.constant dense<0.000000e+00> : vector<8x32xf32>
    %820 = tpu.matmul %817, %819, %cst_268 {dimension_numbers = #tpu.dot_dimension_numbers<[1], [0], [0], [1], [0, 0, 1, 1], [], []>} : vector<8x32xf32>, vector<32x32xf32>, vector<8x32xf32> -> vector<8x32xf32>
    %c4_269 = arith.constant 4 : index
    %c0_270 = arith.constant 0 : index
    %c0_271 = arith.constant 0 : index
    %821 = vector.load %arg23[%c4_269, %c0_270, %c0_271] : memref<10x1x32xf32, #tpu.memory_space<vmem>>, vector<1x1x32xf32>
    %822 = vector.shape_cast %821 : vector<1x1x32xf32> to vector<1x32xf32>
    %823 = vector.broadcast %822 : vector<1x32xf32> to vector<8x32xf32>
    %824 = arith.addf %820, %823 : vector<8x32xf32>
    %c4_272 = arith.constant 4 : index
    %c0_273 = arith.constant 0 : index
    %c0_274 = arith.constant 0 : index
    %825 = vector.load %arg24[%c4_272, %c0_273, %c0_274] : memref<10x1x32xf32, #tpu.memory_space<vmem>>, vector<1x1x32xf32>
    %826 = vector.shape_cast %825 : vector<1x1x32xf32> to vector<1x32xf32>
    %cst_275 = arith.constant 0.000000e+00 : f32
    %827 = vector.broadcast %cst_275 : f32 to vector<8x32xf32>
    %828 = arith.maximumf %824, %827 : vector<8x32xf32>
    %829 = vector.broadcast %826 : vector<1x32xf32> to vector<8x32xf32>
    %830 = arith.mulf %829, %828 : vector<8x32xf32>
    %831 = arith.addf %817, %830 : vector<8x32xf32>
    %c5 = arith.constant 5 : index
    %c0_276 = arith.constant 0 : index
    %c0_277 = arith.constant 0 : index
    %832 = vector.load %arg22[%c5, %c0_276, %c0_277] : memref<10x32x32xf32, #tpu.memory_space<vmem>>, vector<1x32x32xf32>
    %833 = vector.shape_cast %832 : vector<1x32x32xf32> to vector<32x32xf32>
    %cst_278 = arith.constant dense<0.000000e+00> : vector<8x32xf32>
    %834 = tpu.matmul %831, %833, %cst_278 {dimension_numbers = #tpu.dot_dimension_numbers<[1], [0], [0], [1], [0, 0, 1, 1], [], []>} : vector<8x32xf32>, vector<32x32xf32>, vector<8x32xf32> -> vector<8x32xf32>
    %c5_279 = arith.constant 5 : index
    %c0_280 = arith.constant 0 : index
    %c0_281 = arith.constant 0 : index
    %835 = vector.load %arg23[%c5_279, %c0_280, %c0_281] : memref<10x1x32xf32, #tpu.memory_space<vmem>>, vector<1x1x32xf32>
    %836 = vector.shape_cast %835 : vector<1x1x32xf32> to vector<1x32xf32>
    %837 = vector.broadcast %836 : vector<1x32xf32> to vector<8x32xf32>
    %838 = arith.addf %834, %837 : vector<8x32xf32>
    %c5_282 = arith.constant 5 : index
    %c0_283 = arith.constant 0 : index
    %c0_284 = arith.constant 0 : index
    %839 = vector.load %arg24[%c5_282, %c0_283, %c0_284] : memref<10x1x32xf32, #tpu.memory_space<vmem>>, vector<1x1x32xf32>
    %840 = vector.shape_cast %839 : vector<1x1x32xf32> to vector<1x32xf32>
    %cst_285 = arith.constant 0.000000e+00 : f32
    %841 = vector.broadcast %cst_285 : f32 to vector<8x32xf32>
    %842 = arith.maximumf %838, %841 : vector<8x32xf32>
    %843 = vector.broadcast %840 : vector<1x32xf32> to vector<8x32xf32>
    %844 = arith.mulf %843, %842 : vector<8x32xf32>
    %845 = arith.addf %831, %844 : vector<8x32xf32>
    %c6 = arith.constant 6 : index
    %c0_286 = arith.constant 0 : index
    %c0_287 = arith.constant 0 : index
    %846 = vector.load %arg22[%c6, %c0_286, %c0_287] : memref<10x32x32xf32, #tpu.memory_space<vmem>>, vector<1x32x32xf32>
    %847 = vector.shape_cast %846 : vector<1x32x32xf32> to vector<32x32xf32>
    %cst_288 = arith.constant dense<0.000000e+00> : vector<8x32xf32>
    %848 = tpu.matmul %845, %847, %cst_288 {dimension_numbers = #tpu.dot_dimension_numbers<[1], [0], [0], [1], [0, 0, 1, 1], [], []>} : vector<8x32xf32>, vector<32x32xf32>, vector<8x32xf32> -> vector<8x32xf32>
    %c6_289 = arith.constant 6 : index
    %c0_290 = arith.constant 0 : index
    %c0_291 = arith.constant 0 : index
    %849 = vector.load %arg23[%c6_289, %c0_290, %c0_291] : memref<10x1x32xf32, #tpu.memory_space<vmem>>, vector<1x1x32xf32>
    %850 = vector.shape_cast %849 : vector<1x1x32xf32> to vector<1x32xf32>
    %851 = vector.broadcast %850 : vector<1x32xf32> to vector<8x32xf32>
    %852 = arith.addf %848, %851 : vector<8x32xf32>
    %c6_292 = arith.constant 6 : index
    %c0_293 = arith.constant 0 : index
    %c0_294 = arith.constant 0 : index
    %853 = vector.load %arg24[%c6_292, %c0_293, %c0_294] : memref<10x1x32xf32, #tpu.memory_space<vmem>>, vector<1x1x32xf32>
    %854 = vector.shape_cast %853 : vector<1x1x32xf32> to vector<1x32xf32>
    %cst_295 = arith.constant 0.000000e+00 : f32
    %855 = vector.broadcast %cst_295 : f32 to vector<8x32xf32>
    %856 = arith.maximumf %852, %855 : vector<8x32xf32>
    %857 = vector.broadcast %854 : vector<1x32xf32> to vector<8x32xf32>
    %858 = arith.mulf %857, %856 : vector<8x32xf32>
    %859 = arith.addf %845, %858 : vector<8x32xf32>
    %c7 = arith.constant 7 : index
    %c0_296 = arith.constant 0 : index
    %c0_297 = arith.constant 0 : index
    %860 = vector.load %arg22[%c7, %c0_296, %c0_297] : memref<10x32x32xf32, #tpu.memory_space<vmem>>, vector<1x32x32xf32>
    %861 = vector.shape_cast %860 : vector<1x32x32xf32> to vector<32x32xf32>
    %cst_298 = arith.constant dense<0.000000e+00> : vector<8x32xf32>
    %862 = tpu.matmul %859, %861, %cst_298 {dimension_numbers = #tpu.dot_dimension_numbers<[1], [0], [0], [1], [0, 0, 1, 1], [], []>} : vector<8x32xf32>, vector<32x32xf32>, vector<8x32xf32> -> vector<8x32xf32>
    %c7_299 = arith.constant 7 : index
    %c0_300 = arith.constant 0 : index
    %c0_301 = arith.constant 0 : index
    %863 = vector.load %arg23[%c7_299, %c0_300, %c0_301] : memref<10x1x32xf32, #tpu.memory_space<vmem>>, vector<1x1x32xf32>
    %864 = vector.shape_cast %863 : vector<1x1x32xf32> to vector<1x32xf32>
    %865 = vector.broadcast %864 : vector<1x32xf32> to vector<8x32xf32>
    %866 = arith.addf %862, %865 : vector<8x32xf32>
    %c7_302 = arith.constant 7 : index
    %c0_303 = arith.constant 0 : index
    %c0_304 = arith.constant 0 : index
    %867 = vector.load %arg24[%c7_302, %c0_303, %c0_304] : memref<10x1x32xf32, #tpu.memory_space<vmem>>, vector<1x1x32xf32>
    %868 = vector.shape_cast %867 : vector<1x1x32xf32> to vector<1x32xf32>
    %cst_305 = arith.constant 0.000000e+00 : f32
    %869 = vector.broadcast %cst_305 : f32 to vector<8x32xf32>
    %870 = arith.maximumf %866, %869 : vector<8x32xf32>
    %871 = vector.broadcast %868 : vector<1x32xf32> to vector<8x32xf32>
    %872 = arith.mulf %871, %870 : vector<8x32xf32>
    %873 = arith.addf %859, %872 : vector<8x32xf32>
    %c8_306 = arith.constant 8 : index
    %c0_307 = arith.constant 0 : index
    %c0_308 = arith.constant 0 : index
    %874 = vector.load %arg22[%c8_306, %c0_307, %c0_308] : memref<10x32x32xf32, #tpu.memory_space<vmem>>, vector<1x32x32xf32>
    %875 = vector.shape_cast %874 : vector<1x32x32xf32> to vector<32x32xf32>
    %cst_309 = arith.constant dense<0.000000e+00> : vector<8x32xf32>
    %876 = tpu.matmul %873, %875, %cst_309 {dimension_numbers = #tpu.dot_dimension_numbers<[1], [0], [0], [1], [0, 0, 1, 1], [], []>} : vector<8x32xf32>, vector<32x32xf32>, vector<8x32xf32> -> vector<8x32xf32>
    %c8_310 = arith.constant 8 : index
    %c0_311 = arith.constant 0 : index
    %c0_312 = arith.constant 0 : index
    %877 = vector.load %arg23[%c8_310, %c0_311, %c0_312] : memref<10x1x32xf32, #tpu.memory_space<vmem>>, vector<1x1x32xf32>
    %878 = vector.shape_cast %877 : vector<1x1x32xf32> to vector<1x32xf32>
    %879 = vector.broadcast %878 : vector<1x32xf32> to vector<8x32xf32>
    %880 = arith.addf %876, %879 : vector<8x32xf32>
    %c8_313 = arith.constant 8 : index
    %c0_314 = arith.constant 0 : index
    %c0_315 = arith.constant 0 : index
    %881 = vector.load %arg24[%c8_313, %c0_314, %c0_315] : memref<10x1x32xf32, #tpu.memory_space<vmem>>, vector<1x1x32xf32>
    %882 = vector.shape_cast %881 : vector<1x1x32xf32> to vector<1x32xf32>
    %cst_316 = arith.constant 0.000000e+00 : f32
    %883 = vector.broadcast %cst_316 : f32 to vector<8x32xf32>
    %884 = arith.maximumf %880, %883 : vector<8x32xf32>
    %885 = vector.broadcast %882 : vector<1x32xf32> to vector<8x32xf32>
    %886 = arith.mulf %885, %884 : vector<8x32xf32>
    %887 = arith.addf %873, %886 : vector<8x32xf32>
    %c9 = arith.constant 9 : index
    %c0_317 = arith.constant 0 : index
    %c0_318 = arith.constant 0 : index
    %888 = vector.load %arg22[%c9, %c0_317, %c0_318] : memref<10x32x32xf32, #tpu.memory_space<vmem>>, vector<1x32x32xf32>
    %889 = vector.shape_cast %888 : vector<1x32x32xf32> to vector<32x32xf32>
    %cst_319 = arith.constant dense<0.000000e+00> : vector<8x32xf32>
    %890 = tpu.matmul %887, %889, %cst_319 {dimension_numbers = #tpu.dot_dimension_numbers<[1], [0], [0], [1], [0, 0, 1, 1], [], []>} : vector<8x32xf32>, vector<32x32xf32>, vector<8x32xf32> -> vector<8x32xf32>
    %c9_320 = arith.constant 9 : index
    %c0_321 = arith.constant 0 : index
    %c0_322 = arith.constant 0 : index
    %891 = vector.load %arg23[%c9_320, %c0_321, %c0_322] : memref<10x1x32xf32, #tpu.memory_space<vmem>>, vector<1x1x32xf32>
    %892 = vector.shape_cast %891 : vector<1x1x32xf32> to vector<1x32xf32>
    %893 = vector.broadcast %892 : vector<1x32xf32> to vector<8x32xf32>
    %894 = arith.addf %890, %893 : vector<8x32xf32>
    %c9_323 = arith.constant 9 : index
    %c0_324 = arith.constant 0 : index
    %c0_325 = arith.constant 0 : index
    %895 = vector.load %arg24[%c9_323, %c0_324, %c0_325] : memref<10x1x32xf32, #tpu.memory_space<vmem>>, vector<1x1x32xf32>
    %896 = vector.shape_cast %895 : vector<1x1x32xf32> to vector<1x32xf32>
    %cst_326 = arith.constant 0.000000e+00 : f32
    %897 = vector.broadcast %cst_326 : f32 to vector<8x32xf32>
    %898 = arith.maximumf %894, %897 : vector<8x32xf32>
    %899 = vector.broadcast %896 : vector<1x32xf32> to vector<8x32xf32>
    %900 = arith.mulf %899, %898 : vector<8x32xf32>
    %901 = arith.addf %887, %900 : vector<8x32xf32>
    %c0_327 = arith.constant 0 : index
    %c0_328 = arith.constant 0 : index
    %902 = vector.load %arg25[%c0_327, %c0_328] : memref<32x16xf32, #tpu.memory_space<vmem>>, vector<32x16xf32>
    %cst_329 = arith.constant dense<0.000000e+00> : vector<8x16xf32>
    %903 = tpu.matmul %901, %902, %cst_329 {dimension_numbers = #tpu.dot_dimension_numbers<[1], [0], [0], [1], [0, 0, 1, 1], [], []>} : vector<8x32xf32>, vector<32x16xf32>, vector<8x16xf32> -> vector<8x16xf32>
    %c0_330 = arith.constant 0 : index
    %c0_331 = arith.constant 0 : index
    %904 = vector.load %arg26[%c0_330, %c0_331] : memref<1x16xf32, #tpu.memory_space<vmem>>, vector<1x16xf32>
    %905 = vector.broadcast %904 : vector<1x16xf32> to vector<8x16xf32>
    %906 = arith.addf %903, %905 : vector<8x16xf32>
    %c0_332 = arith.constant 0 : index
    %c0_333 = arith.constant 0 : index
    %907 = vector.load %arg27[%c0_332, %c0_333] : memref<8x16xf32, #tpu.memory_space<vmem>>, vector<8x16xf32>
    tpu.vector_store %arg27[%c0_332, %c0_333], %906 {strides = array<i32>} : memref<8x16xf32, #tpu.memory_space<vmem>>, vector<8x16xf32>,
    return
  }
}

</mosaic_0001>

<bundles_post_ra>
// kernel: driver_net_forward.1
= control target key start
LH: loop header
LB: loop body
LE: loop exit
PB: predicated region body
PF: predicated region fallthrough
CT: control target
= control target key end

     0   :  { %s10251_s0 = inlined_call_operand.vmem [shape: f32[64,16], index: 0, kind: input, shape index: {}]   ;;  %s10252_s1 = inlined_call_operand.vmem [shape: f32[8,8], index: 1, kind: input, shape index: {}]   ;;  %s10253_s2 = inlined_call_operand.vmem [shape: f32[8,8], index: 2, kind: input, shape index: {}]   ;;  %s10254_s3 = inlined_call_operand.vmem [shape: f32[8,8], index: 3, kind: input, shape index: {}]   ;;  %s10255_s4 = inlined_call_operand.vmem [shape: f32[16,64], index: 4, kind: input, shape index: {}]   ;;  %s10256_s5 = inlined_call_operand.vmem [shape: f32[1,64], index: 5, kind: input, shape index: {}]   ;;  %s10257_s6 = inlined_call_operand.vmem [shape: f32[64,32], index: 6, kind: input, shape index: {}]   ;;  %s10258_s7 = inlined_call_operand.hbm [shape: f32[1,32], index: 7, kind: input, shape index: {}]   ;;  %s10259_s8 = inlined_call_operand.vmem [shape: f32[4,32,128], index: 8, kind: input, shape index: {}]   ;;  %s10260_s9 = inlined_call_operand.vmem [shape: f32[4,32,128], index: 9, kind: input, shape index: {}]   ;;  %s10261_s10 = inlined_call_operand.vmem [shape: f32[4,1,128], index: 10, kind: input, shape index: {}]   ;;  %s10262_s11 = inlined_call_operand.vmem [shape: f32[256,32], index: 11, kind: input, shape index: {}]   ;;  %s10263_s12 = inlined_call_operand.hbm [shape: f32[1,32], index: 12, kind: input, shape index: {}]   ;;  %s10264_s13 = inlined_call_operand.vmem [shape: f32[32,32], index: 13, kind: input, shape index: {}]   ;;  %s10265_s14 = inlined_call_operand.hbm [shape: f32[1,32], index: 14, kind: input, shape index: {}]   ;;  %s10266_s15 = inlined_call_operand.hbm [shape: f32[32,32], index: 15, kind: input, shape index: {}]   ;;  %s10267_s16 = inlined_call_operand.hbm [shape: f32[1,32], index: 16, kind: input, shape index: {}]   ;;  %s10268_s17 = inlined_call_operand.vmem [shape: f32[32,32], index: 17, kind: input, shape index: {}]   ;;  %s10269_s18 = inlined_call_operand.hbm [shape: f32[8,32], index: 18, kind: input, shape index: {}]   ;;  %s10270_s19 = inlined_call_operand.hbm [shape: f32[8,32], index: 19, kind: input, shape index: {}]   ;;  %s10271_s20 = inlined_call_operand.hbm [shape: f32[8,32], index: 20, kind: input, shape index: {}]   ;;  %s10272_s21 = inlined_call_operand.hbm [shape: f32[1,32], index: 21, kind: input, shape index: {}]   ;;  %s10273_s22 = inlined_call_operand.vmem [shape: f32[10,32,32], index: 22, kind: input, shape index: {}]   ;;  %s10274_s23 = inlined_call_operand.vmem [shape: f32[10,1,32], index: 23, kind: input, shape index: {}]   ;;  %s10275_s24 = inlined_call_operand.vmem [shape: f32[10,1,32], index: 24, kind: input, shape index: {}]   ;;  %s10276_s25 = inlined_call_operand.vmem [shape: f32[32,16], index: 25, kind: input, shape index: {}]   ;;  %s10277_s26 = inlined_call_operand.vmem [shape: f32[1,16], index: 26, kind: input, shape index: {}]   ;;  %s10278_s27 = inlined_call_operand.vmem [shape: f32[8,16], index: 27, kind: output, shape index: {}]  }
   0x1   :  { %10287 = sst [smem:[#allocation22_spill]] %s10251_s0 }
   0x2   :  { %10288 = sst [smem:[#allocation23_spill]] %s10252_s1 }
   0x3   :  { %10289 = sst [smem:[#allocation24_spill]] %s10253_s2 }
   0x4   :  { %10290 = sst [smem:[#allocation25_spill]] %s10254_s3 }
   0x5   :  { %10291 = sst [smem:[#allocation26_spill]] %s10255_s4 }
   0x6   :  { %10292 = sst [smem:[#allocation27_spill]] %s10256_s5 }
   0x7   :  { %10293 = sst [smem:[#allocation28_spill]] %s10257_s6 }
   0x8   :  { %10294 = sst [smem:[#allocation29_spill]] %s10258_s7 }
   0x9   :  { %10295 = sst [smem:[#allocation30_spill]] %s10259_s8 }
   0xa   :  { %10296 = sst [smem:[#allocation31_spill]] %s10260_s9 }
   0xb   :  { %10297 = sst [smem:[#allocation32_spill]] %s10261_s10 }
   0xc   :  { %10298 = sst [smem:[#allocation33_spill]] %s10262_s11 }
   0xd   :  { %32 = vsyncpa [#allocation4], 0 }
   0xe   :  { %33 = vsyncpa [#allocation6], 0 }
   0xf   :  { %34 = vsyncpa [#allocation9], 0 }
  0x10   :  { %35 = vsyncpa [#allocation12], 0 }
  0x11   :  { %36 = vsyncpa [#allocation15], 0  ;;  %s8730_s7 = smov [#allocation5]   ;;  %s8731_s8 = smov [#allocation8]  }
  0x12   :  { %s75_s4 = sshll.u32 %s8730_s7, 4  ;;  %s96_s30 = sshll.u32 %s8731_s8, 4  ;;  %s76_s4 = int_to_ptr.vmem [resolvable:$true] %s75_s4  ;;  %s8886_s30 = int_to_ptr.vmem [resolvable:$true] %s96_s30 }
  0x13   :  { %s8522_s28 = scalar_lea.hbm %s10263_s12, 16 }
  0x14   :  { %p8523_p0 = scmp.ne.s32.totalorder %s10263_s12, %s8522_s28  ;;  %p8526_p1 = scmp.lt.u32.totalorder %s8522_s28, %s10263_s12 }
  0x16   :  { %p8528_p2 = pnand %p8526_p1, %p8523_p0 }
  0x18   :  { %8531 = shalt.err (!%p8528_p2)
}
  0x19   :  { %s8532_s6 = scalar_lea.vmem %s76_s4, 16  ;;  %s8536_s11 = scalar_lea.vmem %s76_s4, 32 }
  0x1a   :  { %p8533_p3 = scmp.ne.s32.totalorder %s76_s4, %s8532_s6  ;;  %p8537_p4 = scmp.lt.s32.totalorder %s76_s4, %s76_s4 }
  0x1b   :  { %p8538_p5 = scmp.lt.s32.totalorder %s8536_s11, %s8532_s6 }
  0x1d   :  { %p8539_p6 = por %p8538_p5, %p8537_p4 }
  0x1f   :  { %p8540_p7 = pnand %p8539_p6, %p8533_p3 }
  0x21   :  { %8543 = shalt.err (!%p8540_p7)
}
  0x22   :  { %78 = dma.hbm_to_vmem [thread:$0]  %s10263_s12, 16, %s76_s4, [#allocation6]  }
  0x23   :  { %s8544_s9 = scalar_lea.hbm %s10266_s15, 512 }
  0x24   :  { %p8545_p8 = scmp.ne.s32.totalorder %s10266_s15, %s8544_s9  ;;  %p8548_p9 = scmp.lt.u32.totalorder %s8544_s9, %s10266_s15 }
  0x26   :  { %p8550_p10 = pnand %p8548_p9, %p8545_p8 }
  0x28   :  { %8553 = shalt.err (!%p8550_p10)
}
  0x29   :  { %s8554_s29 = scalar_lea.vmem %s8886_s30, 512  ;;  %p8559_p12 = scmp.lt.s32.totalorder %s8886_s30, %s8886_s30 }
  0x2a   :  { %p8555_p11 = scmp.ne.s32.totalorder %s8886_s30, %s8554_s29  ;;  %p8560_p13 = scmp.lt.s32.totalorder %s8554_s29, %s8554_s29 }
  0x2c   :  { %p8561_p0 = por %p8560_p13, %p8559_p12 }
  0x2e   :  { %p8562_p1 = pnand %p8561_p0, %p8555_p11 }
  0x30   :  { %8565 = shalt.err (!%p8562_p1)
}
  0x31   :  { %s8732_s12 = smov 128   ;;  %s8733_s4 = smov 8  }
  0x32   :  { %102 = dma.hbm_to_vmem [thread:$0]  %s10266_s15, 512, %s8886_s30, [#allocation9], %s8732_s12, %s8732_s12, %s8733_s4  }
  0x33   :  { %s8734_s11 = smov [#allocation11]   ;;  %s8735_s3 = smov [#allocation14]  }
  0x34   :  { %s121_s2 = sshll.u32 %s8734_s11, 4  ;;  %s141_s7 = sshll.u32 %s8735_s3, 4  ;;  %s122_s2 = int_to_ptr.vmem [resolvable:$true] %s121_s2  ;;  %s142_s7 = int_to_ptr.vmem [resolvable:$true] %s141_s7 }
  0x35   :  { %s8566_s5 = scalar_lea.hbm %s10269_s18, 128 }
  0x36   :  { %p8567_p2 = scmp.ne.s32.totalorder %s10269_s18, %s8566_s5  ;;  %p8570_p3 = scmp.lt.u32.totalorder %s8566_s5, %s10269_s18 }
  0x38   :  { %p8572_p4 = pnand %p8570_p3, %p8567_p2 }
  0x3a   :  { %8575 = shalt.err (!%p8572_p4)
}
  0x3b   :  { %s8576_s15 = scalar_lea.vmem %s122_s2, 128  ;;  %p8581_p6 = scmp.lt.s32.totalorder %s122_s2, %s122_s2 }
  0x3c   :  { %p8577_p5 = scmp.ne.s32.totalorder %s122_s2, %s8576_s15  ;;  %p8582_p7 = scmp.lt.s32.totalorder %s8576_s15, %s8576_s15 }
  0x3e   :  { %p8583_p8 = por %p8582_p7, %p8581_p6 }
  0x40   :  { %p8584_p9 = pnand %p8583_p8, %p8577_p5 }
  0x42   :  { %8587 = shalt.err (!%p8584_p9)
}
  0x43   :  { %124 = dma.hbm_to_vmem [thread:$0]  %s10269_s18, 128, %s122_s2, [#allocation12]  }
  0x44   :  { %s8588_s6 = scalar_lea.hbm %s10271_s20, 128 }
  0x45   :  { %p8589_p10 = scmp.ne.s32.totalorder %s10271_s20, %s8588_s6  ;;  %p8592_p11 = scmp.lt.u32.totalorder %s8588_s6, %s10271_s20 }
  0x47   :  { %p8594_p12 = pnand %p8592_p11, %p8589_p10 }
  0x49   :  { %8597 = shalt.err (!%p8594_p12)
}
  0x4a   :  { %s8598_s5 = scalar_lea.vmem %s142_s7, 128  ;;  %p8603_p0 = scmp.lt.s32.totalorder %s142_s7, %s142_s7 }
  0x4b   :  { %p8599_p13 = scmp.ne.s32.totalorder %s142_s7, %s8598_s5  ;;  %p8604_p1 = scmp.lt.s32.totalorder %s8598_s5, %s8598_s5 }
  0x4d   :  { %p8605_p2 = por %p8604_p1, %p8603_p0 }
  0x4f   :  { %p8606_p3 = pnand %p8605_p2, %p8599_p13 }
  0x51   :  { %8609 = shalt.err (!%p8606_p3)
}
  0x52   :  { %144 = dma.hbm_to_vmem [thread:$0]  %s10271_s20, 128, %s142_s7, [#allocation15]  }
  0x53   :  { %s8736_s28 = smov [#allocation3]   ;;  %s8737_s10 = smov [#allocation7]  }
  0x54   :  { %s57_s0 = sshll.u32 %s8736_s28, 4  ;;  %s87_s29 = sshll.u32 %s8737_s10, 4  ;;  %s58_s0 = int_to_ptr.vmem [resolvable:$true] %s57_s0  ;;  %s88_s29 = int_to_ptr.vmem [resolvable:$true] %s87_s29 }
  0x55   :  { %s10299_s12 = sld [smem:[#allocation29_spill]] }
  0x5b   :  { %s8610_s4 = scalar_lea.hbm %s10299_s12, 16 }
  0x5c   :  { %p8611_p4 = scmp.ne.s32.totalorder %s10299_s12, %s8610_s4  ;;  %p8614_p5 = scmp.lt.u32.totalorder %s8610_s4, %s10299_s12 }
  0x5e   :  { %p8616_p6 = pnand %p8614_p5, %p8611_p4 }
  0x60   :  { %8619 = shalt.err (!%p8616_p6)
}
  0x61   :  { %s8620_s20 = scalar_lea.vmem %s58_s0, 16  ;;  %s8624_s7 = scalar_lea.vmem %s58_s0, 32 }
  0x62   :  { %p8621_p7 = scmp.ne.s32.totalorder %s58_s0, %s8620_s20  ;;  %p8625_p8 = scmp.lt.s32.totalorder %s58_s0, %s58_s0 }
  0x63   :  { %p8626_p9 = scmp.lt.s32.totalorder %s8624_s7, %s8620_s20 }
  0x65   :  { %p8627_p10 = por %p8626_p9, %p8625_p8 }
  0x67   :  { %p8628_p11 = pnand %p8627_p10, %p8621_p7 }
  0x69   :  { %8631 = shalt.err (!%p8628_p11)
}
  0x6a   :  { %60 = dma.hbm_to_vmem [thread:$0]  %s10299_s12, 16, %s58_s0, [#allocation4]  }
  0x6b   :  { %s8632_s2 = scalar_lea.hbm %s10265_s14, 16 }
  0x6c   :  { %p8633_p12 = scmp.ne.s32.totalorder %s10265_s14, %s8632_s2  ;;  %p8636_p13 = scmp.lt.u32.totalorder %s8632_s2, %s10265_s14 }
  0x6e   :  { %p8638_p0 = pnand %p8636_p13, %p8633_p12 }
  0x70   :  { %8641 = shalt.err (!%p8638_p0)
}
  0x71   :  { %s8642_s4 = scalar_lea.vmem %s88_s29, 16  ;;  %s8646_s1 = scalar_lea.vmem %s88_s29, 32 }
  0x72   :  { %p8643_p1 = scmp.ne.s32.totalorder %s88_s29, %s8642_s4  ;;  %p8647_p2 = scmp.lt.s32.totalorder %s88_s29, %s88_s29 }
  0x73   :  { %p8648_p3 = scmp.lt.s32.totalorder %s8646_s1, %s8642_s4 }
  0x75   :  { %p8649_p4 = por %p8648_p3, %p8647_p2 }
  0x77   :  { %p8650_p5 = pnand %p8649_p4, %p8643_p1 }
  0x79   :  { %8653 = shalt.err (!%p8650_p5)
}
  0x7a   :  { %90 = dma.hbm_to_vmem [thread:$0]  %s10265_s14, 16, %s88_s29, [#allocation6]  }
  0x7b   :  { %s8738_s6 = smov [#allocation10]   ;;  %s8739_s3 = smov [#allocation13]  }
  0x7c   :  { %s109_s11 = sshll.u32 %s8738_s6, 4  ;;  %s131_s20 = sshll.u32 %s8739_s3, 4  ;;  %s110_s11 = int_to_ptr.vmem [resolvable:$true] %s109_s11  ;;  %s132_s20 = int_to_ptr.vmem [resolvable:$true] %s131_s20 }
  0x7d   :  { %s8654_s9 = scalar_lea.hbm %s10267_s16, 16 }
  0x7e   :  { %p8655_p6 = scmp.ne.s32.totalorder %s10267_s16, %s8654_s9  ;;  %p8658_p7 = scmp.lt.u32.totalorder %s8654_s9, %s10267_s16 }
  0x80   :  { %p8660_p8 = pnand %p8658_p7, %p8655_p6 }
  0x82   :  { %8663 = shalt.err (!%p8660_p8)
}
  0x83   :  { %s8664_s14 = scalar_lea.vmem %s110_s11, 16  ;;  %s8668_s29 = scalar_lea.vmem %s110_s11, 32 }
  0x84   :  { %p8665_p9 = scmp.ne.s32.totalorder %s110_s11, %s8664_s14  ;;  %p8669_p10 = scmp.lt.s32.totalorder %s110_s11, %s110_s11 }
  0x85   :  { %p8670_p11 = scmp.lt.s32.totalorder %s8668_s29, %s8664_s14 }
  0x87   :  { %p8671_p12 = por %p8670_p11, %p8669_p10 }
  0x89   :  { %p8672_p13 = pnand %p8671_p12, %p8665_p9 }
  0x8b   :  { %8675 = shalt.err (!%p8672_p13)
}
  0x8c   :  { %112 = dma.hbm_to_vmem [thread:$0]  %s10267_s16, 16, %s110_s11, [#allocation9]  }
  0x8d   :  { %s8676_s1 = scalar_lea.hbm %s10270_s19, 128 }
  0x8e   :  { %p8677_p0 = scmp.ne.s32.totalorder %s10270_s19, %s8676_s1  ;;  %p8680_p1 = scmp.lt.u32.totalorder %s8676_s1, %s10270_s19 }
  0x90   :  { %p8682_p2 = pnand %p8680_p1, %p8677_p0 }
  0x92   :  { %8685 = shalt.err (!%p8682_p2)
}
  0x93   :  { %s8686_s7 = scalar_lea.vmem %s132_s20, 128  ;;  %p8691_p4 = scmp.lt.s32.totalorder %s132_s20, %s132_s20 }
  0x94   :  { %p8687_p3 = scmp.ne.s32.totalorder %s132_s20, %s8686_s7  ;;  %p8692_p5 = scmp.lt.s32.totalorder %s8686_s7, %s8686_s7 }
  0x96   :  { %p8693_p6 = por %p8692_p5, %p8691_p4 }
  0x98   :  { %p8694_p7 = pnand %p8693_p6, %p8687_p3 }
  0x9a   :  { %8697 = shalt.err (!%p8694_p7)
}
  0x9b   :  { %134 = dma.hbm_to_vmem [thread:$0]  %s10270_s19, 128, %s132_s20, [#allocation12]  }
  0x9c   :  { %s8740_s8 = smov [#allocation16]   ;;  %s8698_s2 = scalar_lea.hbm %s10272_s21, 16 }
  0x9d   :  { %s151_s9 = sshll.u32 %s8740_s8, 4  ;;  %p8699_p8 = scmp.ne.s32.totalorder %s10272_s21, %s8698_s2  ;;  %s152_s9 = int_to_ptr.vmem [resolvable:$true] %s151_s9 }
  0x9e   :  { %p8702_p9 = scmp.lt.u32.totalorder %s8698_s2, %s10272_s21 }
  0xa0   :  { %p8704_p10 = pnand %p8702_p9, %p8699_p8 }
  0xa2   :  { %8707 = shalt.err (!%p8704_p10)
}
  0xa3   :  { %s8708_s15 = scalar_lea.vmem %s152_s9, 16  ;;  %s8712_s19 = scalar_lea.vmem %s152_s9, 32 }
  0xa4   :  { %p8709_p11 = scmp.ne.s32.totalorder %s152_s9, %s8708_s15  ;;  %p8713_p12 = scmp.lt.s32.totalorder %s152_s9, %s152_s9 }
  0xa5   :  { %p8714_p13 = scmp.lt.s32.totalorder %s8712_s19, %s8708_s15 }
  0xa7   :  { %p8715_p0 = por %p8714_p13, %p8713_p12 }
  0xa9   :  { %p8716_p1 = pnand %p8715_p0, %p8709_p11 }
  0xab   :  { %8719 = shalt.err (!%p8716_p1)
}
  0xac   :  { %154 = dma.hbm_to_vmem [thread:$0]  %s10272_s21, 16, %s152_s9, [#allocation15]  }
  0xad   :  { %8720 = dma.done.wait [#allocation4], 16  }
  0xae   :  { %8721 = vsyncadd [#allocation4], 4294967280 }
  0xaf   :  { %8722 = dma.done.wait [#allocation6], 32  }
  0xb0   :  { %8723 = vsyncadd [#allocation6], 4294967264 }
  0xb1   :  { %8724 = dma.done.wait [#allocation9], 528  }
  0xb2   :  { %8725 = vsyncadd [#allocation9], 4294966768 }
  0xb3   :  { %8726 = dma.done.wait [#allocation12], 256  }
  0xb4   :  { %8727 = vsyncadd [#allocation12], 4294967040 }
  0xb5   :  { %8728 = dma.done.wait [#allocation15], 144  }
  0xb6   :  { %8729 = vsyncadd [#allocation15], 4294967152  ;;  %vm209_vm0 = vcmask 130048   ;;  %s10300_s0 = sld [smem:[#allocation26_spill]]  ;;  %s10301_s7 = sld [smem:[#allocation22_spill]]  ;;  %v8741_v23 = vmov 0.0|0.0  }
  0xb7   :  { %s10302_s8 = sld [smem:[#allocation28_spill]]  ;;  %s10305_s12 = sld [smem:[#allocation31_spill]]  ;;  %vm362_vm1 = vcmask 523264   ;;  %vm8742_vm2 = vmmov 0   ;;  %v8743_v61 = vmov 0.0   ;;  %vm520_vm3 = vcmask 261120  }
  0xb8   :  { %v6553_v62 = vld [vmem:[#allocation3] ss:$0 sm:$0xff]  ;;  %s10306_s10 = sld [smem:[#allocation32_spill]]  ;;  %s8744_s15 = smov 64   ;;  %vm5175_vm7 = vcmask 64512  }
  0xb9   :  { %s8745_s19 = smov 32   ;;  %s10309_s29 = sld [smem:[#allocation33_spill]] }
  0xba   :  { %s10311_s14 = sld [smem:[#allocation24_spill]]  ;;  %s10312_s30 = sld [smem:[#allocation25_spill]] }
  0xbc   :  { %v200_v0 = vld [vmem:[%s10300_s0] sm:$0xff]  ;;  %v201_v1 = vld [vmem:[%s10300_s0 + $0x8] sm:$0xff]  ;;  %v194_v10 = vld [vmem:[%s10301_s7 + $0x10] sm:$0xff] }
  0xbd   :  { %v192_v2 = vld [vmem:[%s10301_s7] sm:$0xff]  ;;  %v7872_v3 = vpack.c.bf16 %v201_v1, %v200_v0  ;;  %v348_v5 = vld [vmem:[%s10302_s8 + $0x8] sm:$0xff]  ;;  %v349_v7 = vld [vmem:[%s10302_s8 + $0x10] sm:$0xff] }
  0xbe   :  { %7143 = vmatprep.mubr.msk.f32.mxu1 %vm209_vm0, %v192_v2  ;;  %v347_v4 = vld [vmem:[%s10302_s8] sm:$0xff]  ;;  %v350_v8 = vld [vmem:[%s10302_s8 + $0x18] sm:$0xff]  ;;  %v193_v9 = vld [vmem:[%s10301_s7 + $0x8] sm:$0xff] }
  0xbf   :  { %7873 = vmatprep.subr.bf16.mxu1 %v7872_v3  ;;  %v7876_v6 = vpack.c.bf16 %v348_v5, %v347_v4  ;;  %v7880_v11 = vpack.c.bf16 %v350_v8, %v349_v7  ;;  %v351_v12 = vld [vmem:[%s10302_s8 + $0x20] sm:$0xff]  ;;  %v352_v13 = vld [vmem:[%s10302_s8 + $0x28] sm:$0xff]  ;;  %v195_v14 = vld [vmem:[%s10301_s7 + $0x18] sm:$0xff] }
  0xc0   :  { %7875 = vmatpush3.bf16.msra.mxu1 %v7872_v3  ;;  %v196_v15 = vld [vmem:[%s10301_s7 + $0x20] sm:$0xff]  ;;  %v7884_v16 = vpack.c.bf16 %v352_v13, %v351_v12  ;;  %v197_v17 = vld [vmem:[%s10301_s7 + $0x28] sm:$0xff]  ;;  %v198_v18 = vld [vmem:[%s10301_s7 + $0x30] sm:$0xff] }
  0xc1   :  { %7877 = vmatprep.subr.bf16.mxu1 %v7876_v6  ;;  %v199_v19 = vld [vmem:[%s10301_s7 + $0x38] sm:$0xff]  ;;  %v353_v20 = vld [vmem:[%s10302_s8 + $0x30] sm:$0xff]  ;;  %s10303_s7 = sld [smem:[#allocation30_spill]]  ;;  %v509_v31 = vld [vmem:[%s10305_s12] sm:$0xff] }
  0xc2   :  { %v354_v21 = vld [vmem:[%s10302_s8 + $0x38] sm:$0xff]  ;;  %s10304_s8 = sld [smem:[#allocation27_spill]]  ;;  %v510_v32 = vld [vmem:[%s10305_s12 + $0x8] sm:$0xff]  ;;  %v511_v58 = vld [vmem:[%s10305_s12 + $0x10] sm:$0xff] }
  0xc3   :  { %7144 = vmatmul.mubr.msk.f32.vlgmr.msra.gmra.mrb[0].mxu1 %vm209_vm0, %v193_v9  ;;  %v7888_v22 = vpack.c.bf16 %v354_v21, %v353_v20  ;;  %v9079_v36 = vpack.c.bf16 %v510_v32, %v509_v31  ;;  %v512_v59 = vld [vmem:[%s10305_s12 + $0x18] sm:$0xff] }
  0xc4   :  { %7146 = vmatprep.mubr.msk.f32.mxu1 %vm209_vm0, %v194_v10  ;;  %7879 = vmatpush3.bf16.msra.mxu1 %v7876_v6  ;;  %v9103_v60 = vpack.c.bf16 %v512_v59, %v511_v58 }
  0xc5   :  { %7881 = vmatprep.subr.bf16.mxu1 %v7880_v11 }
  0xc7   :  { %7147 = vmatmul.mubr.msk.f32.gmra.mrb[2].mxu1 %vm209_vm0, %v195_v14  ;;  %v505_v24 = vld [vmem:[%s10303_s7] sm:$0xff]  ;;  %v506_v25 = vld [vmem:[%s10303_s7 + $0x8] sm:$0xff]  ;;  %v507_v55 = vld [vmem:[%s10303_s7 + $0x10] sm:$0xff] }
  0xc8   :  { %7149 = vmatprep.mubr.msk.f32.mxu1 %vm209_vm0, %v196_v15  ;;  %7883 = vmatpush3.bf16.msra.mxu1 %v7880_v11  ;;  %v7892_v26 = vpack.c.bf16 %v506_v25, %v505_v24  ;;  %v6544_v27 = vld [vmem:[%s10304_s8] ss:$0 sm:$0xff]  ;;  %v508_v56 = vld [vmem:[%s10303_s7 + $0x18] sm:$0xff] }
  0xc9   :  { %7885 = vmatprep.subr.bf16.mxu1 %v7884_v16  ;;  %v7896_v57 = vpack.c.bf16 %v508_v56, %v507_v55 }
  0xca   :  { %7893 = vmatprep.subr.bf16.mxu0 %v7892_v26 }
  0xcb   :  { %7150 = vmatmul.mubr.msk.f32.gmra.mrb[4].mxu1 %vm209_vm0, %v197_v17  ;;  %7895 = vmatpush3.bf16.msra.mxu0 %v7892_v26  ;;  %v6562_v26 = vld [vmem:[%s10306_s10] ss:$0 sm:$0xff] }
  0xcc   :  { %7152 = vmatprep.mubr.msk.f32.mxu1 %vm209_vm0, %v198_v18  ;;  %7887 = vmatpush3.bf16.msra.mxu1 %v7884_v16 }
  0xcd   :  { %7889 = vmatprep.subr.bf16.mxu1 %v7888_v22  ;;  %7897 = vmatprep.subr.bf16.mxu0 %v7896_v57 }
  0xcf   :  { %7153 = vmatmul.mubr.msk.f32.gmra.mrb[6].mxu1 %vm209_vm0, %v199_v19  ;;  %7899 = vmatpush3.bf16.msra.mxu0 %v7896_v57 }
  0xd0   :  { %7891 = vmatpush3.bf16.msra.mxu1 %v7888_v22  ;;  %7906 = vmatprep.subr.bf16.mxu0 %v8741_v23 }
  0xd1   :  { %7900 = vmatprep.subr.bf16.mxu1 %v8741_v23 }
 0x196   :  { %v7145_v28 = vpop.f32.mrb[0].mxu1 }
 0x197   :  { %v306_v29 = vadd.f32 %v7145_v28, %v6544_v27  ;;  %v300_v30 = vpop.f32.mrb[1].mxu1 }
 0x198   :  { %v301_v33 = vadd.f32 %v6544_v27, %v300_v30 }
 0x199   :  { %v340_v37 = vmax.f32 %v306_v29, 0.0 }
 0x19a   :  { %v339_v34 = vmax.f32 %v301_v33, 0.0  ;;  %v7148_v35 = vpop.f32.mrb[2].mxu1 }
 0x19b   :  { %v316_v38 = vadd.f32 %v7148_v35, %v6544_v27  ;;  %v310_v39 = vpop.f32.mrb[3].mxu1 }
 0x19c   :  { %7171 = vmatprep.mubr.msk.f32.mxu1 %vm362_vm1, %v339_v34  ;;  %v311_v40 = vadd.f32 %v6544_v27, %v310_v39  ;;  %v500_v34 = vlaneseq }
 0x19d   :  { %7172 = vmatmul.mubr.msk.f32.vlgmr.msra.gmra.mrb[8].mxu1 %vm362_vm1, %v340_v37  ;;  %v342_v41 = vmax.f32 %v316_v38, 0.0 }
 0x19e   :  { %v341_v42 = vmax.f32 %v311_v40, 0.0  ;;  %v7151_v43 = vpop.f32.mrb[4].mxu1  ;;  %7902 = vmatpush3.bf16.msra.mxu1 %v9079_v36  ;;  %v501_v37 = vand.u32 127, %v500_v34 }
 0x19f   :  { %v326_v44 = vadd.f32 %v7151_v43, %v6544_v27  ;;  %v320_v45 = vpop.f32.mrb[5].mxu1  ;;  %7903 = vmatprep.subr.bf16.mxu1 %v8741_v23 }
 0x1a0   :  { %v321_v46 = vadd.f32 %v6544_v27, %v320_v45  ;;  %7174 = vmatprep.mubr.msk.f32.mxu1 %vm362_vm1, %v341_v42  ;;  %vm502_vm4 = vcmp.ge.s32.totalorder %v501_v37, 64  ;;  %vm503_vm5 = vcmp.lt.s32.totalorder %v501_v37, 96 }
 0x1a1   :  { %v344_v47 = vmax.f32 %v326_v44, 0.0  ;;  %7175 = vmatmul.mubr.msk.f32.gmra.mrb[10].mxu1 %vm362_vm1, %v342_v41  ;;  %vm9146_vm6 = vmand %vm502_vm4, %vm503_vm5 }
 0x1a2   :  { %v343_v48 = vmax.f32 %v321_v46, 0.0  ;;  %v7154_v49 = vpop.f32.mrb[6].mxu1  ;;  %7905 = vmatpush3.bf16.msra.mxu1 %v9103_v60 }
 0x1a3   :  { %v336_v50 = vadd.f32 %v7154_v49, %v6544_v27  ;;  %v330_v51 = vpop.f32.mrb[7].mxu1  ;;  %7912 = vmatprep.subr.bf16.mxu1 %v8741_v23 }
 0x1a4   :  { %v331_v52 = vadd.f32 %v6544_v27, %v330_v51  ;;  %7177 = vmatprep.mubr.msk.f32.mxu1 %vm362_vm1, %v343_v48 }
 0x1a5   :  { %v346_v53 = vmax.f32 %v336_v50, 0.0  ;;  %7178 = vmatmul.mubr.msk.f32.gmra.mrb[12].mxu1 %vm362_vm1, %v344_v47  ;;  %v4912_v50 = vld [vmem:[%s10309_s29 + $0xf0] sm:$0xff] }
 0x1a6   :  { %v345_v54 = vmax.f32 %v331_v52, 0.0 }
 0x1a8   :  { %7180 = vmatprep.mubr.msk.f32.mxu1 %vm362_vm1, %v345_v54 }
 0x1a9   :  { %7181 = vmatmul.mubr.msk.f32.gmra.mrb[14].mxu1 %vm362_vm1, %v346_v53 }
 0x1aa   :  { %7211 = vmatprep.mubr.msk.f32.mxu1 %vm8742_vm2, %v8743_v61 }
 0x1ad   :  { %7212 = vmatmul.mubr.f32.vlgmr.msra.gmra.mrb[16].mxu1 %v8743_v61 }
 0x1ae   :  { %7914 = vmatpush3.bf16.msra.mxu1 %v9079_v36  ;;  %7233 = vmatprep.mubr.msk.f32.mxu1 %vm8742_vm2, %v8743_v61 }
 0x1af   :  { %7915 = vmatprep.subr.bf16.mxu1 %v8741_v23 }
 0x1b2   :  { %7917 = vmatpush3.bf16.msra.mxu1 %v9103_v60 }
 0x1b3   :  { %7924 = vmatprep.subr.bf16.mxu1 %v8741_v23 }
 0x270   :  { %v7173_v63 = vpop.f32.mrb[8].mxu1 }
 0x271   :  { %v459_v0 = vadd.f32 %v7173_v63, %v6553_v62  ;;  %v453_v1 = vpop.f32.mrb[9].mxu1 }
 0x272   :  { %v454_v2 = vadd.f32 %v6553_v62, %v453_v1 }
 0x273   :  { %v493_v5 = vmax.f32 %v459_v0, 0.0 }
 0x274   :  { %v492_v3 = vmax.f32 %v454_v2, 0.0  ;;  %v7176_v4 = vpop.f32.mrb[10].mxu1 }
 0x275   :  { %v469_v6 = vadd.f32 %v7176_v4, %v6553_v62  ;;  %v463_v7 = vpop.f32.mrb[11].mxu1 }
 0x276   :  { %7191 = vmatprep.mubr.msk.f32.mxu0 %vm520_vm3, %v492_v3  ;;  %v464_v8 = vadd.f32 %v6553_v62, %v463_v7 }
 0x277   :  { %7192 = vmatmul.mubr.msk.f32.vlgmr.msra.gmra.mrb[0].mxu0 %vm520_vm3, %v493_v5  ;;  %v495_v9 = vmax.f32 %v469_v6, 0.0 }
 0x278   :  { %v494_v10 = vmax.f32 %v464_v8, 0.0  ;;  %v7179_v11 = vpop.f32.mrb[12].mxu1  ;;  %7908 = vmatpush3.bf16.msra.mxu0 %v9079_v36 }
 0x279   :  { %v479_v12 = vadd.f32 %v7179_v11, %v6553_v62  ;;  %v473_v13 = vpop.f32.mrb[13].mxu1  ;;  %7909 = vmatprep.subr.bf16.mxu0 %v8741_v23 }
 0x27a   :  { %v474_v14 = vadd.f32 %v6553_v62, %v473_v13  ;;  %7194 = vmatprep.mubr.msk.f32.mxu0 %vm520_vm3, %v494_v10 }
 0x27b   :  { %v497_v15 = vmax.f32 %v479_v12, 0.0  ;;  %7195 = vmatmul.mubr.msk.f32.gmra.mrb[2].mxu0 %vm520_vm3, %v495_v9 }
 0x27c   :  { %v496_v16 = vmax.f32 %v474_v14, 0.0  ;;  %v7182_v17 = vpop.f32.mrb[14].mxu1  ;;  %7911 = vmatpush3.bf16.msra.mxu0 %v9103_v60 }
 0x27d   :  { %v489_v18 = vadd.f32 %v7182_v17, %v6553_v62  ;;  %v483_v19 = vpop.f32.mrb[15].mxu1  ;;  %7918 = vmatprep.subr.bf16.mxu0 %v8741_v23 }
 0x27e   :  { %v484_v20 = vadd.f32 %v6553_v62, %v483_v19  ;;  %7197 = vmatprep.mubr.msk.f32.mxu0 %vm520_vm3, %v496_v16 }
 0x27f   :  { %v499_v21 = vmax.f32 %v489_v18, 0.0  ;;  %7198 = vmatmul.mubr.msk.f32.gmra.mrb[4].mxu0 %vm520_vm3, %v497_v15 }
 0x280   :  { %v498_v22 = vmax.f32 %v484_v20, 0.0  ;;  %v719_v24 = vpop.f32.mrb[16].mxu1 }
 0x281   :  { %v7213_v25 = vpop.f32.mrb[17].mxu1 }
 0x282   :  { %7200 = vmatprep.mubr.msk.f32.mxu0 %vm520_vm3, %v498_v22 }
 0x283   :  { %7201 = vmatmul.mubr.msk.f32.gmra.mrb[6].mxu0 %vm520_vm3, %v499_v21 }
 0x284   :  { %7222 = vmatprep.mubr.msk.f32.mxu0 %vm8742_vm2, %v8743_v61 }
 0x34a   :  { %v7193_v27 = vpop.f32.mrb[0].mxu0 }
 0x34b   :  { %v617_v28 = vadd.f32 %v7193_v27, %v6562_v26  ;;  %v611_v29 = vpop.f32.mrb[1].mxu0 }
 0x34c   :  { %v612_v30 = vadd.f32 %v6562_v26, %v611_v29 }
 0x34e   :  { %v723_v31 = vadd.f32 %v719_v24, %v612_v30  ;;  %v7196_v38 = vpop.f32.mrb[2].mxu0 }
 0x34f   :  { %v9134_v39 = vadd.f32 %v7196_v38, %v6562_v26  ;;  %v621_v40 = vpop.f32.mrb[3].mxu0 }
 0x350   :  { %v6571_v32 = vmul.f32 -1.442695, %v723_v31  ;;  %v9136_v41 = vadd.f32 %v6562_v26, %v621_v40 }
 0x352   :  { %8264 = vpow2.f32 %v6571_v32  ;;  %v7199_v42 = vpop.f32.mrb[4].mxu0 }
 0x353   :  { %8266 = vtanh.f32 %v723_v31  ;;  %v9138_v43 = vadd.f32 %v7199_v42, %v6562_v26  ;;  %v631_v44 = vpop.f32.mrb[5].mxu0 }
 0x354   :  { %v9140_v45 = vadd.f32 %v6562_v26, %v631_v44 }
 0x356   :  { %v7202_v46 = vpop.f32.mrb[6].mxu0 }
 0x357   :  { %v9142_v47 = vadd.f32 %v7202_v46, %v6562_v26  ;;  %v641_v48 = vpop.f32.mrb[7].mxu0 }
 0x358   :  { %v9144_v49 = vadd.f32 %v6562_v26, %v641_v48 }
 0x35c   :  { %v8265_v33 = vpop.eup %8264 }
 0x35d   :  { %v728_v35 = vadd.f32 1.0, %v8265_v33  ;;  %v8267_v51 = vpop.eup %8266 }
 0x35f   :  { %8268 = vrcp.f32 %v728_v35 }
 0x369   :  { %v8269_v52 = vpop.eup %8268 }
 0x36a   :  { %v731_v53 = vsel %vm9146_vm6, %v8267_v51, %v8269_v52 }
 0x36b   :  { %734 = vrot.lane.b32.xlu0 %v731_v53, %s8744_s15  ;;  %v732_v56 = vmul.f32 0.0, %v731_v53 }
 0x3dd   :  { %v735_v54 = vpop.permute.xlu0 %734 }
 0x3de   :  { %v737_v55 = vmul.f32 %v735_v54, %v731_v53 }
 0x3e0   :  { %739 = vrot.lane.b32.xlu0 %v737_v55, %s8745_s19 }
 0x452   :  { %v740_v57 = vpop.permute.xlu0 %739 }
 0x453   :  { %v742_v58 = vadd.f32 %v740_v57, %v732_v56 }
 0x455   :  { %8270 = vtanh.f32 %v742_v58 }
 0x45f   :  { %v8271_v59 = vpop.eup %8270 }
 0x460   :  { %745 = vrot.lane.b32.xlu1 %v8271_v59, %s8744_s15 }
 0x4d2   :  { %v746_v62 = vpop.permute.xlu1 %745 }
 0x4d3   :  { %v748_v63 = vmul.f32 %v746_v62, %v731_v53 }
 0x4d5   :  { %750 = vrot.lane.b32.xlu1 %v748_v63, %s8745_s19 }
 0x547   :  { %v751_v0 = vpop.permute.xlu1 %750 }
 0x548   :  { %753 = vst.msk [vmem:[#allocation2] sm:$0xff] %vm520_vm3, %v751_v0  ;;  %7223 = vmatmul.mubr.msk.f32.vlgmr.msra.gmra.mrb[8].mxu0 %vm520_vm3, %v751_v0 }
 0x549   :  { %7920 = vmatpush3.bf16.msra.mxu0 %v9079_v36  ;;  %7244 = vmatprep.mubr.msk.f32.mxu0 %vm8742_vm2, %v8743_v61 }
 0x54a   :  { %7921 = vmatprep.subr.bf16.mxu0 %v8741_v23 }
 0x54d   :  { %7923 = vmatpush3.bf16.msra.mxu0 %v9103_v60 }
 0x54e   :  { %7930 = vmatprep.subr.bf16.mxu0 %v8741_v23 }
 0x61b   :  { %v822_v1 = vpop.f32.mrb[8].mxu0 }
 0x61c   :  { %v826_v2 = vadd.f32 %v822_v1, %v617_v28  ;;  %v7224_v3 = vpop.f32.mrb[9].mxu0 }
 0x61e   :  { %v6573_v4 = vmul.f32 -1.442695, %v826_v2 }
 0x620   :  { %8272 = vpow2.f32 %v6573_v4 }
 0x621   :  { %8274 = vtanh.f32 %v826_v2 }
 0x62a   :  { %v8273_v5 = vpop.eup %8272 }
 0x62b   :  { %v831_v6 = vadd.f32 1.0, %v8273_v5  ;;  %v8275_v7 = vpop.eup %8274 }
 0x62d   :  { %8276 = vrcp.f32 %v831_v6 }
 0x637   :  { %v8277_v8 = vpop.eup %8276 }
 0x638   :  { %v834_v9 = vsel %vm9146_vm6, %v8275_v7, %v8277_v8 }
 0x639   :  { %837 = vrot.lane.b32.xlu0 %v834_v9, %s8744_s15  ;;  %v835_v12 = vmul.f32 %v834_v9, %v742_v58 }
 0x6ab   :  { %v838_v10 = vpop.permute.xlu0 %837 }
 0x6ac   :  { %v840_v11 = vmul.f32 %v838_v10, %v834_v9 }
 0x6ae   :  { %842 = vrot.lane.b32.xlu1 %v840_v11, %s8745_s19 }
 0x720   :  { %v843_v13 = vpop.permute.xlu1 %842 }
 0x721   :  { %v845_v14 = vadd.f32 %v843_v13, %v835_v12 }
 0x723   :  { %8278 = vtanh.f32 %v845_v14 }
 0x72d   :  { %v8279_v15 = vpop.eup %8278 }
 0x72e   :  { %848 = vrot.lane.b32.xlu0 %v8279_v15, %s8744_s15 }
 0x7a0   :  { %v849_v16 = vpop.permute.xlu0 %848 }
 0x7a1   :  { %v851_v17 = vmul.f32 %v849_v16, %v834_v9 }
 0x7a3   :  { %853 = vrot.lane.b32.xlu1 %v851_v17, %s8745_s19 }
 0x815   :  { %v854_v18 = vpop.permute.xlu1 %853 }
 0x816   :  { %856 = vst.msk [vmem:[#allocation2 + $0x8] sm:$0xff] %vm520_vm3, %v854_v18  ;;  %7234 = vmatmul.mubr.msk.f32.vlgmr.msra.gmra.mrb[18].mxu1 %vm520_vm3, %v854_v18 }
 0x817   :  { %7926 = vmatpush3.bf16.msra.mxu1 %v9079_v36  ;;  %7255 = vmatprep.mubr.msk.f32.mxu1 %vm8742_vm2, %v8743_v61 }
 0x818   :  { %7927 = vmatprep.subr.bf16.mxu1 %v8741_v23 }
 0x81b   :  { %7929 = vmatpush3.bf16.msra.mxu1 %v9103_v60 }
 0x81c   :  { %7936 = vmatprep.subr.bf16.mxu1 %v8741_v23 }
 0x8e9   :  { %v925_v19 = vpop.f32.mrb[18].mxu1 }
 0x8ea   :  { %v929_v20 = vadd.f32 %v925_v19, %v9136_v41  ;;  %v7235_v21 = vpop.f32.mrb[19].mxu1 }
 0x8ec   :  { %v6575_v22 = vmul.f32 -1.442695, %v929_v20 }
 0x8ee   :  { %8280 = vpow2.f32 %v6575_v22 }
 0x8ef   :  { %8282 = vtanh.f32 %v929_v20 }
 0x8f8   :  { %v8281_v24 = vpop.eup %8280 }
 0x8f9   :  { %v934_v25 = vadd.f32 1.0, %v8281_v24  ;;  %v8283_v26 = vpop.eup %8282 }
 0x8fb   :  { %8284 = vrcp.f32 %v934_v25 }
 0x905   :  { %v8285_v27 = vpop.eup %8284 }
 0x906   :  { %v937_v28 = vsel %vm9146_vm6, %v8283_v26, %v8285_v27 }
 0x907   :  { %940 = vrot.lane.b32.xlu0 %v937_v28, %s8744_s15  ;;  %v938_v31 = vmul.f32 %v937_v28, %v845_v14 }
 0x979   :  { %v941_v29 = vpop.permute.xlu0 %940 }
 0x97a   :  { %v943_v30 = vmul.f32 %v941_v29, %v937_v28  ;;  %v6586_v29 = vld [vmem:[%s10303_s7 + $0x20] sm:$0xff] }
 0x97c   :  { %945 = vrot.lane.b32.xlu1 %v943_v30, %s8745_s19  ;;  %v6587_v30 = vld [vmem:[%s10303_s7 + $0x28] sm:$0xff] }
 0x9ee   :  { %v946_v32 = vpop.permute.xlu1 %945 }
 0x9ef   :  { %v948_v33 = vadd.f32 %v946_v32, %v938_v31  ;;  %v7948_v31 = vpack.c.bf16 %v6587_v30, %v6586_v29 }
 0x9f1   :  { %8286 = vtanh.f32 %v948_v33 }
 0x9fb   :  { %v8287_v34 = vpop.eup %8286 }
 0x9fc   :  { %951 = vrot.lane.b32.xlu0 %v8287_v34, %s8744_s15 }
 0xa6e   :  { %v952_v35 = vpop.permute.xlu0 %951 }
 0xa6f   :  { %v954_v37 = vmul.f32 %v952_v35, %v937_v28  ;;  %v6588_v35 = vld [vmem:[%s10303_s7 + $0x30] sm:$0xff] }
 0xa71   :  { %956 = vrot.lane.b32.xlu1 %v954_v37, %s8745_s19  ;;  %v6589_v37 = vld [vmem:[%s10303_s7 + $0x38] sm:$0xff] }
 0xae3   :  { %v957_v38 = vpop.permute.xlu1 %956 }
 0xae4   :  { %959 = vst.msk [vmem:[#allocation2 + $0x10] sm:$0xff] %vm520_vm3, %v957_v38  ;;  %7245 = vmatmul.mubr.msk.f32.vlgmr.msra.gmra.mrb[10].mxu0 %vm520_vm3, %v957_v38  ;;  %v7952_v38 = vpack.c.bf16 %v6589_v37, %v6588_v35 }
 0xae5   :  { %7932 = vmatpush3.bf16.msra.mxu0 %v9079_v36  ;;  %7266 = vmatprep.mubr.msk.f32.mxu0 %vm8742_vm2, %v8743_v61 }
 0xae6   :  { %7933 = vmatprep.subr.bf16.mxu0 %v8741_v23 }
 0xae9   :  { %7935 = vmatpush3.bf16.msra.mxu0 %v9103_v60 }
 0xaea   :  { %7942 = vmatprep.subr.bf16.mxu0 %v8741_v23 }
 0xbb7   :  { %v1028_v40 = vpop.f32.mrb[10].mxu0 }
 0xbb8   :  { %v1032_v41 = vadd.f32 %v1028_v40, %v9134_v39  ;;  %v7246_v42 = vpop.f32.mrb[11].mxu0 }
 0xbb9   :  { %v1476_v42 = vld [vmem:[#allocation2 + $0x8] sm:$0xff] }
 0xbba   :  { %v6577_v44 = vmul.f32 -1.442695, %v1032_v41 }
 0xbbc   :  { %8288 = vpow2.f32 %v6577_v44  ;;  %v1477_v44 = vld [vmem:[#allocation2 + $0x10] sm:$0xff] }
 0xbbd   :  { %8290 = vtanh.f32 %v1032_v41  ;;  %v1475_v41 = vld [vmem:[#allocation2] sm:$0xff] }
 0xbc6   :  { %v8289_v46 = vpop.eup %8288 }
 0xbc7   :  { %v1037_v48 = vadd.f32 1.0, %v8289_v46  ;;  %v8291_v51 = vpop.eup %8290 }
 0xbc9   :  { %8292 = vrcp.f32 %v1037_v48 }
 0xbd3   :  { %v8293_v52 = vpop.eup %8292 }
 0xbd4   :  { %v1040_v53 = vsel %vm9146_vm6, %v8291_v51, %v8293_v52 }
 0xbd5   :  { %1043 = vrot.lane.b32.xlu0 %v1040_v53, %s8744_s15  ;;  %v1041_v56 = vmul.f32 %v1040_v53, %v948_v33 }
 0xc47   :  { %v1044_v54 = vpop.permute.xlu0 %1043 }
 0xc48   :  { %v1046_v55 = vmul.f32 %v1044_v54, %v1040_v53 }
 0xc4a   :  { %1048 = vrot.lane.b32.xlu1 %v1046_v55, %s8745_s19 }
 0xcbc   :  { %v1049_v39 = vpop.permute.xlu1 %1048 }
 0xcbd   :  { %v1051_v57 = vadd.f32 %v1049_v39, %v1041_v56 }
 0xcbf   :  { %8294 = vtanh.f32 %v1051_v57 }
 0xcc9   :  { %v8295_v58 = vpop.eup %8294 }
 0xcca   :  { %1054 = vrot.lane.b32.xlu0 %v8295_v58, %s8744_s15 }
 0xd3c   :  { %v1055_v59 = vpop.permute.xlu0 %1054 }
 0xd3d   :  { %v1057_v62 = vmul.f32 %v1055_v59, %v1040_v53 }
 0xd3f   :  { %1059 = vrot.lane.b32.xlu1 %v1057_v62, %s8745_s19 }
 0xdb1   :  { %v1060_v63 = vpop.permute.xlu1 %1059 }
 0xdb2   :  { %1062 = vst.msk [vmem:[#allocation2 + $0x18] sm:$0xff] %vm520_vm3, %v1060_v63  ;;  %7256 = vmatmul.mubr.msk.f32.vlgmr.msra.gmra.mrb[20].mxu1 %vm520_vm3, %v1060_v63 }
 0xdb3   :  { %7938 = vmatpush3.bf16.msra.mxu1 %v9079_v36  ;;  %7277 = vmatprep.mubr.msk.f32.mxu1 %vm8742_vm2, %v8743_v61 }
 0xdb4   :  { %7939 = vmatprep.subr.bf16.mxu1 %v8741_v23 }
 0xdb7   :  { %7941 = vmatpush3.bf16.msra.mxu1 %v9103_v60 }
 0xdb8   :  { %7949 = vmatprep.subr.bf16.mxu1 %v7948_v31 }
 0xdb9   :  { %v1478_v46 = vld [vmem:[#allocation2 + $0x18] sm:$0xff] }
 0xe85   :  { %v1131_v0 = vpop.f32.mrb[20].mxu1 }
 0xe86   :  { %v1135_v1 = vadd.f32 %v1131_v0, %v9140_v45  ;;  %v7257_v2 = vpop.f32.mrb[21].mxu1 }
 0xe88   :  { %v6579_v3 = vmul.f32 -1.442695, %v1135_v1 }
 0xe8a   :  { %8296 = vpow2.f32 %v6579_v3 }
 0xe8b   :  { %8298 = vtanh.f32 %v1135_v1 }
 0xe94   :  { %v8297_v4 = vpop.eup %8296 }
 0xe95   :  { %v1140_v5 = vadd.f32 1.0, %v8297_v4  ;;  %v8299_v6 = vpop.eup %8298 }
 0xe97   :  { %8300 = vrcp.f32 %v1140_v5 }
 0xea1   :  { %v8301_v7 = vpop.eup %8300 }
 0xea2   :  { %v1143_v8 = vsel %vm9146_vm6, %v8299_v6, %v8301_v7 }
 0xea3   :  { %1146 = vrot.lane.b32.xlu0 %v1143_v8, %s8744_s15  ;;  %v1144_v11 = vmul.f32 %v1143_v8, %v1051_v57 }
 0xf15   :  { %v1147_v9 = vpop.permute.xlu0 %1146 }
 0xf16   :  { %v1149_v10 = vmul.f32 %v1147_v9, %v1143_v8  ;;  %v6590_v9 = vld [vmem:[%s10305_s12 + $0x20] sm:$0xff] }
 0xf18   :  { %1151 = vrot.lane.b32.xlu1 %v1149_v10, %s8745_s19  ;;  %v6591_v10 = vld [vmem:[%s10305_s12 + $0x28] sm:$0xff] }
 0xf8a   :  { %v1152_v45 = vpop.permute.xlu1 %1151 }
 0xf8b   :  { %v1154_v12 = vadd.f32 %v1152_v45, %v1144_v11  ;;  %v9275_v11 = vpack.c.bf16 %v6591_v10, %v6590_v9  ;;  %v6592_v45 = vld [vmem:[%s10305_s12 + $0x30] sm:$0xff] }
 0xf8d   :  { %8302 = vtanh.f32 %v1154_v12 }
 0xf97   :  { %v8303_v13 = vpop.eup %8302 }
 0xf98   :  { %1157 = vrot.lane.b32.xlu0 %v8303_v13, %s8744_s15 }
0x100a   :  { %v1158_v14 = vpop.permute.xlu0 %1157 }
0x100b   :  { %v1160_v15 = vmul.f32 %v1158_v14, %v1143_v8 }
0x100d   :  { %1162 = vrot.lane.b32.xlu1 %v1160_v15, %s8745_s19 }
0x107f   :  { %v1163_v16 = vpop.permute.xlu1 %1162 }
0x1080   :  { %1165 = vst.msk [vmem:[#allocation2 + $0x20] sm:$0xff] %vm520_vm3, %v1163_v16  ;;  %7267 = vmatmul.mubr.msk.f32.vlgmr.msra.gmra.mrb[12].mxu0 %vm520_vm3, %v1163_v16 }
0x1081   :  { %7944 = vmatpush3.bf16.msra.mxu0 %v9079_v36  ;;  %7288 = vmatprep.mubr.msk.f32.mxu0 %vm8742_vm2, %v8743_v61 }
0x1082   :  { %7945 = vmatprep.subr.bf16.mxu0 %v8741_v23 }
0x1085   :  { %7947 = vmatpush3.bf16.msra.mxu0 %v9103_v60 }
0x1086   :  { %7956 = vmatprep.subr.bf16.mxu0 %v8741_v23 }
0x1087   :  { %v1479_v48 = vld [vmem:[#allocation2 + $0x20] sm:$0xff] }
0x1153   :  { %v1234_v17 = vpop.f32.mrb[12].mxu0 }
0x1154   :  { %v1238_v18 = vadd.f32 %v1234_v17, %v9138_v43  ;;  %v7268_v19 = vpop.f32.mrb[13].mxu0 }
0x1156   :  { %v6581_v20 = vmul.f32 -1.442695, %v1238_v18 }
0x1158   :  { %8304 = vpow2.f32 %v6581_v20 }
0x1159   :  { %8306 = vtanh.f32 %v1238_v18 }
0x1162   :  { %v8305_v21 = vpop.eup %8304 }
0x1163   :  { %v1243_v22 = vadd.f32 1.0, %v8305_v21  ;;  %v8307_v36 = vpop.eup %8306  ;;  %v9310_v21 = vld [vmem:[%s10306_s10 + $0x1] ss:$0 sm:$0xff] }
0x1165   :  { %8308 = vrcp.f32 %v1243_v22 }
0x116f   :  { %v8309_v24 = vpop.eup %8308 }
0x1170   :  { %v1246_v25 = vsel %vm9146_vm6, %v8307_v36, %v8309_v24 }
0x1171   :  { %1249 = vrot.lane.b32.xlu0 %v1246_v25, %s8744_s15  ;;  %v1247_v27 = vmul.f32 %v1246_v25, %v1154_v12  ;;  %v6593_v12 = vld [vmem:[%s10305_s12 + $0x38] sm:$0xff] }
0x1172   :  { %v9285_v13 = vpack.c.bf16 %v6593_v12, %v6592_v45 }
0x11e3   :  { %v1250_v60 = vpop.permute.xlu0 %1249 }
0x11e4   :  { %v1252_v26 = vmul.f32 %v1250_v60, %v1246_v25 }
0x11e6   :  { %1254 = vrot.lane.b32.xlu1 %v1252_v26, %s8745_s19 }
0x1258   :  { %v1255_v43 = vpop.permute.xlu1 %1254 }
0x1259   :  { %v1257_v28 = vadd.f32 %v1255_v43, %v1247_v27 }
0x125b   :  { %8310 = vtanh.f32 %v1257_v28 }
0x1265   :  { %v8311_v32 = vpop.eup %8310 }
0x1266   :  { %1260 = vrot.lane.b32.xlu0 %v8311_v32, %s8744_s15 }
0x12d8   :  { %v1261_v33 = vpop.permute.xlu0 %1260 }
0x12d9   :  { %v1263_v34 = vmul.f32 %v1261_v33, %v1246_v25 }
0x12db   :  { %1265 = vrot.lane.b32.xlu1 %v1263_v34, %s8745_s19 }
0x134d   :  { %v1266_v40 = vpop.permute.xlu1 %1265 }
0x134e   :  { %1268 = vst.msk [vmem:[#allocation2 + $0x28] sm:$0xff] %vm520_vm3, %v1266_v40  ;;  %7278 = vmatmul.mubr.msk.f32.vlgmr.msra.gmra.mrb[22].mxu1 %vm520_vm3, %v1266_v40 }
0x134f   :  { %7951 = vmatpush3.bf16.msra.mxu1 %v7948_v31  ;;  %7299 = vmatprep.mubr.msk.f32.mxu1 %vm520_vm3, %v1475_v41 }
0x1350   :  { %7953 = vmatprep.subr.bf16.mxu1 %v7952_v38 }
0x1353   :  { %7955 = vmatpush3.bf16.msra.mxu1 %v7952_v38 }
0x1354   :  { %7968 = vmatprep.subr.bf16.mxu1 %v8741_v23 }
0x1355   :  { %v1480_v51 = vld [vmem:[#allocation2 + $0x28] sm:$0xff] }
0x1356   :  { %7300 = vmatmul.mubr.msk.f32.vlgmr.msra.gmra.mrb[24].mxu1 %vm520_vm3, %v1476_v42 }
0x1357   :  { %7302 = vmatprep.mubr.msk.f32.mxu1 %vm520_vm3, %v1477_v44  ;;  %7970 = vmatpush3.bf16.msra.mxu1 %v9275_v11 }
0x1358   :  { %7971 = vmatprep.subr.bf16.mxu1 %v8741_v23 }
0x135a   :  { %7303 = vmatmul.mubr.msk.f32.gmra.mrb[26].mxu1 %vm520_vm3, %v1478_v46 }
0x135b   :  { %7305 = vmatprep.mubr.msk.f32.mxu1 %vm520_vm3, %v1479_v48  ;;  %7973 = vmatpush3.bf16.msra.mxu1 %v9285_v13 }
0x135c   :  { %7980 = vmatprep.subr.bf16.mxu1 %v8741_v23 }
0x135e   :  { %7306 = vmatmul.mubr.msk.f32.gmra.mrb[28].mxu1 %vm520_vm3, %v1480_v51 }
0x1421   :  { %v1337_v52 = vpop.f32.mrb[22].mxu1 }
0x1422   :  { %v1341_v53 = vadd.f32 %v1337_v52, %v9144_v49  ;;  %v7279_v54 = vpop.f32.mrb[23].mxu1 }
0x1424   :  { %v6583_v55 = vmul.f32 -1.442695, %v1341_v53 }
0x1426   :  { %8312 = vpow2.f32 %v6583_v55 }
0x1427   :  { %8314 = vtanh.f32 %v1341_v53 }
0x1429   :  { %v9251_v56 = vpop.f32.mrb[24].mxu1 }
0x142a   :  { %v1591_v39 = vpop.f32.mrb[25].mxu1 }
0x142b   :  { %v1592_v22 = vadd.f32 %v9310_v21, %v1591_v39 }
0x142d   :  { %v9253_v57 = vpop.f32.mrb[26].mxu1 }
0x142e   :  { %v9255_v58 = vpop.f32.mrb[27].mxu1 }
0x1430   :  { %v8313_v59 = vpop.eup %8312 }
0x1431   :  { %v1346_v62 = vadd.f32 1.0, %v8313_v59  ;;  %v9257_v63 = vpop.f32.mrb[28].mxu1  ;;  %v8315_v1 = vpop.eup %8314 }
0x1432   :  { %v9259_v0 = vpop.f32.mrb[29].mxu1 }
0x1433   :  { %8316 = vrcp.f32 %v1346_v62 }
0x143d   :  { %v8317_v49 = vpop.eup %8316 }
0x143e   :  { %v1349_v2 = vsel %vm9146_vm6, %v8315_v1, %v8317_v49  ;;  %v1597_v1 = vadd.f32 %v9251_v56, %v9310_v21 }
0x143f   :  { %1352 = vrot.lane.b32.xlu0 %v1349_v2, %s8744_s15  ;;  %v1350_v5 = vmul.f32 %v1349_v2, %v1257_v28 }
0x14b1   :  { %v1353_v3 = vpop.permute.xlu0 %1352 }
0x14b2   :  { %v1355_v4 = vmul.f32 %v1353_v3, %v1349_v2 }
0x14b4   :  { %1357 = vrot.lane.b32.xlu1 %v1355_v4, %s8745_s19 }
0x1526   :  { %v1358_v6 = vpop.permute.xlu1 %1357 }
0x1527   :  { %v9265_v7 = vadd.f32 %v1358_v6, %v1350_v5 }
0x1529   :  { %8318 = vtanh.f32 %v9265_v7 }
0x1533   :  { %v8319_v8 = vpop.eup %8318 }
0x1534   :  { %1363 = vrot.lane.b32.xlu0 %v8319_v8, %s8744_s15 }
0x15a6   :  { %v1364_v14 = vpop.permute.xlu0 %1363 }
0x15a7   :  { %v1366_v15 = vmul.f32 %v1364_v14, %v1349_v2 }
0x15a9   :  { %1368 = vrot.lane.b32.xlu1 %v1366_v15, %s8745_s19 }
0x161b   :  { %v1369_v16 = vpop.permute.xlu1 %1368 }
0x161c   :  { %1371 = vst.msk [vmem:[#allocation2 + $0x30] sm:$0xff] %vm520_vm3, %v1369_v16  ;;  %7289 = vmatmul.mubr.msk.f32.vlgmr.msra.gmra.mrb[14].mxu0 %vm520_vm3, %v1369_v16 }
0x161d   :  { %7958 = vmatpush3.bf16.msra.mxu0 %v9275_v11  ;;  %7319 = vmatprep.mubr.msk.f32.mxu0 %vm8742_vm2, %v8743_v61 }
0x161e   :  { %7959 = vmatprep.subr.bf16.mxu0 %v8741_v23 }
0x1621   :  { %7961 = vmatpush3.bf16.msra.mxu0 %v9285_v13 }
0x1622   :  { %7962 = vmatprep.subr.bf16.mxu0 %v8741_v23 }
0x1623   :  { %v1481_v17 = vld [vmem:[#allocation2 + $0x30] sm:$0xff] }
0x1624   :  { %7320 = vmatmul.mubr.f32.vlgmr.msra.gmra.mrb[16].mxu0 %v8743_v61  ;;  %7308 = vmatprep.mubr.msk.f32.mxu1 %vm520_vm3, %v1481_v17 }
0x1625   :  { %7964 = vmatpush3.bf16.msra.mxu0 %v9275_v11  ;;  %7330 = vmatprep.mubr.msk.f32.mxu0 %vm8742_vm2, %v8743_v61 }
0x1626   :  { %7965 = vmatprep.subr.bf16.mxu0 %v8741_v23 }
0x1629   :  { %7967 = vmatpush3.bf16.msra.mxu0 %v9285_v13 }
0x162a   :  { %7974 = vmatprep.subr.bf16.mxu0 %v8741_v23 }
0x16ef   :  { %v1440_v18 = vpop.f32.mrb[14].mxu0 }
0x16f0   :  { %v1444_v19 = vadd.f32 %v1440_v18, %v9142_v47  ;;  %v7290_v20 = vpop.f32.mrb[15].mxu0 }
0x16f2   :  { %v6585_v31 = vmul.f32 -1.442695, %v1444_v19 }
0x16f7   :  { %v1696_v36 = vpop.f32.mrb[16].mxu0 }
0x16f8   :  { %v1700_v24 = vadd.f32 %v1696_v36, %v1592_v22  ;;  %v7321_v25 = vpop.f32.mrb[17].mxu0 }
0x16fa   :  { %v6604_v60 = vmul.f32 -1.442695, %v1700_v24 }
0x16fc   :  { %8320 = vpow2.f32 %v6604_v60 }
0x16fd   :  { %8322 = vtanh.f32 %v1700_v24  ;;  %v1602_v24 = vadd.f32 %v9310_v21, %v9255_v58 }
0x1706   :  { %v8321_v26 = vpop.eup %8320 }
0x1707   :  { %v1705_v27 = vadd.f32 1.0, %v8321_v26  ;;  %v8323_v43 = vpop.eup %8322 }
0x1709   :  { %8324 = vrcp.f32 %v1705_v27 }
0x170a   :  { %8326 = vpow2.f32 %v6585_v31 }
0x1713   :  { %v8325_v28 = vpop.eup %8324 }
0x1714   :  { %v1708_v47 = vsel %vm9146_vm6, %v8323_v43, %v8325_v28  ;;  %v8327_v32 = vpop.eup %8326 }
0x1715   :  { %1711 = vrot.lane.b32.xlu0 %v1708_v47, %s8744_s15  ;;  %v1709_v33 = vmul.f32 0.0, %v1708_v47  ;;  %v1449_v34 = vadd.f32 1.0, %v8327_v32 }
0x1787   :  { %v1712_v29 = vpop.permute.xlu0 %1711 }
0x1788   :  { %v1714_v30 = vmul.f32 %v1712_v29, %v1708_v47 }
0x178a   :  { %1716 = vrot.lane.b32.xlu1 %v1714_v30, %s8745_s19 }
0x17fc   :  { %v1717_v35 = vpop.permute.xlu1 %1716 }
0x17fd   :  { %v1719_v37 = vadd.f32 %v1717_v35, %v1709_v33 }
0x17ff   :  { %8328 = vtanh.f32 %v1719_v37 }
0x1800   :  { %8330 = vrcp.f32 %v1449_v34 }
0x1801   :  { %8332 = vtanh.f32 %v1444_v19 }
0x1809   :  { %v8329_v38 = vpop.eup %8328 }
0x180a   :  { %v8331_v40 = vpop.eup %8330  ;;  %1722 = vrot.lane.b32.xlu0 %v8329_v38, %s8744_s15 }
0x180b   :  { %v8333_v41 = vpop.eup %8332 }
0x180c   :  { %v1452_v42 = vsel %vm9146_vm6, %v8333_v41, %v8331_v40  ;;  %v1607_v41 = vadd.f32 %v9253_v57, %v9310_v21 }
0x180d   :  { %v1453_v53 = vmul.f32 %v1452_v42, %v9265_v7 }
0x180e   :  { %1455 = vrot.lane.b32.xlu0 %v1452_v42, %s8744_s15 }
0x187c   :  { %v1723_v44 = vpop.permute.xlu0 %1722 }
0x187d   :  { %v1725_v46 = vmul.f32 %v1723_v44, %v1708_v47 }
0x187f   :  { %1727 = vrot.lane.b32.xlu1 %v1725_v46, %s8745_s19 }
0x1880   :  { %v1456_v48 = vpop.permute.xlu0 %1455 }
0x1881   :  { %v1458_v51 = vmul.f32 %v1456_v48, %v1452_v42 }
0x1883   :  { %1460 = vrot.lane.b32.xlu0 %v1458_v51, %s8745_s19 }
0x18f1   :  { %v1728_v52 = vpop.permute.xlu1 %1727 }
0x18f2   :  { %1730 = vst.msk [vmem:[#allocation2] sm:$0xff] %vm520_vm3, %v1728_v52  ;;  %7331 = vmatmul.mubr.msk.f32.vlgmr.msra.gmra.mrb[18].mxu0 %vm520_vm3, %v1728_v52 }
0x18f3   :  { %7976 = vmatpush3.bf16.msra.mxu0 %v9275_v11  ;;  %7352 = vmatprep.mubr.msk.f32.mxu0 %vm8742_vm2, %v8743_v61 }
0x18f4   :  { %7977 = vmatprep.subr.bf16.mxu0 %v8741_v23 }
0x18f5   :  { %v1461_v54 = vpop.permute.xlu0 %1460 }
0x18f6   :  { %v1463_v55 = vadd.f32 %v1461_v54, %v1453_v53 }
0x18f7   :  { %7979 = vmatpush3.bf16.msra.mxu0 %v9285_v13 }
0x18f8   :  { %8334 = vtanh.f32 %v1463_v55  ;;  %7986 = vmatprep.subr.bf16.mxu0 %v8741_v23 }
0x1902   :  { %v8335_v39 = vpop.eup %8334 }
0x1903   :  { %1466 = vrot.lane.b32.xlu0 %v8335_v39, %s8744_s15 }
0x1975   :  { %v1467_v59 = vpop.permute.xlu0 %1466 }
0x1976   :  { %v1469_v62 = vmul.f32 %v1467_v59, %v1452_v42 }
0x1978   :  { %1471 = vrot.lane.b32.xlu0 %v1469_v62, %s8745_s19 }
0x19c5   :  { %v1799_v49 = vpop.f32.mrb[18].mxu0 }
0x19c6   :  { %v1803_v2 = vadd.f32 %v1799_v49, %v1597_v1  ;;  %v7332_v3 = vpop.f32.mrb[19].mxu0 }
0x19c8   :  { %v6606_v4 = vmul.f32 -1.442695, %v1803_v2 }
0x19ca   :  { %8336 = vpow2.f32 %v6606_v4 }
0x19cb   :  { %8338 = vtanh.f32 %v1803_v2 }
0x19d4   :  { %v8337_v5 = vpop.eup %8336 }
0x19d5   :  { %v1808_v6 = vadd.f32 1.0, %v8337_v5  ;;  %v8339_v7 = vpop.eup %8338  ;;  %v1612_v5 = vadd.f32 %v9310_v21, %v9259_v0 }
0x19d7   :  { %8340 = vrcp.f32 %v1808_v6 }
0x19e1   :  { %v8341_v8 = vpop.eup %8340 }
0x19e2   :  { %v1811_v9 = vsel %vm9146_vm6, %v8339_v7, %v8341_v8 }
0x19e3   :  { %1814 = vrot.lane.b32.xlu1 %v1811_v9, %s8744_s15  ;;  %v1812_v16 = vmul.f32 %v1811_v9, %v1719_v37 }
0x19ea   :  { %v1472_v10 = vpop.permute.xlu0 %1471 }
0x19eb   :  { %1474 = vst.msk [vmem:[#allocation2 + $0x38] sm:$0xff] %vm520_vm3, %v1472_v10 }
0x19f2   :  { %v1482_v56 = vld [vmem:[#allocation2 + $0x38] sm:$0xff] }
0x19f3   :  { %7309 = vmatmul.mubr.msk.f32.gmra.mrb[30].mxu1 %vm520_vm3, %v1482_v56 }
0x19f4   :  { %7341 = vmatprep.mubr.msk.f32.mxu1 %vm8742_vm2, %v8743_v61 }
0x1a55   :  { %v1815_v45 = vpop.permute.xlu1 %1814 }
0x1a56   :  { %v1817_v12 = vmul.f32 %v1815_v45, %v1811_v9 }
0x1a58   :  { %1819 = vrot.lane.b32.xlu1 %v1817_v12, %s8745_s19 }
0x1ac6   :  { %v9344_v14 = vpop.f32.mrb[30].mxu1 }
0x1ac7   :  { %v9346_v15 = vpop.f32.mrb[31].mxu1 }
0x1aca   :  { %v1820_v17 = vpop.permute.xlu1 %1819 }
0x1acb   :  { %v1822_v18 = vadd.f32 %v1820_v17, %v1812_v16 }
0x1acd   :  { %8342 = vtanh.f32 %v1822_v18 }
0x1ad7   :  { %v8343_v19 = vpop.eup %8342 }
0x1ad8   :  { %1825 = vrot.lane.b32.xlu1 %v8343_v19, %s8744_s15 }
0x1b4a   :  { %v1826_v20 = vpop.permute.xlu1 %1825 }
0x1b4b   :  { %v1828_v22 = vmul.f32 %v1826_v20, %v1811_v9 }
0x1b4d   :  { %1830 = vrot.lane.b32.xlu1 %v1828_v22, %s8745_s19 }
0x1bbf   :  { %v1831_v36 = vpop.permute.xlu1 %1830 }
0x1bc0   :  { %1833 = vst.msk [vmem:[#allocation2 + $0x8] sm:$0xff] %vm520_vm3, %v1831_v36  ;;  %7342 = vmatmul.mubr.msk.f32.vlgmr.msra.gmra.mrb[32].mxu1 %vm520_vm3, %v1831_v36 }
0x1bc1   :  { %7982 = vmatpush3.bf16.msra.mxu1 %v9275_v11  ;;  %7363 = vmatprep.mubr.msk.f32.mxu1 %vm8742_vm2, %v8743_v61 }
0x1bc2   :  { %7983 = vmatprep.subr.bf16.mxu1 %v8741_v23 }
0x1bc5   :  { %7985 = vmatpush3.bf16.msra.mxu1 %v9285_v13 }
0x1bc6   :  { %7992 = vmatprep.subr.bf16.mxu1 %v8741_v23 }
0x1c93   :  { %v1902_v25 = vpop.f32.mrb[32].mxu1 }
0x1c94   :  { %v1906_v60 = vadd.f32 %v1902_v25, %v1602_v24  ;;  %v7343_v26 = vpop.f32.mrb[33].mxu1 }
0x1c96   :  { %v6608_v27 = vmul.f32 -1.442695, %v1906_v60 }
0x1c98   :  { %8344 = vpow2.f32 %v6608_v27 }
0x1c99   :  { %8346 = vtanh.f32 %v1906_v60  ;;  %v1617_v60 = vadd.f32 %v9257_v63, %v9310_v21 }
0x1ca2   :  { %v8345_v43 = vpop.eup %8344 }
0x1ca3   :  { %v1911_v28 = vadd.f32 1.0, %v8345_v43  ;;  %v8347_v47 = vpop.eup %8346 }
0x1ca5   :  { %8348 = vrcp.f32 %v1911_v28 }
0x1caf   :  { %v8349_v29 = vpop.eup %8348 }
0x1cb0   :  { %v1914_v30 = vsel %vm9146_vm6, %v8347_v47, %v8349_v29 }
0x1cb1   :  { %1917 = vrot.lane.b32.xlu0 %v1914_v30, %s8744_s15  ;;  %v1915_v58 = vmul.f32 %v1914_v30, %v1822_v18 }
0x1d23   :  { %v1918_v31 = vpop.permute.xlu0 %1917 }
0x1d24   :  { %v1920_v32 = vmul.f32 %v1918_v31, %v1914_v30 }
0x1d26   :  { %1922 = vrot.lane.b32.xlu1 %v1920_v32, %s8745_s19 }
0x1d98   :  { %v1923_v33 = vpop.permute.xlu1 %1922 }
0x1d99   :  { %v1925_v34 = vadd.f32 %v1923_v33, %v1915_v58 }
0x1d9b   :  { %8350 = vtanh.f32 %v1925_v34 }
0x1da5   :  { %v8351_v35 = vpop.eup %8350 }
0x1da6   :  { %1928 = vrot.lane.b32.xlu0 %v8351_v35, %s8744_s15  ;;  %v6620_v35 = vld [vmem:[%s10303_s7 + $0x48] sm:$0xff] }
0x1e18   :  { %v1929_v37 = vpop.permute.xlu0 %1928 }
0x1e19   :  { %v1931_v38 = vmul.f32 %v1929_v37, %v1914_v30 }
0x1e1b   :  { %1933 = vrot.lane.b32.xlu1 %v1931_v38, %s8745_s19 }
0x1e8d   :  { %v1934_v40 = vpop.permute.xlu1 %1933 }
0x1e8e   :  { %1936 = vst.msk [vmem:[#allocation2 + $0x10] sm:$0xff] %vm520_vm3, %v1934_v40  ;;  %7353 = vmatmul.mubr.msk.f32.vlgmr.msra.gmra.mrb[20].mxu0 %vm520_vm3, %v1934_v40 }
0x1e8f   :  { %7988 = vmatpush3.bf16.msra.mxu0 %v9275_v11  ;;  %7374 = vmatprep.mubr.msk.f32.mxu0 %vm8742_vm2, %v8743_v61 }
0x1e90   :  { %7989 = vmatprep.subr.bf16.mxu0 %v8741_v23 }
0x1e93   :  { %7991 = vmatpush3.bf16.msra.mxu0 %v9285_v13 }
0x1e94   :  { %7998 = vmatprep.subr.bf16.mxu0 %v8741_v23 }
0x1f61   :  { %v2005_v42 = vpop.f32.mrb[20].mxu0 }
0x1f62   :  { %v2009_v44 = vadd.f32 %v2005_v42, %v1607_v41  ;;  %v7354_v46 = vpop.f32.mrb[21].mxu0  ;;  %v6621_v42 = vld [vmem:[%s10303_s7 + $0x50] sm:$0xff] }
0x1f64   :  { %v6610_v48 = vmul.f32 -1.442695, %v2009_v44 }
0x1f66   :  { %8352 = vpow2.f32 %v6610_v48 }
0x1f67   :  { %8354 = vtanh.f32 %v2009_v44  ;;  %v6622_v44 = vld [vmem:[%s10303_s7 + $0x58] sm:$0xff] }
0x1f68   :  { %v8008_v46 = vpack.c.bf16 %v6622_v44, %v6621_v42 }
0x1f70   :  { %v8353_v51 = vpop.eup %8352 }
0x1f71   :  { %v2014_v52 = vadd.f32 1.0, %v8353_v51  ;;  %v8355_v53 = vpop.eup %8354  ;;  %v2452_v51 = vld [vmem:[#allocation2] sm:$0xff] }
0x1f73   :  { %8356 = vrcp.f32 %v2014_v52  ;;  %v2453_v52 = vld [vmem:[#allocation2 + $0x8] sm:$0xff] }
0x1f7d   :  { %v8357_v54 = vpop.eup %8356 }
0x1f7e   :  { %v2017_v55 = vsel %vm9146_vm6, %v8355_v53, %v8357_v54  ;;  %v2454_v53 = vld [vmem:[#allocation2 + $0x10] sm:$0xff] }
0x1f7f   :  { %2020 = vrot.lane.b32.xlu0 %v2017_v55, %s8744_s15  ;;  %v2018_v57 = vmul.f32 %v2017_v55, %v1925_v34  ;;  %v6619_v34 = vld [vmem:[%s10303_s7 + $0x40] sm:$0xff] }
0x1f80   :  { %v8004_v37 = vpack.c.bf16 %v6620_v35, %v6619_v34 }
0x1ff1   :  { %v2021_v39 = vpop.permute.xlu0 %2020 }
0x1ff2   :  { %v2023_v59 = vmul.f32 %v2021_v39, %v2017_v55 }
0x1ff4   :  { %2025 = vrot.lane.b32.xlu1 %v2023_v59, %s8745_s19  ;;  %v1622_v59 = vadd.f32 %v9310_v21, %v9346_v15 }
0x2066   :  { %v2026_v62 = vpop.permute.xlu1 %2025 }
0x2067   :  { %v2028_v1 = vadd.f32 %v2026_v62, %v2018_v57 }
0x2069   :  { %8358 = vtanh.f32 %v2028_v1 }
0x2073   :  { %v8359_v49 = vpop.eup %8358 }
0x2074   :  { %2031 = vrot.lane.b32.xlu0 %v8359_v49, %s8744_s15 }
0x20e6   :  { %v2032_v2 = vpop.permute.xlu0 %2031 }
0x20e7   :  { %v2034_v3 = vmul.f32 %v2032_v2, %v2017_v55 }
0x20e9   :  { %2036 = vrot.lane.b32.xlu1 %v2034_v3, %s8745_s19 }
0x215b   :  { %v2037_v4 = vpop.permute.xlu1 %2036 }
0x215c   :  { %2039 = vst.msk [vmem:[#allocation2 + $0x18] sm:$0xff] %vm520_vm3, %v2037_v4  ;;  %7364 = vmatmul.mubr.msk.f32.vlgmr.msra.gmra.mrb[34].mxu1 %vm520_vm3, %v2037_v4 }
0x215d   :  { %7994 = vmatpush3.bf16.msra.mxu1 %v9275_v11  ;;  %7385 = vmatprep.mubr.msk.f32.mxu1 %vm8742_vm2, %v8743_v61 }
0x215e   :  { %7995 = vmatprep.subr.bf16.mxu1 %v8741_v23 }
0x2161   :  { %7997 = vmatpush3.bf16.msra.mxu1 %v9285_v13 }
0x2162   :  { %8005 = vmatprep.subr.bf16.mxu1 %v8004_v37 }
0x2163   :  { %v2455_v54 = vld [vmem:[#allocation2 + $0x18] sm:$0xff] }
0x222f   :  { %v2108_v6 = vpop.f32.mrb[34].mxu1 }
0x2230   :  { %v2112_v7 = vadd.f32 %v2108_v6, %v1612_v5  ;;  %v7365_v8 = vpop.f32.mrb[35].mxu1 }
0x2232   :  { %v6612_v9 = vmul.f32 -1.442695, %v2112_v7 }
0x2234   :  { %8360 = vpow2.f32 %v6612_v9 }
0x2235   :  { %8362 = vtanh.f32 %v2112_v7 }
0x223e   :  { %v8361_v10 = vpop.eup %8360 }
0x223f   :  { %v2117_v56 = vadd.f32 1.0, %v8361_v10  ;;  %v8363_v45 = vpop.eup %8362 }
0x2241   :  { %8364 = vrcp.f32 %v2117_v56 }
0x224b   :  { %v8365_v12 = vpop.eup %8364 }
0x224c   :  { %v2120_v16 = vsel %vm9146_vm6, %v8363_v45, %v8365_v12 }
0x224d   :  { %2123 = vrot.lane.b32.xlu0 %v2120_v16, %s8744_s15  ;;  %v2121_v0 = vmul.f32 %v2120_v16, %v2028_v1 }
0x22bf   :  { %v2124_v17 = vpop.permute.xlu0 %2123 }
0x22c0   :  { %v2126_v18 = vmul.f32 %v2124_v17, %v2120_v16 }
0x22c2   :  { %2128 = vrot.lane.b32.xlu1 %v2126_v18, %s8745_s19 }
0x2334   :  { %v2129_v19 = vpop.permute.xlu1 %2128 }
0x2335   :  { %v2131_v20 = vadd.f32 %v2129_v19, %v2121_v0  ;;  %v6623_v19 = vld [vmem:[%s10305_s12 + $0x40] sm:$0xff] }
0x2337   :  { %8366 = vtanh.f32 %v2131_v20 }
0x2341   :  { %v8367_v22 = vpop.eup %8366 }
0x2342   :  { %2134 = vrot.lane.b32.xlu0 %v8367_v22, %s8744_s15 }
0x23b4   :  { %v2135_v36 = vpop.permute.xlu0 %2134 }
0x23b5   :  { %v2137_v24 = vmul.f32 %v2135_v36, %v2120_v16  ;;  %v6625_v36 = vld [vmem:[%s10305_s12 + $0x50] sm:$0xff] }
0x23b7   :  { %2139 = vrot.lane.b32.xlu1 %v2137_v24, %s8745_s19  ;;  %v6626_v24 = vld [vmem:[%s10305_s12 + $0x58] sm:$0xff] }
0x2429   :  { %v2140_v25 = vpop.permute.xlu1 %2139 }
0x242a   :  { %2142 = vst.msk [vmem:[#allocation2 + $0x20] sm:$0xff] %vm520_vm3, %v2140_v25  ;;  %7375 = vmatmul.mubr.msk.f32.vlgmr.msra.gmra.mrb[22].mxu0 %vm520_vm3, %v2140_v25  ;;  %v9470_v25 = vpack.c.bf16 %v6626_v24, %v6625_v36 }
0x242b   :  { %8000 = vmatpush3.bf16.msra.mxu0 %v9275_v11  ;;  %7396 = vmatprep.mubr.msk.f32.mxu0 %vm8742_vm2, %v8743_v61 }
0x242c   :  { %8001 = vmatprep.subr.bf16.mxu0 %v8741_v23 }
0x242f   :  { %8003 = vmatpush3.bf16.msra.mxu0 %v9285_v13 }
0x2430   :  { %8012 = vmatprep.subr.bf16.mxu0 %v8741_v23 }
0x2431   :  { %v2456_v55 = vld [vmem:[#allocation2 + $0x20] sm:$0xff] }
0x24fd   :  { %v2211_v26 = vpop.f32.mrb[22].mxu0 }
0x24fe   :  { %v2215_v27 = vadd.f32 %v2211_v26, %v1617_v60  ;;  %v7376_v43 = vpop.f32.mrb[23].mxu0 }
0x2500   :  { %v6614_v28 = vmul.f32 -1.442695, %v2215_v27 }
0x2502   :  { %8368 = vpow2.f32 %v6614_v28  ;;  %v1627_v28 = vadd.f32 %v9344_v14, %v9310_v21 }
0x2503   :  { %8370 = vtanh.f32 %v2215_v27 }
0x250c   :  { %v8369_v47 = vpop.eup %8368 }
0x250d   :  { %v2220_v29 = vadd.f32 1.0, %v8369_v47  ;;  %v8371_v11 = vpop.eup %8370 }
0x250f   :  { %8372 = vrcp.f32 %v2220_v29 }
0x2519   :  { %v8373_v30 = vpop.eup %8372 }
0x251a   :  { %v2223_v31 = vsel %vm9146_vm6, %v8371_v11, %v8373_v30  ;;  %v9496_v30 = vld [vmem:[%s10306_s10 + $0x2] ss:$0 sm:$0xff] }
0x251b   :  { %2226 = vrot.lane.b32.xlu0 %v2223_v31, %s8744_s15  ;;  %v2224_v63 = vmul.f32 %v2223_v31, %v2131_v20  ;;  %v6624_v20 = vld [vmem:[%s10305_s12 + $0x48] sm:$0xff] }
0x251c   :  { %v9460_v22 = vpack.c.bf16 %v6624_v20, %v6623_v19 }
0x258d   :  { %v2227_v13 = vpop.permute.xlu0 %2226 }
0x258e   :  { %v2229_v32 = vmul.f32 %v2227_v13, %v2223_v31 }
0x2590   :  { %2231 = vrot.lane.b32.xlu1 %v2229_v32, %s8745_s19 }
0x2602   :  { %v2232_v58 = vpop.permute.xlu1 %2231 }
0x2603   :  { %v2234_v33 = vadd.f32 %v2232_v58, %v2224_v63 }
0x2605   :  { %8374 = vtanh.f32 %v2234_v33 }
0x260f   :  { %v8375_v38 = vpop.eup %8374 }
0x2610   :  { %2237 = vrot.lane.b32.xlu0 %v8375_v38, %s8744_s15 }
0x2682   :  { %v2238_v40 = vpop.permute.xlu0 %2237 }
0x2683   :  { %v2240_v41 = vmul.f32 %v2238_v40, %v2223_v31 }
0x2685   :  { %2242 = vrot.lane.b32.xlu1 %v2240_v41, %s8745_s19 }
0x26f7   :  { %v2243_v48 = vpop.permute.xlu1 %2242 }
0x26f8   :  { %2245 = vst.msk [vmem:[#allocation2 + $0x28] sm:$0xff] %vm520_vm3, %v2243_v48  ;;  %7386 = vmatmul.mubr.msk.f32.vlgmr.msra.gmra.mrb[36].mxu1 %vm520_vm3, %v2243_v48 }
0x26f9   :  { %8007 = vmatpush3.bf16.msra.mxu1 %v8004_v37  ;;  %7407 = vmatprep.mubr.msk.f32.mxu1 %vm520_vm3, %v2452_v51 }
0x26fa   :  { %8009 = vmatprep.subr.bf16.mxu1 %v8008_v46 }
0x26fd   :  { %8011 = vmatpush3.bf16.msra.mxu1 %v8008_v46 }
0x26fe   :  { %8024 = vmatprep.subr.bf16.mxu1 %v8741_v23 }
0x26ff   :  { %v2457_v39 = vld [vmem:[#allocation2 + $0x28] sm:$0xff] }
0x2700   :  { %7408 = vmatmul.mubr.msk.f32.vlgmr.msra.gmra.mrb[38].mxu1 %vm520_vm3, %v2453_v52 }
0x2701   :  { %7410 = vmatprep.mubr.msk.f32.mxu1 %vm520_vm3, %v2454_v53  ;;  %8026 = vmatpush3.bf16.msra.mxu1 %v9460_v22 }
0x2702   :  { %8027 = vmatprep.subr.bf16.mxu1 %v8741_v23 }
0x2704   :  { %7411 = vmatmul.mubr.msk.f32.gmra.mrb[40].mxu1 %vm520_vm3, %v2455_v54 }
0x2705   :  { %7413 = vmatprep.mubr.msk.f32.mxu1 %vm520_vm3, %v2456_v55  ;;  %8029 = vmatpush3.bf16.msra.mxu1 %v9470_v25 }
0x2706   :  { %8036 = vmatprep.subr.bf16.mxu1 %v8741_v23 }
0x2708   :  { %7414 = vmatmul.mubr.msk.f32.gmra.mrb[42].mxu1 %vm520_vm3, %v2457_v39 }
0x27cb   :  { %v2314_v57 = vpop.f32.mrb[36].mxu1 }
0x27cc   :  { %v2318_v62 = vadd.f32 %v2314_v57, %v1622_v59  ;;  %v7387_v1 = vpop.f32.mrb[37].mxu1 }
0x27ce   :  { %v6616_v49 = vmul.f32 -1.442695, %v2318_v62 }
0x27d0   :  { %8376 = vpow2.f32 %v6616_v49 }
0x27d1   :  { %8378 = vtanh.f32 %v2318_v62 }
0x27d3   :  { %v9436_v2 = vpop.f32.mrb[38].mxu1 }
0x27d4   :  { %v2568_v3 = vpop.f32.mrb[39].mxu1 }
0x27d5   :  { %v2569_v31 = vadd.f32 %v9496_v30, %v2568_v3 }
0x27d7   :  { %v9438_v4 = vpop.f32.mrb[40].mxu1 }
0x27d8   :  { %v9440_v5 = vpop.f32.mrb[41].mxu1 }
0x27da   :  { %v8377_v6 = vpop.eup %8376 }
0x27db   :  { %v2323_v7 = vadd.f32 1.0, %v8377_v6  ;;  %v9442_v8 = vpop.f32.mrb[42].mxu1  ;;  %v8379_v15 = vpop.eup %8378 }
0x27dc   :  { %v9444_v9 = vpop.f32.mrb[43].mxu1 }
0x27dd   :  { %8380 = vrcp.f32 %v2323_v7 }
0x27e7   :  { %v8381_v10 = vpop.eup %8380 }
0x27e8   :  { %v2326_v56 = vsel %vm9146_vm6, %v8379_v15, %v8381_v10  ;;  %v2574_v10 = vadd.f32 %v9436_v2, %v9496_v30 }
0x27e9   :  { %2329 = vrot.lane.b32.xlu0 %v2326_v56, %s8744_s15  ;;  %v2327_v16 = vmul.f32 %v2326_v56, %v2234_v33 }
0x285b   :  { %v2330_v45 = vpop.permute.xlu0 %2329 }
0x285c   :  { %v2332_v12 = vmul.f32 %v2330_v45, %v2326_v56 }
0x285e   :  { %2334 = vrot.lane.b32.xlu1 %v2332_v12, %s8745_s19 }
0x28d0   :  { %v2335_v17 = vpop.permute.xlu1 %2334 }
0x28d1   :  { %v9450_v18 = vadd.f32 %v2335_v17, %v2327_v16 }
0x28d3   :  { %8382 = vtanh.f32 %v9450_v18 }
0x28dd   :  { %v8383_v0 = vpop.eup %8382 }
0x28de   :  { %2340 = vrot.lane.b32.xlu0 %v8383_v0, %s8744_s15 }
0x2950   :  { %v2341_v60 = vpop.permute.xlu0 %2340 }
0x2951   :  { %v2343_v26 = vmul.f32 %v2341_v60, %v2326_v56 }
0x2953   :  { %2345 = vrot.lane.b32.xlu1 %v2343_v26, %s8745_s19 }
0x29c5   :  { %v2346_v27 = vpop.permute.xlu1 %2345 }
0x29c6   :  { %2348 = vst.msk [vmem:[#allocation2 + $0x30] sm:$0xff] %vm520_vm3, %v2346_v27  ;;  %7397 = vmatmul.mubr.msk.f32.vlgmr.msra.gmra.mrb[24].mxu0 %vm520_vm3, %v2346_v27 }
0x29c7   :  { %8014 = vmatpush3.bf16.msra.mxu0 %v9460_v22  ;;  %7427 = vmatprep.mubr.msk.f32.mxu0 %vm8742_vm2, %v8743_v61 }
0x29c8   :  { %8015 = vmatprep.subr.bf16.mxu0 %v8741_v23 }
0x29cb   :  { %8017 = vmatpush3.bf16.msra.mxu0 %v9470_v25 }
0x29cc   :  { %8018 = vmatprep.subr.bf16.mxu0 %v8741_v23 }
0x29cd   :  { %v2458_v43 = vld [vmem:[#allocation2 + $0x30] sm:$0xff] }
0x29ce   :  { %7428 = vmatmul.mubr.f32.vlgmr.msra.gmra.mrb[26].mxu0 %v8743_v61  ;;  %7416 = vmatprep.mubr.msk.f32.mxu1 %vm520_vm3, %v2458_v43 }
0x29cf   :  { %8020 = vmatpush3.bf16.msra.mxu0 %v9460_v22  ;;  %7438 = vmatprep.mubr.msk.f32.mxu0 %vm8742_vm2, %v8743_v61 }
0x29d0   :  { %8021 = vmatprep.subr.bf16.mxu0 %v8741_v23 }
0x29d3   :  { %8023 = vmatpush3.bf16.msra.mxu0 %v9470_v25 }
0x29d4   :  { %8030 = vmatprep.subr.bf16.mxu0 %v8741_v23 }
0x2a99   :  { %v2417_v47 = vpop.f32.mrb[24].mxu0 }
0x2a9a   :  { %v2421_v29 = vadd.f32 %v2417_v47, %v1627_v28  ;;  %v7398_v11 = vpop.f32.mrb[25].mxu0 }
0x2a9c   :  { %v6618_v40 = vmul.f32 -1.442695, %v2421_v29 }
0x2aa1   :  { %v2673_v13 = vpop.f32.mrb[26].mxu0 }
0x2aa2   :  { %v2677_v32 = vadd.f32 %v2673_v13, %v2569_v31  ;;  %v7429_v63 = vpop.f32.mrb[27].mxu0 }
0x2aa4   :  { %v6637_v58 = vmul.f32 -1.442695, %v2677_v32 }
0x2aa6   :  { %8384 = vpow2.f32 %v6637_v58 }
0x2aa7   :  { %8386 = vtanh.f32 %v2677_v32  ;;  %v2579_v32 = vadd.f32 %v9496_v30, %v9440_v5 }
0x2ab0   :  { %v8385_v33 = vpop.eup %8384 }
0x2ab1   :  { %v2682_v34 = vadd.f32 1.0, %v8385_v33  ;;  %v8387_v21 = vpop.eup %8386 }
0x2ab3   :  { %8388 = vrcp.f32 %v2682_v34 }
0x2ab4   :  { %8390 = vpow2.f32 %v6618_v40 }
0x2abd   :  { %v8389_v14 = vpop.eup %8388 }
0x2abe   :  { %v2685_v35 = vsel %vm9146_vm6, %v8387_v21, %v8389_v14  ;;  %v8391_v41 = vpop.eup %8390 }
0x2abf   :  { %2688 = vrot.lane.b32.xlu0 %v2685_v35, %s8744_s15  ;;  %v2686_v42 = vmul.f32 0.0, %v2685_v35  ;;  %v2426_v44 = vadd.f32 1.0, %v8391_v41 }
0x2b31   :  { %v2689_v37 = vpop.permute.xlu0 %2688 }
0x2b32   :  { %v2691_v38 = vmul.f32 %v2689_v37, %v2685_v35 }
0x2b34   :  { %2693 = vrot.lane.b32.xlu1 %v2691_v38, %s8745_s19 }
0x2ba6   :  { %v2694_v46 = vpop.permute.xlu1 %2693 }
0x2ba7   :  { %v2696_v48 = vadd.f32 %v2694_v46, %v2686_v42 }
0x2ba9   :  { %8392 = vtanh.f32 %v2696_v48 }
0x2baa   :  { %8394 = vrcp.f32 %v2426_v44 }
0x2bab   :  { %8396 = vtanh.f32 %v2421_v29 }
0x2bb3   :  { %v8393_v51 = vpop.eup %8392 }
0x2bb4   :  { %v8395_v52 = vpop.eup %8394  ;;  %2699 = vrot.lane.b32.xlu0 %v8393_v51, %s8744_s15 }
0x2bb5   :  { %v8397_v53 = vpop.eup %8396 }
0x2bb6   :  { %v2429_v54 = vsel %vm9146_vm6, %v8397_v53, %v8395_v52  ;;  %v2584_v53 = vadd.f32 %v9438_v4, %v9496_v30 }
0x2bb7   :  { %v2430_v1 = vmul.f32 %v2429_v54, %v9450_v18 }
0x2bb8   :  { %2432 = vrot.lane.b32.xlu0 %v2429_v54, %s8744_s15 }
0x2c26   :  { %v2700_v55 = vpop.permute.xlu0 %2699 }
0x2c27   :  { %v2702_v39 = vmul.f32 %v2700_v55, %v2685_v35 }
0x2c29   :  { %2704 = vrot.lane.b32.xlu1 %v2702_v39, %s8745_s19 }
0x2c2a   :  { %v2433_v59 = vpop.permute.xlu0 %2432 }
0x2c2b   :  { %v2435_v57 = vmul.f32 %v2433_v59, %v2429_v54 }
0x2c2d   :  { %2437 = vrot.lane.b32.xlu0 %v2435_v57, %s8745_s19 }
0x2c9b   :  { %v2705_v62 = vpop.permute.xlu1 %2704 }
0x2c9c   :  { %2707 = vst.msk [vmem:[#allocation2] sm:$0xff] %vm520_vm3, %v2705_v62  ;;  %7439 = vmatmul.mubr.msk.f32.vlgmr.msra.gmra.mrb[28].mxu0 %vm520_vm3, %v2705_v62 }
0x2c9d   :  { %8032 = vmatpush3.bf16.msra.mxu0 %v9460_v22  ;;  %7460 = vmatprep.mubr.msk.f32.mxu0 %vm8742_vm2, %v8743_v61 }
0x2c9e   :  { %8033 = vmatprep.subr.bf16.mxu0 %v8741_v23 }
0x2c9f   :  { %v2438_v49 = vpop.permute.xlu0 %2437 }
0x2ca0   :  { %v2440_v3 = vadd.f32 %v2438_v49, %v2430_v1 }
0x2ca1   :  { %8035 = vmatpush3.bf16.msra.mxu0 %v9470_v25 }
0x2ca2   :  { %8398 = vtanh.f32 %v2440_v3  ;;  %8042 = vmatprep.subr.bf16.mxu0 %v8741_v23 }
0x2cac   :  { %v8399_v6 = vpop.eup %8398 }
0x2cad   :  { %2443 = vrot.lane.b32.xlu0 %v8399_v6, %s8744_s15 }
0x2d1f   :  { %v2444_v7 = vpop.permute.xlu0 %2443 }
0x2d20   :  { %v2446_v15 = vmul.f32 %v2444_v7, %v2429_v54 }
0x2d22   :  { %2448 = vrot.lane.b32.xlu0 %v2446_v15, %s8745_s19 }
0x2d6f   :  { %v2776_v56 = vpop.f32.mrb[28].mxu0 }
0x2d70   :  { %v2780_v45 = vadd.f32 %v2776_v56, %v2574_v10  ;;  %v7440_v12 = vpop.f32.mrb[29].mxu0 }
0x2d72   :  { %v6639_v16 = vmul.f32 -1.442695, %v2780_v45 }
0x2d74   :  { %8400 = vpow2.f32 %v6639_v16 }
0x2d75   :  { %8402 = vtanh.f32 %v2780_v45 }
0x2d7e   :  { %v8401_v17 = vpop.eup %8400 }
0x2d7f   :  { %v2785_v18 = vadd.f32 1.0, %v8401_v17  ;;  %v8403_v0 = vpop.eup %8402  ;;  %v2589_v17 = vadd.f32 %v9496_v30, %v9444_v9 }
0x2d81   :  { %8404 = vrcp.f32 %v2785_v18 }
0x2d8b   :  { %v8405_v19 = vpop.eup %8404 }
0x2d8c   :  { %v2788_v20 = vsel %vm9146_vm6, %v8403_v0, %v8405_v19 }
0x2d8d   :  { %2791 = vrot.lane.b32.xlu1 %v2788_v20, %s8744_s15  ;;  %v2789_v43 = vmul.f32 %v2788_v20, %v2696_v48 }
0x2d94   :  { %v2449_v36 = vpop.permute.xlu0 %2448 }
0x2d95   :  { %2451 = vst.msk [vmem:[#allocation2 + $0x38] sm:$0xff] %vm520_vm3, %v2449_v36 }
0x2d9c   :  { %v2459_v2 = vld [vmem:[#allocation2 + $0x38] sm:$0xff] }
0x2d9d   :  { %7417 = vmatmul.mubr.msk.f32.gmra.mrb[44].mxu1 %vm520_vm3, %v2459_v2 }
0x2d9e   :  { %7449 = vmatprep.mubr.msk.f32.mxu1 %vm8742_vm2, %v8743_v61 }
0x2dff   :  { %v2792_v24 = vpop.permute.xlu1 %2791 }
0x2e00   :  { %v2794_v60 = vmul.f32 %v2792_v24, %v2788_v20 }
0x2e02   :  { %2796 = vrot.lane.b32.xlu1 %v2794_v60, %s8745_s19 }
0x2e70   :  { %v9530_v26 = vpop.f32.mrb[44].mxu1 }
0x2e71   :  { %v9532_v27 = vpop.f32.mrb[45].mxu1 }
0x2e74   :  { %v2797_v28 = vpop.permute.xlu1 %2796 }
0x2e75   :  { %v2799_v47 = vadd.f32 %v2797_v28, %v2789_v43 }
0x2e77   :  { %8406 = vtanh.f32 %v2799_v47 }
0x2e81   :  { %v8407_v29 = vpop.eup %8406 }
0x2e82   :  { %2802 = vrot.lane.b32.xlu1 %v8407_v29, %s8744_s15 }
0x2ef4   :  { %v2803_v11 = vpop.permute.xlu1 %2802 }
0x2ef5   :  { %v2805_v31 = vmul.f32 %v2803_v11, %v2788_v20 }
0x2ef7   :  { %2807 = vrot.lane.b32.xlu1 %v2805_v31, %s8745_s19 }
0x2f69   :  { %v2808_v13 = vpop.permute.xlu1 %2807 }
0x2f6a   :  { %2810 = vst.msk [vmem:[#allocation2 + $0x8] sm:$0xff] %vm520_vm3, %v2808_v13  ;;  %7450 = vmatmul.mubr.msk.f32.vlgmr.msra.gmra.mrb[46].mxu1 %vm520_vm3, %v2808_v13 }
0x2f6b   :  { %8038 = vmatpush3.bf16.msra.mxu1 %v9460_v22  ;;  %7471 = vmatprep.mubr.msk.f32.mxu1 %vm8742_vm2, %v8743_v61 }
0x2f6c   :  { %8039 = vmatprep.subr.bf16.mxu1 %v8741_v23 }
0x2f6f   :  { %8041 = vmatpush3.bf16.msra.mxu1 %v9470_v25 }
0x2f70   :  { %8048 = vmatprep.subr.bf16.mxu1 %v8741_v23 }
0x303d   :  { %v2879_v63 = vpop.f32.mrb[46].mxu1 }
0x303e   :  { %v2883_v58 = vadd.f32 %v2879_v63, %v2579_v32  ;;  %v7451_v33 = vpop.f32.mrb[47].mxu1 }
0x3040   :  { %v6641_v34 = vmul.f32 -1.442695, %v2883_v58 }
0x3042   :  { %8408 = vpow2.f32 %v6641_v34 }
0x3043   :  { %8410 = vtanh.f32 %v2883_v58  ;;  %v2594_v58 = vadd.f32 %v9442_v8, %v9496_v30 }
0x304c   :  { %v8409_v21 = vpop.eup %8408 }
0x304d   :  { %v2888_v14 = vadd.f32 1.0, %v8409_v21  ;;  %v8411_v35 = vpop.eup %8410 }
0x304f   :  { %8412 = vrcp.f32 %v2888_v14 }
0x3059   :  { %v8413_v37 = vpop.eup %8412 }
0x305a   :  { %v2891_v38 = vsel %vm9146_vm6, %v8411_v35, %v8413_v37 }
0x305b   :  { %2894 = vrot.lane.b32.xlu0 %v2891_v38, %s8744_s15  ;;  %v2892_v5 = vmul.f32 %v2891_v38, %v2799_v47 }
0x30cd   :  { %v2895_v40 = vpop.permute.xlu0 %2894 }
0x30ce   :  { %v2897_v41 = vmul.f32 %v2895_v40, %v2891_v38 }
0x30d0   :  { %2899 = vrot.lane.b32.xlu1 %v2897_v41, %s8745_s19 }
0x3142   :  { %v2900_v42 = vpop.permute.xlu1 %2899 }
0x3143   :  { %v2902_v44 = vadd.f32 %v2900_v42, %v2892_v5 }
0x3145   :  { %8414 = vtanh.f32 %v2902_v44 }
0x314f   :  { %v8415_v46 = vpop.eup %8414 }
0x3150   :  { %2905 = vrot.lane.b32.xlu0 %v8415_v46, %s8744_s15  ;;  %v6653_v46 = vld [vmem:[%s10303_s7 + $0x68] sm:$0xff] }
0x31c2   :  { %v2906_v48 = vpop.permute.xlu0 %2905 }
0x31c3   :  { %v2908_v51 = vmul.f32 %v2906_v48, %v2891_v38 }
0x31c5   :  { %2910 = vrot.lane.b32.xlu1 %v2908_v51, %s8745_s19 }
0x3237   :  { %v2911_v52 = vpop.permute.xlu1 %2910 }
0x3238   :  { %2913 = vst.msk [vmem:[#allocation2 + $0x10] sm:$0xff] %vm520_vm3, %v2911_v52  ;;  %7461 = vmatmul.mubr.msk.f32.vlgmr.msra.gmra.mrb[30].mxu0 %vm520_vm3, %v2911_v52 }
0x3239   :  { %8044 = vmatpush3.bf16.msra.mxu0 %v9460_v22  ;;  %7482 = vmatprep.mubr.msk.f32.mxu0 %vm8742_vm2, %v8743_v61 }
0x323a   :  { %8045 = vmatprep.subr.bf16.mxu0 %v8741_v23 }
0x323d   :  { %8047 = vmatpush3.bf16.msra.mxu0 %v9470_v25 }
0x323e   :  { %8054 = vmatprep.subr.bf16.mxu0 %v8741_v23 }
0x330b   :  { %v2982_v54 = vpop.f32.mrb[30].mxu0 }
0x330c   :  { %v2986_v55 = vadd.f32 %v2982_v54, %v2584_v53  ;;  %v7462_v39 = vpop.f32.mrb[31].mxu0  ;;  %v6654_v54 = vld [vmem:[%s10303_s7 + $0x70] sm:$0xff] }
0x330e   :  { %v6643_v59 = vmul.f32 -1.442695, %v2986_v55 }
0x3310   :  { %8416 = vpow2.f32 %v6643_v59 }
0x3311   :  { %8418 = vtanh.f32 %v2986_v55  ;;  %v6655_v55 = vld [vmem:[%s10303_s7 + $0x78] sm:$0xff] }
0x3312   :  { %v8064_v39 = vpack.c.bf16 %v6655_v55, %v6654_v54 }
0x331a   :  { %v8417_v57 = vpop.eup %8416 }
0x331b   :  { %v2991_v62 = vadd.f32 1.0, %v8417_v57  ;;  %v8419_v1 = vpop.eup %8418  ;;  %v3429_v57 = vld [vmem:[#allocation2] sm:$0xff] }
0x331d   :  { %8420 = vrcp.f32 %v2991_v62  ;;  %v3430_v62 = vld [vmem:[#allocation2 + $0x8] sm:$0xff] }
0x3327   :  { %v8421_v49 = vpop.eup %8420 }
0x3328   :  { %v2994_v3 = vsel %vm9146_vm6, %v8419_v1, %v8421_v49  ;;  %v3431_v1 = vld [vmem:[#allocation2 + $0x10] sm:$0xff] }
0x3329   :  { %2997 = vrot.lane.b32.xlu0 %v2994_v3, %s8744_s15  ;;  %v2995_v4 = vmul.f32 %v2994_v3, %v2902_v44  ;;  %v6652_v44 = vld [vmem:[%s10303_s7 + $0x60] sm:$0xff]  ;;  %s10310_s7 = sld [smem:[#allocation23_spill]] }
0x332a   :  { %v8060_v48 = vpack.c.bf16 %v6653_v46, %v6652_v44 }
0x339b   :  { %v2998_v6 = vpop.permute.xlu0 %2997 }
0x339c   :  { %v3000_v7 = vmul.f32 %v2998_v6, %v2994_v3 }
0x339e   :  { %3002 = vrot.lane.b32.xlu1 %v3000_v7, %s8745_s19  ;;  %v2599_v7 = vadd.f32 %v9496_v30, %v9532_v27 }
0x3410   :  { %v3003_v15 = vpop.permute.xlu1 %3002 }
0x3411   :  { %v3005_v10 = vadd.f32 %v3003_v15, %v2995_v4 }
0x3413   :  { %8422 = vtanh.f32 %v3005_v10 }
0x341d   :  { %v8423_v56 = vpop.eup %8422 }
0x341e   :  { %3008 = vrot.lane.b32.xlu0 %v8423_v56, %s8744_s15 }
0x3490   :  { %v3009_v45 = vpop.permute.xlu0 %3008 }
0x3491   :  { %v3011_v12 = vmul.f32 %v3009_v45, %v2994_v3 }
0x3493   :  { %3013 = vrot.lane.b32.xlu1 %v3011_v12, %s8745_s19 }
0x3505   :  { %v3014_v16 = vpop.permute.xlu1 %3013 }
0x3506   :  { %3016 = vst.msk [vmem:[#allocation2 + $0x18] sm:$0xff] %vm520_vm3, %v3014_v16  ;;  %7472 = vmatmul.mubr.msk.f32.vlgmr.msra.gmra.mrb[48].mxu1 %vm520_vm3, %v3014_v16 }
0x3507   :  { %8050 = vmatpush3.bf16.msra.mxu1 %v9460_v22  ;;  %7493 = vmatprep.mubr.msk.f32.mxu1 %vm8742_vm2, %v8743_v61 }
0x3508   :  { %8051 = vmatprep.subr.bf16.mxu1 %v8741_v23 }
0x350b   :  { %8053 = vmatpush3.bf16.msra.mxu1 %v9470_v25 }
0x350c   :  { %8061 = vmatprep.subr.bf16.mxu1 %v8060_v48 }
0x350d   :  { %v3432_v49 = vld [vmem:[#allocation2 + $0x18] sm:$0xff] }
0x35d9   :  { %v3085_v18 = vpop.f32.mrb[48].mxu1 }
0x35da   :  { %v3089_v0 = vadd.f32 %v3085_v18, %v2589_v17  ;;  %v7473_v19 = vpop.f32.mrb[49].mxu1 }
0x35dc   :  { %v6645_v20 = vmul.f32 -1.442695, %v3089_v0 }
0x35de   :  { %8424 = vpow2.f32 %v6645_v20 }
0x35df   :  { %8426 = vtanh.f32 %v3089_v0 }
0x35e8   :  { %v8425_v36 = vpop.eup %8424 }
0x35e9   :  { %v3094_v2 = vadd.f32 1.0, %v8425_v36  ;;  %v8427_v24 = vpop.eup %8426 }
0x35eb   :  { %8428 = vrcp.f32 %v3094_v2 }
0x35f5   :  { %v8429_v60 = vpop.eup %8428 }
0x35f6   :  { %v3097_v43 = vsel %vm9146_vm6, %v8427_v24, %v8429_v60 }
0x35f7   :  { %3100 = vrot.lane.b32.xlu0 %v3097_v43, %s8744_s15  ;;  %v3098_v9 = vmul.f32 %v3097_v43, %v3005_v10 }
0x3669   :  { %v3101_v28 = vpop.permute.xlu0 %3100 }
0x366a   :  { %v3103_v47 = vmul.f32 %v3101_v28, %v3097_v43 }
0x366c   :  { %3105 = vrot.lane.b32.xlu1 %v3103_v47, %s8745_s19 }
0x36de   :  { %v3106_v29 = vpop.permute.xlu1 %3105 }
0x36df   :  { %v3108_v11 = vadd.f32 %v3106_v29, %v3098_v9 }
0x36e1   :  { %8430 = vtanh.f32 %v3108_v11 }
0x36eb   :  { %v8431_v31 = vpop.eup %8430 }
0x36ec   :  { %3111 = vrot.lane.b32.xlu0 %v8431_v31, %s8744_s15  ;;  %v6656_v31 = vld [vmem:[%s10305_s12 + $0x60] sm:$0xff] }
0x375e   :  { %v3112_v13 = vpop.permute.xlu0 %3111 }
0x375f   :  { %v3114_v32 = vmul.f32 %v3112_v13, %v3097_v43  ;;  %v6657_v13 = vld [vmem:[%s10305_s12 + $0x68] sm:$0xff] }
0x3761   :  { %3116 = vrot.lane.b32.xlu1 %v3114_v32, %s8745_s19  ;;  %v9647_v32 = vpack.c.bf16 %v6657_v13, %v6656_v31 }
0x37d3   :  { %v3117_v63 = vpop.permute.xlu1 %3116 }
0x37d4   :  { %3119 = vst.msk [vmem:[#allocation2 + $0x20] sm:$0xff] %vm520_vm3, %v3117_v63  ;;  %7483 = vmatmul.mubr.msk.f32.vlgmr.msra.gmra.mrb[32].mxu0 %vm520_vm3, %v3117_v63  ;;  %v6658_v63 = vld [vmem:[%s10305_s12 + $0x70] sm:$0xff] }
0x37d5   :  { %8056 = vmatpush3.bf16.msra.mxu0 %v9460_v22  ;;  %7504 = vmatprep.mubr.msk.f32.mxu0 %vm8742_vm2, %v8743_v61 }
0x37d6   :  { %8057 = vmatprep.subr.bf16.mxu0 %v8741_v23 }
0x37d9   :  { %8059 = vmatpush3.bf16.msra.mxu0 %v9470_v25 }
0x37da   :  { %8068 = vmatprep.subr.bf16.mxu0 %v8741_v23 }
0x37db   :  { %v3433_v3 = vld [vmem:[#allocation2 + $0x20] sm:$0xff] }
0x38a7   :  { %v3188_v33 = vpop.f32.mrb[32].mxu0 }
0x38a8   :  { %v3192_v34 = vadd.f32 %v3188_v33, %v2594_v58  ;;  %v7484_v21 = vpop.f32.mrb[33].mxu0  ;;  %v6659_v58 = vld [vmem:[%s10305_s12 + $0x78] sm:$0xff] }
0x38aa   :  { %v6647_v14 = vmul.f32 -1.442695, %v3192_v34 }
0x38ac   :  { %8432 = vpow2.f32 %v6647_v14  ;;  %v2604_v14 = vadd.f32 %v9530_v26, %v9496_v30 }
0x38ad   :  { %8434 = vtanh.f32 %v3192_v34  ;;  %v9658_v34 = vpack.c.bf16 %v6659_v58, %v6658_v63 }
0x38b6   :  { %v8433_v35 = vpop.eup %8432 }
0x38b7   :  { %v3197_v37 = vadd.f32 1.0, %v8433_v35  ;;  %v8435_v22 = vpop.eup %8434 }
0x38b9   :  { %8436 = vrcp.f32 %v3197_v37 }
0x38c3   :  { %v8437_v38 = vpop.eup %8436 }
0x38c4   :  { %v3200_v40 = vsel %vm9146_vm6, %v8435_v22, %v8437_v38  ;;  %v9678_v38 = vld [vmem:[%s10306_s10 + $0x3] ss:$0 sm:$0xff] }
0x38c5   :  { %3203 = vrot.lane.b32.xlu0 %v3200_v40, %s8744_s15  ;;  %v3201_v8 = vmul.f32 %v3200_v40, %v3108_v11 }
0x3937   :  { %v3204_v25 = vpop.permute.xlu0 %3203 }
0x3938   :  { %v3206_v41 = vmul.f32 %v3204_v25, %v3200_v40 }
0x393a   :  { %3208 = vrot.lane.b32.xlu1 %v3206_v41, %s8745_s19 }
0x39ac   :  { %v3209_v5 = vpop.permute.xlu1 %3208 }
0x39ad   :  { %v3211_v42 = vadd.f32 %v3209_v5, %v3201_v8 }
0x39af   :  { %8438 = vtanh.f32 %v3211_v42 }
0x39b9   :  { %v8439_v51 = vpop.eup %8438 }
0x39ba   :  { %3214 = vrot.lane.b32.xlu0 %v8439_v51, %s8744_s15 }
0x3a2c   :  { %v3215_v52 = vpop.permute.xlu0 %3214 }
0x3a2d   :  { %v3217_v53 = vmul.f32 %v3215_v52, %v3200_v40 }
0x3a2f   :  { %3219 = vrot.lane.b32.xlu1 %v3217_v53, %s8745_s19 }
0x3aa1   :  { %v3220_v59 = vpop.permute.xlu1 %3219 }
0x3aa2   :  { %3222 = vst.msk [vmem:[#allocation2 + $0x28] sm:$0xff] %vm520_vm3, %v3220_v59  ;;  %7494 = vmatmul.mubr.msk.f32.vlgmr.msra.gmra.mrb[50].mxu1 %vm520_vm3, %v3220_v59 }
0x3aa3   :  { %8063 = vmatpush3.bf16.msra.mxu1 %v8060_v48  ;;  %7515 = vmatprep.mubr.msk.f32.mxu1 %vm520_vm3, %v3429_v57 }
0x3aa4   :  { %8065 = vmatprep.subr.bf16.mxu1 %v8064_v39 }
0x3aa7   :  { %8067 = vmatpush3.bf16.msra.mxu1 %v8064_v39 }
0x3aa8   :  { %8080 = vmatprep.subr.bf16.mxu1 %v8741_v23 }
0x3aa9   :  { %v3434_v6 = vld [vmem:[#allocation2 + $0x28] sm:$0xff] }
0x3aaa   :  { %7516 = vmatmul.mubr.msk.f32.vlgmr.msra.gmra.mrb[52].mxu1 %vm520_vm3, %v3430_v62 }
0x3aab   :  { %7518 = vmatprep.mubr.msk.f32.mxu1 %vm520_vm3, %v3431_v1 }
0x3aae   :  { %7519 = vmatmul.mubr.msk.f32.gmra.mrb[54].mxu1 %vm520_vm3, %v3432_v49 }
0x3aaf   :  { %7521 = vmatprep.mubr.msk.f32.mxu1 %vm520_vm3, %v3433_v3 }
0x3ab2   :  { %7522 = vmatmul.mubr.msk.f32.gmra.mrb[56].mxu1 %vm520_vm3, %v3434_v6 }
0x3b75   :  { %v3291_v4 = vpop.f32.mrb[50].mxu1 }
0x3b76   :  { %v3295_v15 = vadd.f32 %v3291_v4, %v2599_v7  ;;  %v7495_v10 = vpop.f32.mrb[51].mxu1 }
0x3b77   :  { %v3681_v10 = vld [vmem:[%s10309_s29 + $0x8] sm:$0xff] }
0x3b78   :  { %v6649_v56 = vmul.f32 -1.442695, %v3295_v15 }
0x3b7a   :  { %8440 = vpow2.f32 %v6649_v56 }
0x3b7b   :  { %8442 = vtanh.f32 %v3295_v15  ;;  %v3680_v15 = vld [vmem:[%s10309_s29] sm:$0xff] }
0x3b7c   :  { %v8087_v56 = vpack.c.bf16 %v3681_v10, %v3680_v15 }
0x3b7d   :  { %v9622_v45 = vpop.f32.mrb[52].mxu1 }
0x3b7e   :  { %v3545_v12 = vpop.f32.mrb[53].mxu1 }
0x3b7f   :  { %v3546_v40 = vadd.f32 %v9678_v38, %v3545_v12  ;;  %v3682_v12 = vld [vmem:[%s10309_s29 + $0x10] sm:$0xff] }
0x3b81   :  { %v9624_v16 = vpop.f32.mrb[54].mxu1 }
0x3b82   :  { %v9626_v17 = vpop.f32.mrb[55].mxu1 }
0x3b84   :  { %v8441_v18 = vpop.eup %8440 }
0x3b85   :  { %v3300_v0 = vadd.f32 1.0, %v8441_v18  ;;  %v9628_v19 = vpop.f32.mrb[56].mxu1  ;;  %v8443_v27 = vpop.eup %8442  ;;  %v3683_v18 = vld [vmem:[%s10309_s29 + $0x18] sm:$0xff] }
0x3b86   :  { %v9630_v20 = vpop.f32.mrb[57].mxu1 }
0x3b87   :  { %8444 = vrcp.f32 %v3300_v0 }
0x3b91   :  { %v8445_v36 = vpop.eup %8444 }
0x3b92   :  { %v3303_v2 = vsel %vm9146_vm6, %v8443_v27, %v8445_v36  ;;  %v8090_v27 = vpack.c.bf16 %v3683_v18, %v3682_v12 }
0x3b93   :  { %3306 = vrot.lane.b32.xlu0 %v3303_v2, %s8744_s15  ;;  %v3304_v43 = vmul.f32 %v3303_v2, %v3211_v42 }
0x3c05   :  { %v3307_v24 = vpop.permute.xlu0 %3306 }
0x3c06   :  { %v3309_v60 = vmul.f32 %v3307_v24, %v3303_v2 }
0x3c08   :  { %3311 = vrot.lane.b32.xlu1 %v3309_v60, %s8745_s19 }
0x3c7a   :  { %v3312_v28 = vpop.permute.xlu1 %3311 }
0x3c7b   :  { %v9636_v47 = vadd.f32 %v3312_v28, %v3304_v43 }
0x3c7d   :  { %8446 = vtanh.f32 %v9636_v47 }
0x3c87   :  { %v8447_v9 = vpop.eup %8446 }
0x3c88   :  { %3317 = vrot.lane.b32.xlu0 %v8447_v9, %s8744_s15 }
0x3cfa   :  { %v3318_v29 = vpop.permute.xlu0 %3317 }
0x3cfb   :  { %v3320_v11 = vmul.f32 %v3318_v29, %v3303_v2 }
0x3cfd   :  { %3322 = vrot.lane.b32.xlu1 %v3320_v11, %s8745_s19 }
0x3d6f   :  { %v3323_v33 = vpop.permute.xlu1 %3322 }
0x3d70   :  { %3325 = vst.msk [vmem:[#allocation2 + $0x30] sm:$0xff] %vm520_vm3, %v3323_v33  ;;  %7505 = vmatmul.mubr.msk.f32.vlgmr.msra.gmra.mrb[34].mxu0 %vm520_vm3, %v3323_v33 }
0x3d71   :  { %8070 = vmatpush3.bf16.msra.mxu0 %v9647_v32  ;;  %7535 = vmatprep.mubr.msk.f32.mxu0 %vm8742_vm2, %v8743_v61 }
0x3d72   :  { %8071 = vmatprep.subr.bf16.mxu0 %v8741_v23 }
0x3d75   :  { %8073 = vmatpush3.bf16.msra.mxu0 %v9658_v34 }
0x3d76   :  { %8074 = vmatprep.subr.bf16.mxu0 %v8741_v23 }
0x3d77   :  { %v3435_v21 = vld [vmem:[#allocation2 + $0x30] sm:$0xff] }
0x3d78   :  { %7536 = vmatmul.mubr.f32.vlgmr.msra.gmra.mrb[36].mxu0 %v8743_v61  ;;  %7524 = vmatprep.mubr.msk.f32.mxu1 %vm520_vm3, %v3435_v21 }
0x3d79   :  { %8076 = vmatpush3.bf16.msra.mxu0 %v9647_v32  ;;  %7546 = vmatprep.mubr.msk.f32.mxu0 %vm8742_vm2, %v8743_v61 }
0x3d7a   :  { %8077 = vmatprep.subr.bf16.mxu0 %v8741_v23 }
0x3d7d   :  { %8079 = vmatpush3.bf16.msra.mxu0 %v9658_v34 }
0x3d7e   :  { %8086 = vmatprep.subr.bf16.mxu0 %v8741_v23 }
0x3e43   :  { %v3394_v35 = vpop.f32.mrb[34].mxu0 }
0x3e44   :  { %v3398_v37 = vadd.f32 %v3394_v35, %v2604_v14  ;;  %v7506_v22 = vpop.f32.mrb[35].mxu0 }
0x3e46   :  { %v6651_v52 = vmul.f32 -1.442695, %v3398_v37 }
0x3e4b   :  { %v3650_v25 = vpop.f32.mrb[36].mxu0 }
0x3e4c   :  { %v3654_v41 = vadd.f32 %v3650_v25, %v3546_v40  ;;  %v7537_v8 = vpop.f32.mrb[37].mxu0 }
0x3e4e   :  { %v6670_v5 = vmul.f32 -1.442695, %v3654_v41 }
0x3e50   :  { %8448 = vpow2.f32 %v6670_v5 }
0x3e51   :  { %8450 = vtanh.f32 %v3654_v41 }
0x3e5a   :  { %v8449_v42 = vpop.eup %8448 }
0x3e5b   :  { %v3659_v44 = vadd.f32 1.0, %v8449_v42  ;;  %v8451_v30 = vpop.eup %8450 }
0x3e5d   :  { %8452 = vrcp.f32 %v3659_v44  ;;  %v3785_v44 = vld [vmem:[%s10309_s29 + $0x20] sm:$0xff] }
0x3e5e   :  { %8454 = vpow2.f32 %v6651_v52 }
0x3e67   :  { %v8453_v26 = vpop.eup %8452 }
0x3e68   :  { %v3662_v46 = vsel %vm9146_vm6, %v8451_v30, %v8453_v26  ;;  %v8455_v53 = vpop.eup %8454  ;;  %v3786_v30 = vld [vmem:[%s10309_s29 + $0x28] sm:$0xff]  ;;  %v3787_v26 = vld [vmem:[%s10309_s29 + $0x30] sm:$0xff] }
0x3e69   :  { %3665 = vrot.lane.b32.xlu0 %v3662_v46, %s8744_s15  ;;  %v3663_v54 = vmul.f32 0.0, %v3662_v46  ;;  %v3403_v55 = vadd.f32 1.0, %v8455_v53 }
0x3edb   :  { %v3666_v48 = vpop.permute.xlu0 %3665 }
0x3edc   :  { %v3668_v51 = vmul.f32 %v3666_v48, %v3662_v46  ;;  %v3788_v48 = vld [vmem:[%s10309_s29 + $0x38] sm:$0xff] }
0x3ede   :  { %3670 = vrot.lane.b32.xlu1 %v3668_v51, %s8745_s19  ;;  %v8084_v51 = vpack.c.bf16 %v3788_v48, %v3787_v26  ;;  %v4206_v26 = vld [vmem:[%s10309_s29 + $0x60] sm:$0xff]  ;;  %v4208_v48 = vld [vmem:[%s10309_s29 + $0x70] sm:$0xff] }
0x3f50   :  { %v3671_v39 = vpop.permute.xlu1 %3670 }
0x3f51   :  { %v9685_v59 = vadd.f32 %v3671_v39, %v3663_v54 }
0x3f53   :  { %8456 = vtanh.f32 %v9685_v59 }
0x3f54   :  { %8458 = vrcp.f32 %v3403_v55 }
0x3f55   :  { %8460 = vtanh.f32 %v3398_v37 }
0x3f5d   :  { %v8457_v57 = vpop.eup %8456 }
0x3f5e   :  { %v8459_v62 = vpop.eup %8458  ;;  %3676 = vrot.lane.b32.xlu0 %v8457_v57, %s8744_s15 }
0x3f5f   :  { %v8461_v1 = vpop.eup %8460 }
0x3f60   :  { %v3406_v49 = vsel %vm9146_vm6, %v8461_v1, %v8459_v62  ;;  %v3556_v62 = vadd.f32 %v9678_v38, %v9626_v17 }
0x3f61   :  { %v3407_v36 = vmul.f32 %v3406_v49, %v9636_v47  ;;  %v3551_v47 = vadd.f32 %v9622_v45, %v9678_v38 }
0x3f62   :  { %3409 = vrot.lane.b32.xlu0 %v3406_v49, %s8744_s15 }
0x3fd0   :  { %v3677_v3 = vpop.permute.xlu0 %3676 }
0x3fd1   :  { %v3679_v6 = vmul.f32 %v3677_v3, %v3662_v46  ;;  %v8081_v46 = vpack.c.bf16 %v3786_v30, %v3785_v44 }
0x3fd3   :  { %3685 = vrot.lane.b32.xlu1 %v3679_v6, %s8745_s19  ;;  %8082 = vmatpush3.bf16.msra.mxu1 %v8081_v46  ;;  %v4207_v46 = vld [vmem:[%s10309_s29 + $0x68] sm:$0xff] }
0x3fd4   :  { %v3410_v7 = vpop.permute.xlu0 %3409  ;;  %8083 = vmatprep.subr.bf16.mxu1 %v8741_v23 }
0x3fd5   :  { %v3412_v4 = vmul.f32 %v3410_v7, %v3406_v49 }
0x3fd7   :  { %3414 = vrot.lane.b32.xlu0 %v3412_v4, %s8745_s19  ;;  %8085 = vmatpush3.bf16.msra.mxu1 %v8084_v51  ;;  %v8111_v51 = vpack.c.bf16 %v4207_v46, %v4206_v26  ;;  %v4558_v26 = vld [vmem:[%s10309_s29 + $0xa0] sm:$0xff]  ;;  %v4559_v46 = vld [vmem:[%s10309_s29 + $0xa8] sm:$0xff] }
0x3fd8   :  { %8092 = vmatprep.subr.bf16.mxu1 %v8741_v23 }
0x4045   :  { %v3686_v0 = vpop.permute.xlu1 %3685 }
0x4046   :  { %7547 = vmatmul.mubr.msk.f32.vlgmr.msra.gmra.mrb[38].mxu0 %vm520_vm3, %v3686_v0 }
0x4047   :  { %8088 = vmatpush3.bf16.msra.mxu0 %v8087_v56  ;;  %7568 = vmatprep.mubr.msk.f32.mxu0 %vm8742_vm2, %v8743_v61 }
0x4048   :  { %8089 = vmatprep.subr.bf16.mxu0 %v8741_v23 }
0x4049   :  { %v3415_v2 = vpop.permute.xlu0 %3414 }
0x404a   :  { %v3417_v24 = vadd.f32 %v3415_v2, %v3407_v36  ;;  %v4030_v36 = vld [vmem:[%s10309_s29 + $0x40] sm:$0xff]  ;;  %v4031_v2 = vld [vmem:[%s10309_s29 + $0x48] sm:$0xff] }
0x404b   :  { %8091 = vmatpush3.bf16.msra.mxu0 %v8090_v27 }
0x404c   :  { %8462 = vtanh.f32 %v3417_v24  ;;  %8098 = vmatprep.subr.bf16.mxu0 %v8741_v23  ;;  %v4032_v24 = vld [vmem:[%s10309_s29 + $0x50] sm:$0xff] }
0x404e   :  { %7569 = vmatmul.mubr.msk.f32.vlgmr.msra.gmra.mrb[40].mxu0 %vm520_vm3, %v3686_v0 }
0x404f   :  { %7590 = vmatprep.mubr.msk.f32.mxu0 %vm8742_vm2, %v8743_v61 }
0x4056   :  { %v8463_v60 = vpop.eup %8462 }
0x4057   :  { %3420 = vrot.lane.b32.xlu0 %v8463_v60, %s8744_s15  ;;  %v8099_v60 = vpack.c.bf16 %v4031_v2, %v4030_v36  ;;  %v4382_v2 = vld [vmem:[%s10309_s29 + $0x80] sm:$0xff] }
0x4059   :  { %8100 = vmatpush3.bf16.msra.mxu0 %v8099_v60  ;;  %v4384_v60 = vld [vmem:[%s10309_s29 + $0x90] sm:$0xff] }
0x405a   :  { %8101 = vmatprep.subr.bf16.mxu0 %v8741_v23 }
0x40c9   :  { %v3421_v43 = vpop.permute.xlu0 %3420 }
0x40ca   :  { %v3423_v28 = vmul.f32 %v3421_v43, %v3406_v49  ;;  %v4033_v43 = vld [vmem:[%s10309_s29 + $0x58] sm:$0xff] }
0x40cc   :  { %3425 = vrot.lane.b32.xlu0 %v3423_v28, %s8745_s19  ;;  %v8102_v28 = vpack.c.bf16 %v4033_v43, %v4032_v24  ;;  %v4383_v24 = vld [vmem:[%s10309_s29 + $0x88] sm:$0xff] }
0x40cd   :  { %v8123_v43 = vpack.c.bf16 %v4383_v24, %v4382_v2  ;;  %v4737_v24 = vld [vmem:[%s10309_s29 + $0xd8] sm:$0xff] }
0x40ce   :  { %8103 = vmatpush3.bf16.msra.mxu0 %v8102_v28  ;;  %v4385_v28 = vld [vmem:[%s10309_s29 + $0x98] sm:$0xff] }
0x40cf   :  { %8110 = vmatprep.subr.bf16.mxu0 %v8741_v23 }
0x4119   :  { %v3755_v9 = vpop.f32.mrb[38].mxu0 }
0x411a   :  { %v3759_v29 = vadd.f32 %v3755_v9, %v3551_v47  ;;  %v7548_v11 = vpop.f32.mrb[39].mxu0 }
0x411c   :  { %v6672_v31 = vmul.f32 -1.442695, %v3759_v29 }
0x411e   :  { %8464 = vpow2.f32 %v6672_v31  ;;  %v3561_v31 = vadd.f32 %v9624_v16, %v9678_v38 }
0x411f   :  { %8466 = vtanh.f32 %v3759_v29 }
0x4121   :  { %v3930_v13 = vpop.f32.mrb[40].mxu0 }
0x4122   :  { %v7570_v63 = vpop.f32.mrb[41].mxu0 }
0x4128   :  { %v8465_v58 = vpop.eup %8464 }
0x4129   :  { %v3764_v33 = vadd.f32 1.0, %v8465_v58  ;;  %v8467_v21 = vpop.eup %8466 }
0x412b   :  { %8468 = vrcp.f32 %v3764_v33 }
0x4135   :  { %v8469_v14 = vpop.eup %8468 }
0x4136   :  { %v3767_v35 = vsel %vm9146_vm6, %v8467_v21, %v8469_v14 }
0x4137   :  { %3770 = vrot.lane.b32.xlu1 %v3767_v35, %s8744_s15  ;;  %v3768_v8 = vmul.f32 %v3767_v35, %v9685_v59 }
0x413e   :  { %v3426_v37 = vpop.permute.xlu0 %3425 }
0x413f   :  { %3428 = vst.msk [vmem:[#allocation2 + $0x38] sm:$0xff] %vm520_vm3, %v3426_v37 }
0x4146   :  { %v3436_v45 = vld [vmem:[#allocation2 + $0x38] sm:$0xff] }
0x4147   :  { %7525 = vmatmul.mubr.msk.f32.gmra.mrb[58].mxu1 %vm520_vm3, %v3436_v45 }
0x4148   :  { %7557 = vmatprep.mubr.msk.f32.mxu1 %vm8742_vm2, %v8743_v61 }
0x41a9   :  { %v3771_v22 = vpop.permute.xlu1 %3770 }
0x41aa   :  { %v3773_v40 = vmul.f32 %v3771_v22, %v3767_v35 }
0x41ac   :  { %3775 = vrot.lane.b32.xlu1 %v3773_v40, %s8745_s19 }
0x421a   :  { %v9727_v25 = vpop.f32.mrb[58].mxu1 }
0x421b   :  { %v9729_v41 = vpop.f32.mrb[59].mxu1 }
0x421e   :  { %v3776_v5 = vpop.permute.xlu1 %3775 }
0x421f   :  { %v3778_v42 = vadd.f32 %v3776_v5, %v3768_v8 }
0x4221   :  { %8470 = vtanh.f32 %v3778_v42 }
0x422b   :  { %v8471_v52 = vpop.eup %8470 }
0x422c   :  { %3781 = vrot.lane.b32.xlu1 %v8471_v52, %s8744_s15  ;;  %v4209_v52 = vld [vmem:[%s10309_s29 + $0x78] sm:$0xff] }
0x429e   :  { %v3782_v53 = vpop.permute.xlu1 %3781 }
0x429f   :  { %v3784_v54 = vmul.f32 %v3782_v53, %v3767_v35  ;;  %v8114_v53 = vpack.c.bf16 %v4209_v52, %v4208_v48  ;;  %v4560_v48 = vld [vmem:[%s10309_s29 + $0xb0] sm:$0xff]  ;;  %v4561_v52 = vld [vmem:[%s10309_s29 + $0xb8] sm:$0xff] }
0x42a1   :  { %3790 = vrot.lane.b32.xlu1 %v3784_v54, %s8745_s19 }
0x4313   :  { %v3791_v55 = vpop.permute.xlu1 %3790 }
0x4314   :  { %7558 = vmatmul.mubr.msk.f32.vlgmr.msra.gmra.mrb[60].mxu1 %vm520_vm3, %v3791_v55 }
0x4315   :  { %8094 = vmatpush3.bf16.msra.mxu1 %v9647_v32  ;;  %7579 = vmatprep.mubr.msk.f32.mxu1 %vm8742_vm2, %v8743_v61 }
0x4316   :  { %8095 = vmatprep.subr.bf16.mxu1 %v8741_v23 }
0x4319   :  { %8097 = vmatpush3.bf16.msra.mxu1 %v9658_v34 }
0x431a   :  { %8104 = vmatprep.subr.bf16.mxu1 %v8741_v23 }
0x431c   :  { %7580 = vmatmul.mubr.msk.f32.vlgmr.msra.gmra.mrb[62].mxu1 %vm520_vm3, %v3791_v55 }
0x431d   :  { %8106 = vmatpush3.bf16.msra.mxu1 %v9647_v32  ;;  %7601 = vmatprep.mubr.msk.f32.mxu1 %vm8742_vm2, %v8743_v61 }
0x431e   :  { %8107 = vmatprep.subr.bf16.mxu1 %v8741_v23 }
0x4321   :  { %8109 = vmatpush3.bf16.msra.mxu1 %v9658_v34 }
0x4322   :  { %8116 = vmatprep.subr.bf16.mxu1 %v8741_v23 }
0x43e7   :  { %v3860_v39 = vpop.f32.mrb[60].mxu1 }
0x43e8   :  { %v3931_v59 = vadd.f32 %v3930_v13, %v3860_v39  ;;  %v7559_v57 = vpop.f32.mrb[61].mxu1 }
0x43e9   :  { %v3566_v57 = vadd.f32 %v9678_v38, %v9630_v20 }
0x43ef   :  { %v4000_v1 = vpop.f32.mrb[62].mxu1 }
0x43f0   :  { %v4004_v49 = vadd.f32 %v4000_v1, %v3556_v62  ;;  %v7581_v3 = vpop.f32.mrb[63].mxu1 }
0x43f2   :  { %v6676_v6 = vmul.f32 -1.442695, %v4004_v49 }
0x43f4   :  { %8472 = vpow2.f32 %v6676_v6 }
0x43f5   :  { %8474 = vtanh.f32 %v4004_v49 }
0x43fe   :  { %v8473_v7 = vpop.eup %8472 }
0x43ff   :  { %v4009_v4 = vadd.f32 1.0, %v8473_v7  ;;  %v8475_v15 = vpop.eup %8474 }
0x4401   :  { %8476 = vrcp.f32 %v4009_v4 }
0x440b   :  { %v8477_v10 = vpop.eup %8476 }
0x440c   :  { %v4012_v56 = vsel %vm9146_vm6, %v8475_v15, %v8477_v10 }
0x440d   :  { %4015 = vrot.lane.b32.xlu0 %v4012_v56, %s8744_s15  ;;  %v4013_v17 = vmul.f32 %v4012_v56, %v3778_v42 }
0x447f   :  { %v4016_v12 = vpop.permute.xlu0 %4015 }
0x4480   :  { %v4018_v18 = vmul.f32 %v4016_v12, %v4012_v56 }
0x4482   :  { %4020 = vrot.lane.b32.xlu1 %v4018_v18, %s8745_s19 }
0x44f4   :  { %v4021_v0 = vpop.permute.xlu1 %4020 }
0x44f5   :  { %v4023_v27 = vadd.f32 %v4021_v0, %v4013_v17 }
0x44f7   :  { %8478 = vtanh.f32 %v4023_v27 }
0x4501   :  { %v8479_v47 = vpop.eup %8478 }
0x4502   :  { %4026 = vrot.lane.b32.xlu0 %v8479_v47, %s8744_s15  ;;  %v8126_v47 = vpack.c.bf16 %v4385_v28, %v4384_v60 }
0x4574   :  { %v4027_v9 = vpop.permute.xlu0 %4026 }
0x4575   :  { %v4029_v29 = vmul.f32 %v4027_v9, %v4012_v56 }
0x4577   :  { %4035 = vrot.lane.b32.xlu1 %v4029_v29, %s8745_s19 }
0x45e9   :  { %v4036_v11 = vpop.permute.xlu1 %4035 }
0x45ea   :  { %7591 = vmatmul.mubr.msk.f32.vlgmr.msra.gmra.mrb[42].mxu0 %vm520_vm3, %v4036_v11  ;;  %7602 = vmatmul.mubr.msk.f32.vlgmr.msra.gmra.mrb[64].mxu1 %vm520_vm3, %v4036_v11 }
0x45eb   :  { %8118 = vmatpush3.bf16.msra.mxu1 %v9647_v32  ;;  %7612 = vmatprep.mubr.msk.f32.mxu0 %vm8742_vm2, %v8743_v61 }
0x45ec   :  { %8119 = vmatprep.subr.bf16.mxu1 %v8741_v23  ;;  %7623 = vmatprep.mubr.msk.f32.mxu1 %vm8742_vm2, %v8743_v61 }
0x45ed   :  { %8112 = vmatpush3.bf16.msra.mxu0 %v8111_v51  ;;  %v8135_v51 = vpack.c.bf16 %v4559_v46, %v4558_v26 }
0x45ee   :  { %8113 = vmatprep.subr.bf16.mxu0 %v8741_v23 }
0x45ef   :  { %8121 = vmatpush3.bf16.msra.mxu1 %v9658_v34 }
0x45f0   :  { %8128 = vmatprep.subr.bf16.mxu1 %v8741_v23 }
0x45f1   :  { %8115 = vmatpush3.bf16.msra.mxu0 %v8114_v53  ;;  %v8138_v53 = vpack.c.bf16 %v4561_v52, %v4560_v48  ;;  %v4999_v52 = vld [vmem:[%s10264_s13] sm:$0xff] }
0x45f2   :  { %8122 = vmatprep.subr.bf16.mxu0 %v8741_v23 }
0x46bd   :  { %v4105_v13 = vpop.f32.mrb[42].mxu0  ;;  %v4176_v63 = vpop.f32.mrb[64].mxu1 }
0x46be   :  { %v4109_v58 = vadd.f32 %v4105_v13, %v3931_v59  ;;  %v4180_v33 = vadd.f32 %v4176_v63, %v3561_v31  ;;  %v7592_v21 = vpop.f32.mrb[43].mxu0  ;;  %v7603_v14 = vpop.f32.mrb[65].mxu1  ;;  %v3571_v13 = vadd.f32 %v9628_v19, %v9678_v38 }
0x46c0   :  { %v6679_v35 = vmul.f32 -1.442695, %v4180_v33 }
0x46c2   :  { %8480 = vpow2.f32 %v6679_v35 }
0x46c3   :  { %8482 = vtanh.f32 %v4180_v33 }
0x46cc   :  { %v8481_v37 = vpop.eup %8480 }
0x46cd   :  { %v4185_v45 = vadd.f32 1.0, %v8481_v37  ;;  %v8483_v22 = vpop.eup %8482 }
0x46cf   :  { %8484 = vrcp.f32 %v4185_v45 }
0x46d9   :  { %v8485_v40 = vpop.eup %8484 }
0x46da   :  { %v4188_v8 = vsel %vm9146_vm6, %v8483_v22, %v8485_v40 }
0x46db   :  { %4191 = vrot.lane.b32.xlu0 %v4188_v8, %s8744_s15  ;;  %v4189_v42 = vmul.f32 %v4188_v8, %v4023_v27 }
0x474d   :  { %v4192_v16 = vpop.permute.xlu0 %4191 }
0x474e   :  { %v4194_v5 = vmul.f32 %v4192_v16, %v4188_v8 }
0x4750   :  { %4196 = vrot.lane.b32.xlu1 %v4194_v5, %s8745_s19 }
0x47c2   :  { %v4197_v44 = vpop.permute.xlu1 %4196 }
0x47c3   :  { %v4199_v30 = vadd.f32 %v4197_v44, %v4189_v42 }
0x47c5   :  { %8486 = vtanh.f32 %v4199_v30 }
0x47cf   :  { %v8487_v54 = vpop.eup %8486 }
0x47d0   :  { %4202 = vrot.lane.b32.xlu0 %v8487_v54, %s8744_s15 }
0x4842   :  { %v4203_v55 = vpop.permute.xlu0 %4202 }
0x4843   :  { %v4205_v39 = vmul.f32 %v4203_v55, %v4188_v8 }
0x4845   :  { %4211 = vrot.lane.b32.xlu1 %v4205_v39, %s8745_s19 }
0x48b7   :  { %v4212_v59 = vpop.permute.xlu1 %4211 }
0x48b8   :  { %7613 = vmatmul.mubr.msk.f32.vlgmr.msra.gmra.mrb[44].mxu0 %vm520_vm3, %v4212_v59  ;;  %7624 = vmatmul.mubr.msk.f32.vlgmr.msra.gmra.mrb[66].mxu1 %vm520_vm3, %v4212_v59 }
0x48b9   :  { %8130 = vmatpush3.bf16.msra.mxu1 %v9647_v32  ;;  %7634 = vmatprep.mubr.msk.f32.mxu0 %vm8742_vm2, %v8743_v61 }
0x48ba   :  { %8131 = vmatprep.subr.bf16.mxu1 %v8741_v23  ;;  %7645 = vmatprep.mubr.msk.f32.mxu1 %vm8742_vm2, %v8743_v61 }
0x48bb   :  { %8124 = vmatpush3.bf16.msra.mxu0 %v8123_v43 }
0x48bc   :  { %8125 = vmatprep.subr.bf16.mxu0 %v8741_v23 }
0x48bd   :  { %8133 = vmatpush3.bf16.msra.mxu1 %v9658_v34 }
0x48be   :  { %8140 = vmatprep.subr.bf16.mxu1 %v8741_v23 }
0x48bf   :  { %8127 = vmatpush3.bf16.msra.mxu0 %v8126_v47 }
0x48c0   :  { %8134 = vmatprep.subr.bf16.mxu0 %v8741_v23 }
0x498b   :  { %v4281_v62 = vpop.f32.mrb[44].mxu0  ;;  %v4352_v1 = vpop.f32.mrb[66].mxu1 }
0x498c   :  { %v4285_v49 = vadd.f32 %v4281_v62, %v4109_v58  ;;  %v4356_v3 = vadd.f32 %v4352_v1, %v3566_v57  ;;  %v7614_v6 = vpop.f32.mrb[45].mxu0  ;;  %v7625_v7 = vpop.f32.mrb[67].mxu1  ;;  %v3576_v57 = vadd.f32 %v9678_v38, %v9729_v41 }
0x498e   :  { %v6682_v4 = vmul.f32 -1.442695, %v4356_v3 }
0x4990   :  { %8488 = vpow2.f32 %v6682_v4 }
0x4991   :  { %8490 = vtanh.f32 %v4356_v3 }
0x499a   :  { %v8489_v15 = vpop.eup %8488 }
0x499b   :  { %v4361_v10 = vadd.f32 1.0, %v8489_v15  ;;  %v8491_v56 = vpop.eup %8490 }
0x499d   :  { %8492 = vrcp.f32 %v4361_v10 }
0x49a7   :  { %v8493_v12 = vpop.eup %8492 }
0x49a8   :  { %v4364_v18 = vsel %vm9146_vm6, %v8491_v56, %v8493_v12 }
0x49a9   :  { %4367 = vrot.lane.b32.xlu0 %v4364_v18, %s8744_s15  ;;  %v4365_v0 = vmul.f32 %v4364_v18, %v4199_v30 }
0x4a1b   :  { %v4368_v20 = vpop.permute.xlu0 %4367 }
0x4a1c   :  { %v4370_v17 = vmul.f32 %v4368_v20, %v4364_v18 }
0x4a1e   :  { %4372 = vrot.lane.b32.xlu1 %v4370_v17, %s8745_s19 }
0x4a90   :  { %v4373_v27 = vpop.permute.xlu1 %4372 }
0x4a91   :  { %v4375_v36 = vadd.f32 %v4373_v27, %v4365_v0  ;;  %v4734_v0 = vld [vmem:[%s10309_s29 + $0xc0] sm:$0xff]  ;;  %v4735_v27 = vld [vmem:[%s10309_s29 + $0xc8] sm:$0xff] }
0x4a92   :  { %v8147_v2 = vpack.c.bf16 %v4735_v27, %v4734_v0  ;;  %v5173_v0 = vld [vmem:[%s10310_s7] sm:$0xff] }
0x4a93   :  { %8494 = vtanh.f32 %v4375_v36  ;;  %v5169_v27 = vld [vmem:[%s10268_s17] sm:$0xff] }
0x4a9d   :  { %v8495_v9 = vpop.eup %8494 }
0x4a9e   :  { %4378 = vrot.lane.b32.xlu0 %v8495_v9, %s8744_s15 }
0x4b10   :  { %v4379_v29 = vpop.permute.xlu0 %4378 }
0x4b11   :  { %v4381_v11 = vmul.f32 %v4379_v29, %v4364_v18  ;;  %v3581_v29 = vadd.f32 %v9727_v25, %v9678_v38 }
0x4b13   :  { %4387 = vrot.lane.b32.xlu1 %v4381_v11, %s8745_s19 }
0x4b85   :  { %v4388_v31 = vpop.permute.xlu1 %4387 }
0x4b86   :  { %7635 = vmatmul.mubr.msk.f32.vlgmr.msra.gmra.mrb[46].mxu0 %vm520_vm3, %v4388_v31  ;;  %7646 = vmatmul.mubr.msk.f32.vlgmr.msra.gmra.mrb[68].mxu1 %vm520_vm3, %v4388_v31 }
0x4b87   :  { %8142 = vmatpush3.bf16.msra.mxu1 %v9647_v32  ;;  %7656 = vmatprep.mubr.msk.f32.mxu0 %vm8742_vm2, %v8743_v61 }
0x4b88   :  { %8143 = vmatprep.subr.bf16.mxu1 %v8741_v23  ;;  %7667 = vmatprep.mubr.msk.f32.mxu1 %vm8742_vm2, %v8743_v61 }
0x4b89   :  { %8136 = vmatpush3.bf16.msra.mxu0 %v8135_v51 }
0x4b8a   :  { %8137 = vmatprep.subr.bf16.mxu0 %v8741_v23 }
0x4b8b   :  { %8145 = vmatpush3.bf16.msra.mxu1 %v9658_v34 }
0x4b8c   :  { %8152 = vmatprep.subr.bf16.mxu1 %v8741_v23 }
0x4b8d   :  { %8139 = vmatpush3.bf16.msra.mxu0 %v8138_v53  ;;  %v5000_v53 = vld [vmem:[%s10264_s13 + $0x8] sm:$0xff] }
0x4b8e   :  { %8146 = vmatprep.subr.bf16.mxu0 %v8741_v23 }
0x4c59   :  { %v4457_v63 = vpop.f32.mrb[46].mxu0  ;;  %v4528_v58 = vpop.f32.mrb[68].mxu1 }
0x4c5a   :  { %v4461_v33 = vadd.f32 %v4457_v63, %v4285_v49  ;;  %v4532_v21 = vadd.f32 %v4528_v58, %v3571_v13  ;;  %v7636_v14 = vpop.f32.mrb[47].mxu0  ;;  %v7647_v35 = vpop.f32.mrb[69].mxu1 }
0x4c5c   :  { %v6685_v37 = vmul.f32 -1.442695, %v4532_v21 }
0x4c5e   :  { %8496 = vpow2.f32 %v6685_v37 }
0x4c5f   :  { %8498 = vtanh.f32 %v4532_v21 }
0x4c68   :  { %v8497_v45 = vpop.eup %8496 }
0x4c69   :  { %v4537_v22 = vadd.f32 1.0, %v8497_v45  ;;  %v8499_v40 = vpop.eup %8498 }
0x4c6b   :  { %8500 = vrcp.f32 %v4537_v22 }
0x4c75   :  { %v8501_v8 = vpop.eup %8500 }
0x4c76   :  { %v4540_v16 = vsel %vm9146_vm6, %v8499_v40, %v8501_v8 }
0x4c77   :  { %4543 = vrot.lane.b32.xlu0 %v4540_v16, %s8744_s15  ;;  %v4541_v42 = vmul.f32 %v4540_v16, %v4375_v36  ;;  %v4736_v36 = vld [vmem:[%s10309_s29 + $0xd0] sm:$0xff] }
0x4c78   :  { %v8150_v60 = vpack.c.bf16 %v4737_v24, %v4736_v36  ;;  %v5170_v36 = vld [vmem:[%s10268_s17 + $0x8] sm:$0xff]  ;;  %v5171_v24 = vld [vmem:[%s10268_s17 + $0x10] sm:$0xff] }
0x4ce9   :  { %v4544_v19 = vpop.permute.xlu0 %4543 }
0x4cea   :  { %v4546_v5 = vmul.f32 %v4544_v19, %v4540_v16  ;;  %v4910_v19 = vld [vmem:[%s10309_s29 + $0xe0] sm:$0xff] }
0x4cec   :  { %4548 = vrot.lane.b32.xlu1 %v4546_v5, %s8745_s19  ;;  %v4911_v5 = vld [vmem:[%s10309_s29 + $0xe8] sm:$0xff] }
0x4d5e   :  { %v4549_v44 = vpop.permute.xlu1 %4548 }
0x4d5f   :  { %v4551_v30 = vadd.f32 %v4549_v44, %v4541_v42  ;;  %v8159_v42 = vpack.c.bf16 %v4911_v5, %v4910_v19  ;;  %v4913_v44 = vld [vmem:[%s10309_s29 + $0xf8] sm:$0xff] }
0x4d61   :  { %8502 = vtanh.f32 %v4551_v30 }
0x4d6b   :  { %v8503_v54 = vpop.eup %8502 }
0x4d6c   :  { %4554 = vrot.lane.b32.xlu0 %v8503_v54, %s8744_s15  ;;  %v8165_v54 = vpack.c.bf16 %v5000_v53, %v4999_v52  ;;  %v6708_v53 = vld [vmem:[%s10273_s22 + $0x30] sm:$0xff] }
0x4dde   :  { %v4555_v55 = vpop.permute.xlu0 %4554 }
0x4ddf   :  { %v4557_v39 = vmul.f32 %v4555_v55, %v4540_v16  ;;  %v5001_v55 = vld [vmem:[%s10264_s13 + $0x10] sm:$0xff] }
0x4de1   :  { %4563 = vrot.lane.b32.xlu1 %v4557_v39, %s8745_s19  ;;  %v5002_v39 = vld [vmem:[%s10264_s13 + $0x18] sm:$0xff] }
0x4e53   :  { %v4564_v59 = vpop.permute.xlu1 %4563 }
0x4e54   :  { %7657 = vmatmul.mubr.msk.f32.vlgmr.msra.gmra.mrb[48].mxu0 %vm520_vm3, %v4564_v59  ;;  %7668 = vmatmul.mubr.msk.f32.vlgmr.msra.gmra.mrb[70].mxu1 %vm520_vm3, %v4564_v59  ;;  %v8168_v59 = vpack.c.bf16 %v5002_v39, %v5001_v55  ;;  %v6703_v39 = vld [vmem:[%s10274_s23] ss:$0 sm:$0xff] }
0x4e55   :  { %8154 = vmatpush3.bf16.msra.mxu1 %v9647_v32  ;;  %7678 = vmatprep.mubr.msk.f32.mxu0 %vm8742_vm2, %v8743_v61 }
0x4e56   :  { %8155 = vmatprep.subr.bf16.mxu1 %v8741_v23  ;;  %7689 = vmatprep.mubr.msk.f32.mxu1 %vm8742_vm2, %v8743_v61 }
0x4e57   :  { %8148 = vmatpush3.bf16.msra.mxu0 %v8147_v2  ;;  %v5323_v2 = vld [vmem:[#allocation13] sm:$0xff] }
0x4e58   :  { %8149 = vmatprep.subr.bf16.mxu0 %v8741_v23 }
0x4e59   :  { %8157 = vmatpush3.bf16.msra.mxu1 %v9658_v34 }
0x4e5a   :  { %8164 = vmatprep.subr.bf16.mxu1 %v8741_v23 }
0x4e5b   :  { %8151 = vmatpush3.bf16.msra.mxu0 %v8150_v60  ;;  %v8177_v60 = vpack.c.bf16 %v5170_v36, %v5169_v27  ;;  %v6724_v36 = vld [vmem:[%s10273_s22 + $0x60] sm:$0xff] }
0x4e5c   :  { %8158 = vmatprep.subr.bf16.mxu0 %v8741_v23 }
0x4f27   :  { %v4633_v62 = vpop.f32.mrb[48].mxu0  ;;  %v4704_v1 = vpop.f32.mrb[70].mxu1 }
0x4f28   :  { %v4637_v49 = vadd.f32 %v4633_v62, %v4461_v33  ;;  %v4708_v3 = vadd.f32 %v4704_v1, %v3576_v57  ;;  %v7658_v32 = vpop.f32.mrb[49].mxu0  ;;  %v7669_v6 = vpop.f32.mrb[71].mxu1  ;;  %v5084_v57 = vld [vmem:[#allocation8] sm:$0xff]  ;;  %v5085_v62 = vld [vmem:[#allocation8 + $0x8] sm:$0xff] }
0x4f29   :  { %v8171_v1 = vpack.c.bf16 %v5085_v62, %v5084_v57 }
0x4f2a   :  { %v6688_v7 = vmul.f32 -1.442695, %v4708_v3 }
0x4f2c   :  { %8504 = vpow2.f32 %v6688_v7 }
0x4f2d   :  { %8506 = vtanh.f32 %v4708_v3  ;;  %v6693_v3 = vld [vmem:[#allocation5] ss:$0 sm:$0xff] }
0x4f36   :  { %v8505_v4 = vpop.eup %8504 }
0x4f37   :  { %v4713_v15 = vadd.f32 1.0, %v8505_v4  ;;  %v8507_v10 = vpop.eup %8506 }
0x4f39   :  { %8508 = vrcp.f32 %v4713_v15  ;;  %v5086_v15 = vld [vmem:[#allocation8 + $0x10] sm:$0xff] }
0x4f43   :  { %v8509_v56 = vpop.eup %8508 }
0x4f44   :  { %v4716_v34 = vsel %vm9146_vm6, %v8507_v10, %v8509_v56  ;;  %v5087_v10 = vld [vmem:[#allocation8 + $0x18] sm:$0xff] }
0x4f45   :  { %4719 = vrot.lane.b32.xlu0 %v4716_v34, %s8744_s15  ;;  %v4717_v18 = vmul.f32 %v4716_v34, %v4551_v30  ;;  %v8162_v30 = vpack.c.bf16 %v4913_v44, %v4912_v50  ;;  %v8174_v56 = vpack.c.bf16 %v5087_v10, %v5086_v15  ;;  %v6702_v44 = vld [vmem:[#allocation16] ss:$0 sm:$0xff]  ;;  %v6717_v15 = vld [vmem:[%s10273_s22 + $0x50] sm:$0xff]  ;;  %v6718_v10 = vld [vmem:[%s10273_s22 + $0x58] sm:$0xff] }
0x4fb7   :  { %v4720_v41 = vpop.permute.xlu0 %4719 }
0x4fb8   :  { %v4722_v12 = vmul.f32 %v4720_v41, %v4716_v34 }
0x4fba   :  { %4724 = vrot.lane.b32.xlu1 %v4722_v12, %s8745_s19 }
0x502c   :  { %v4725_v20 = vpop.permute.xlu1 %4724 }
0x502d   :  { %v4727_v17 = vadd.f32 %v4725_v20, %v4717_v18 }
0x502f   :  { %8510 = vtanh.f32 %v4727_v17 }
0x5039   :  { %v8511_v43 = vpop.eup %8510 }
0x503a   :  { %4730 = vrot.lane.b32.xlu0 %v8511_v43, %s8744_s15  ;;  %v5172_v43 = vld [vmem:[%s10268_s17 + $0x18] sm:$0xff] }
0x50ac   :  { %v4731_v28 = vpop.permute.xlu0 %4730 }
0x50ad   :  { %v4733_v47 = vmul.f32 %v4731_v28, %v4716_v34  ;;  %v6694_v34 = vld [vmem:[#allocation7] ss:$0 sm:$0xff]  ;;  %v5322_v28 = vld [vmem:[%s10311_s14] sm:$0xff] }
0x50af   :  { %4739 = vrot.lane.b32.xlu1 %v4733_v47, %s8745_s19  ;;  %v8180_v47 = vpack.c.bf16 %v5172_v43, %v5171_v24  ;;  %v6727_v43 = vld [vmem:[%s10273_s22 + $0x78] sm:$0xff] }
0x5121   :  { %v4740_v9 = vpop.permute.xlu1 %4739 }
0x5122   :  { %7679 = vmatmul.mubr.msk.f32.vlgmr.msra.gmra.mrb[50].mxu0 %vm520_vm3, %v4740_v9  ;;  %7690 = vmatmul.mubr.msk.f32.vlgmr.msra.gmra.mrb[72].mxu1 %vm520_vm3, %v4740_v9  ;;  %v5399_v9 = vld [vmem:[#allocation14] sm:$0xff] }
0x5123   :  { %7700 = vmatprep.mubr.msk.f32.mxu0 %vm8742_vm2, %v8743_v61  ;;  %7711 = vmatprep.mubr.msk.f32.mxu1 %vm8742_vm2, %v8743_v61 }
0x5124   :  { %8160 = vmatpush3.bf16.msra.mxu0 %v8159_v42  ;;  %8166 = vmatpush3.bf16.msra.mxu1 %v8165_v54  ;;  %v6709_v54 = vld [vmem:[%s10273_s22 + $0x38] sm:$0xff] }
0x5125   :  { %8161 = vmatprep.subr.bf16.mxu0 %v8741_v23  ;;  %8167 = vmatprep.subr.bf16.mxu1 %v8741_v23  ;;  %v8192_v55 = vpack.c.bf16 %v6709_v54, %v6708_v53  ;;  %v6741_v54 = vld [vmem:[%s10275_s24 + $0x4] ss:$0 sm:$0xff] }
0x5128   :  { %8163 = vmatpush3.bf16.msra.mxu0 %v8162_v30  ;;  %8169 = vmatpush3.bf16.msra.mxu1 %v8168_v59 }
0x5129   :  { %8170 = vmatprep.subr.bf16.mxu0 %v8741_v23  ;;  %7741 = vmatprep.subr.mxu1 %v8743_v61 }
0x51f5   :  { %v4809_v11 = vpop.f32.mrb[50].mxu0  ;;  %v4880_v31 = vpop.f32.mrb[72].mxu1 }
0x51f6   :  { %v4813_v13 = vadd.f32 %v4809_v11, %v4637_v49  ;;  %v4884_v63 = vadd.f32 %v4880_v31, %v3581_v29  ;;  %v7680_v58 = vpop.f32.mrb[51].mxu0  ;;  %v7691_v33 = vpop.f32.mrb[73].mxu1  ;;  %v5398_v29 = vld [vmem:[%s10312_s30] sm:$0xff]  ;;  %v6696_v11 = vld [vmem:[#allocation10] ss:$0 sm:$0xff] }
0x51f8   :  { %v6691_v21 = vmul.f32 -1.442695, %v4884_v63 }
0x51fa   :  { %8512 = vpow2.f32 %v6691_v21 }
0x51fb   :  { %8514 = vtanh.f32 %v4884_v63 }
0x5204   :  { %v8513_v14 = vpop.eup %8512 }
0x5205   :  { %v4889_v35 = vadd.f32 1.0, %v8513_v14  ;;  %v8515_v37 = vpop.eup %8514 }
0x5207   :  { %8516 = vrcp.f32 %v4889_v35 }
0x5211   :  { %v8517_v45 = vpop.eup %8516 }
0x5212   :  { %v4892_v22 = vsel %vm9146_vm6, %v8515_v37, %v8517_v45  ;;  %v5483_v37 = vld [vmem:[%s10273_s22] sm:$0xff]  ;;  %v5484_v45 = vld [vmem:[%s10273_s22 + $0x8] sm:$0xff] }
0x5213   :  { %4895 = vrot.lane.b32.xlu0 %v4892_v22, %s8744_s15  ;;  %v4893_v40 = vmul.f32 %v4892_v22, %v4727_v17  ;;  %v5174_v17 = vld [vmem:[#allocation11] sm:$0xff] }
0x5285   :  { %v4896_v38 = vpop.permute.xlu0 %4895 }
0x5286   :  { %v4898_v25 = vmul.f32 %v4896_v38, %v4892_v22 }
0x5288   :  { %4900 = vrot.lane.b32.xlu1 %v4898_v25, %s8745_s19 }
0x52fa   :  { %v4901_v8 = vpop.permute.xlu1 %4900 }
0x52fb   :  { %v4903_v16 = vadd.f32 %v4901_v8, %v4893_v40  ;;  %v5485_v40 = vld [vmem:[%s10273_s22 + $0x10] sm:$0xff]  ;;  %v5486_v8 = vld [vmem:[%s10273_s22 + $0x18] sm:$0xff] }
0x52fd   :  { %8518 = vtanh.f32 %v4903_v16  ;;  %v8186_v16 = vpack.c.bf16 %v5486_v8, %v5485_v40  ;;  %v6732_v8 = vld [vmem:[%s10275_s24 + $0x3] ss:$0 sm:$0xff] }
0x5307   :  { %v8519_v26 = vpop.eup %8518 }
0x5308   :  { %4906 = vrot.lane.b32.xlu0 %v8519_v26, %s8744_s15 }
0x537a   :  { %v4907_v46 = vpop.permute.xlu0 %4906 }
0x537b   :  { %v4909_v48 = vmul.f32 %v4907_v46, %v4892_v22  ;;  %v8183_v22 = vpack.c.bf16 %v5484_v45, %v5483_v37  ;;  %v6736_v37 = vld [vmem:[%s10273_s22 + $0x98] sm:$0xff] }
0x537d   :  { %4915 = vrot.lane.b32.xlu1 %v4909_v48, %s8745_s19  ;;  %v6706_v48 = vld [vmem:[%s10273_s22 + $0x20] sm:$0xff] }
0x53ef   :  { %v4916_v51 = vpop.permute.xlu1 %4915 }
0x53f0   :  { %7701 = vmatmul.mubr.msk.f32.vlgmr.msra.gmra.mrb[52].mxu0 %vm520_vm3, %v4916_v51  ;;  %v6707_v51 = vld [vmem:[%s10273_s22 + $0x28] sm:$0xff] }
0x53f1   :  { %7722 = vmatprep.mubr.msk.f32.mxu0 %vm8742_vm2, %v8743_v61  ;;  %8172 = vmatpush3.bf16.msra.mxu0 %v8171_v1  ;;  %v8189_v52 = vpack.c.bf16 %v6707_v51, %v6706_v48  ;;  %v6705_v1 = vld [vmem:[%s10275_s24] ss:$0 sm:$0xff]  ;;  %v6738_v48 = vld [vmem:[%s10274_s23 + $0x4] ss:$0 sm:$0xff] }
0x53f2   :  { %8173 = vmatprep.subr.bf16.mxu0 %v8741_v23 }
0x53f5   :  { %8175 = vmatpush3.bf16.msra.mxu0 %v8174_v56  ;;  %v8198_v56 = vpack.c.bf16 %v6718_v10, %v6717_v15  ;;  %v6750_v10 = vld [vmem:[%s10275_s24 + $0x5] ss:$0 sm:$0xff] }
0x53f6   :  { %7725 = vmatprep.subr.mxu0 %v8743_v61 }
0x54c3   :  { %v4985_v49 = vpop.f32.mrb[52].mxu0 }
0x54c4   :  { %v4989_v32 = vadd.f32 %v4985_v49, %v4813_v13  ;;  %v7702_v6 = vpop.f32.mrb[53].mxu0 }
0x54c5   :  { %v6715_v6 = vld [vmem:[%s10273_s22 + $0x40] sm:$0xff] }
0x54c6   :  { %v4997_v7 = vadd.f32 %v6693_v3, %v4989_v32 }
0x54c8   :  { %v4998_v4 = vmax.f32 %v4997_v7, 0.0  ;;  %v6716_v7 = vld [vmem:[%s10273_s22 + $0x48] sm:$0xff] }
0x54ca   :  { %7712 = vmatmul.mubr.msk.f32.vlgmr.msra.gmra.mrb[74].mxu1 %vm520_vm3, %v4998_v4  ;;  %v8195_v4 = vpack.c.bf16 %v6716_v7, %v6715_v6  ;;  %v6747_v6 = vld [vmem:[%s10274_s23 + $0x5] ss:$0 sm:$0xff] }
0x54cb   :  { %7743 = vmatprep.mubr.msk.f32.mxu1 %vm8742_vm2, %v8743_v61  ;;  %7742 = vmatpush3.msra.mxu1 %v5323_v2  ;;  %v6725_v2 = vld [vmem:[%s10273_s22 + $0x68] sm:$0xff] }
0x54cc   :  { %7746 = vmatprep.subr.mxu1 %v8743_v61  ;;  %v8201_v24 = vpack.c.bf16 %v6725_v2, %v6724_v36  ;;  %v6756_v36 = vld [vmem:[%s10274_s23 + $0x6] ss:$0 sm:$0xff] }
0x54ce   :  { %7744 = vmatmul.mubr.msk.f32.vlgmr.msra.gmra.mrb[76].mxu1 %vm5175_vm7, %v5322_v28 }
0x54cf   :  { %7748 = vmatprep.mubr.msk.f32.mxu1 %vm8742_vm2, %v8743_v61  ;;  %7747 = vmatpush3.msra.mxu1 %v5399_v9 }
0x54d0   :  { %8188 = vmatprep.subr.bf16.mxu1 %v8741_v23 }
0x54d2   :  { %7749 = vmatmul.mubr.msk.f32.vlgmr.msra.gmra.mrb[78].mxu1 %vm5175_vm7, %v5398_v29 }
0x54d3   :  { %7770 = vmatprep.mubr.msk.f32.mxu1 %vm8742_vm2, %v8743_v61  ;;  %8190 = vmatpush3.bf16.msra.mxu1 %v8189_v52 }
0x54d4   :  { %8191 = vmatprep.subr.bf16.mxu1 %v8741_v23 }
0x54d7   :  { %8193 = vmatpush3.bf16.msra.mxu1 %v8192_v55 }
0x54d8   :  { %8200 = vmatprep.subr.bf16.mxu1 %v8741_v23 }
0x559d   :  { %v5079_v41 = vpop.f32.mrb[74].mxu1 }
0x559e   :  { %v5080_v12 = vadd.f32 %v6694_v34, %v5079_v41  ;;  %v7713_v18 = vpop.f32.mrb[75].mxu1  ;;  %v6711_v34 = vld [vmem:[%s10274_s23 + $0x1] ss:$0 sm:$0xff] }
0x55a0   :  { %v5083_v20 = vmax.f32 %v5080_v12, 0.0 }
0x55a1   :  { %v5393_v14 = vpop.f32.mrb[76].mxu1 }
0x55a2   :  { %7723 = vmatmul.mubr.msk.f32.vlgmr.msra.gmra.mrb[54].mxu0 %vm520_vm3, %v5083_v20  ;;  %v7745_v35 = vpop.f32.mrb[77].mxu1  ;;  %v6714_v20 = vld [vmem:[%s10275_s24 + $0x1] ss:$0 sm:$0xff] }
0x55a3   :  { %7727 = vmatprep.mubr.msk.f32.mxu0 %vm8742_vm2, %v8743_v61  ;;  %7726 = vmatpush3.msra.mxu0 %v5174_v17  ;;  %v6735_v35 = vld [vmem:[%s10273_s22 + $0x90] sm:$0xff] }
0x55a4   :  { %8176 = vmatprep.subr.bf16.mxu0 %v8741_v23  ;;  %v8210_v45 = vpack.c.bf16 %v6736_v37, %v6735_v35  ;;  %v6768_v37 = vld [vmem:[%s10275_s24 + $0x7] ss:$0 sm:$0xff] }
0x55a5   :  { %v5469_v38 = vpop.f32.mrb[78].mxu1 }
0x55a6   :  { %7728 = vmatmul.mubr.msk.f32.vlgmr.msra.gmra.mrb[56].mxu0 %vm5175_vm7, %v5173_v0  ;;  %v7750_v25 = vpop.f32.mrb[79].mxu1 }
0x55a7   :  { %7738 = vmatprep.mubr.msk.f32.mxu0 %vm8742_vm2, %v8743_v61  ;;  %8178 = vmatpush3.bf16.msra.mxu0 %v8177_v60  ;;  %v6726_v60 = vld [vmem:[%s10273_s22 + $0x70] sm:$0xff] }
0x55a8   :  { %8179 = vmatprep.subr.bf16.mxu0 %v8741_v23  ;;  %v8204_v28 = vpack.c.bf16 %v6727_v43, %v6726_v60  ;;  %v6759_v43 = vld [vmem:[%s10275_s24 + $0x6] ss:$0 sm:$0xff] }
0x55ab   :  { %8181 = vmatpush3.bf16.msra.mxu0 %v8180_v47  ;;  %v6720_v47 = vld [vmem:[%s10274_s23 + $0x2] ss:$0 sm:$0xff] }
0x55ac   :  { %8182 = vmatprep.subr.bf16.mxu0 %v8741_v23 }
0x5675   :  { %v5164_v31 = vpop.f32.mrb[54].mxu0 }
0x5676   :  { %v5165_v13 = vadd.f32 %v6696_v11, %v5164_v31  ;;  %v7724_v63 = vpop.f32.mrb[55].mxu0  ;;  %v6723_v31 = vld [vmem:[%s10275_s24 + $0x2] ss:$0 sm:$0xff] }
0x5678   :  { %8520 = vtanh.f32 %v5165_v13 }
0x5679   :  { %v5245_v33 = vpop.f32.mrb[56].mxu0 }
0x567a   :  { %v7729_v21 = vpop.f32.mrb[57].mxu0 }
0x567b   :  { %v6734_v21 = vld [vmem:[%s10273_s22 + $0x88] sm:$0xff] }
0x5682   :  { %v8521_v58 = vpop.eup %8520 }
0x5683   :  { %7739 = vmatmul.mubr.msk.f32.vlgmr.msra.gmra.mrb[58].mxu0 %vm520_vm3, %v8521_v58 }
0x5684   :  { %7759 = vmatprep.mubr.msk.f32.mxu0 %vm8742_vm2, %v8743_v61  ;;  %8184 = vmatpush3.bf16.msra.mxu0 %v8183_v22  ;;  %v6729_v22 = vld [vmem:[%s10274_s23 + $0x3] ss:$0 sm:$0xff] }
0x5685   :  { %8185 = vmatprep.subr.bf16.mxu0 %v8741_v23 }
0x5688   :  { %8187 = vmatpush3.bf16.msra.mxu0 %v8186_v16 }
0x5689   :  { %8194 = vmatprep.subr.bf16.mxu0 %v8741_v23 }
0x5756   :  { %v5318_v19 = vpop.f32.mrb[58].mxu0 }
0x5757   :  { %v5319_v5 = vadd.f32 %v5318_v19, %v5245_v33  ;;  %v7740_v50 = vpop.f32.mrb[59].mxu0  ;;  %v6733_v33 = vld [vmem:[%s10273_s22 + $0x80] sm:$0xff] }
0x5758   :  { %v6742_v50 = vld [vmem:[%s10273_s22 + $0xa0] sm:$0xff] }
0x5759   :  { %v5397_v42 = vadd.f32 %v5393_v14, %v5319_v5  ;;  %v8207_v14 = vpack.c.bf16 %v6734_v21, %v6733_v33  ;;  %v6765_v33 = vld [vmem:[%s10274_s23 + $0x7] ss:$0 sm:$0xff] }
0x575b   :  { %v5473_v30 = vadd.f32 %v5469_v38, %v5397_v42  ;;  %v6743_v42 = vld [vmem:[%s10273_s22 + $0xa8] sm:$0xff] }
0x575d   :  { %v5481_v26 = vadd.f32 %v6702_v44, %v5473_v30  ;;  %v8213_v44 = vpack.c.bf16 %v6743_v42, %v6742_v50  ;;  %v6744_v30 = vld [vmem:[%s10273_s22 + $0xb0] sm:$0xff] }
0x575f   :  { %v5482_v46 = vmax.f32 %v5481_v26, 0.0  ;;  %v6745_v26 = vld [vmem:[%s10273_s22 + $0xb8] sm:$0xff] }
0x5761   :  { %7760 = vmatmul.mubr.msk.f32.vlgmr.msra.gmra.mrb[60].mxu0 %vm520_vm3, %v5482_v46 }
0x5762   :  { %7781 = vmatprep.mubr.msk.f32.mxu0 %vm8742_vm2, %v8743_v61  ;;  %8196 = vmatpush3.bf16.msra.mxu0 %v8195_v4 }
0x5763   :  { %8197 = vmatprep.subr.bf16.mxu0 %v8741_v23 }
0x5766   :  { %8199 = vmatpush3.bf16.msra.mxu0 %v8198_v56 }
0x5767   :  { %8206 = vmatprep.subr.bf16.mxu0 %v8741_v23 }
0x5834   :  { %v5563_v59 = vpop.f32.mrb[60].mxu0 }
0x5835   :  { %v5564_v57 = vadd.f32 %v6703_v39, %v5563_v59  ;;  %v7761_v62 = vpop.f32.mrb[61].mxu0 }
0x5836   :  { %v6752_v62 = vld [vmem:[%s10273_s22 + $0xc8] sm:$0xff] }
0x5837   :  { %v5568_v49 = vmax.f32 %v5564_v57, 0.0  ;;  %v6751_v57 = vld [vmem:[%s10273_s22 + $0xc0] sm:$0xff] }
0x5839   :  { %v5575_v3 = vmul.f32 %v6705_v1, %v5568_v49  ;;  %v8219_v1 = vpack.c.bf16 %v6752_v62, %v6751_v57  ;;  %v6753_v49 = vld [vmem:[%s10273_s22 + $0xd0] sm:$0xff] }
0x583b   :  { %v5576_v32 = vadd.f32 %v5575_v3, %v5482_v46  ;;  %v8216_v46 = vpack.c.bf16 %v6745_v26, %v6744_v30  ;;  %v6754_v3 = vld [vmem:[%s10273_s22 + $0xd8] sm:$0xff]  ;;  %v6777_v30 = vld [vmem:[%s10275_s24 + $0x8] ss:$0 sm:$0xff] }
0x583d   :  { %7771 = vmatmul.mubr.msk.f32.vlgmr.msra.gmra.mrb[80].mxu1 %vm520_vm3, %v5576_v32 }
0x583e   :  { %7792 = vmatprep.mubr.msk.f32.mxu1 %vm8742_vm2, %v8743_v61  ;;  %8202 = vmatpush3.bf16.msra.mxu1 %v8201_v24 }
0x583f   :  { %8203 = vmatprep.subr.bf16.mxu1 %v8741_v23 }
0x5842   :  { %8205 = vmatpush3.bf16.msra.mxu1 %v8204_v28 }
0x5843   :  { %8212 = vmatprep.subr.bf16.mxu1 %v8741_v23 }
0x5910   :  { %v5659_v41 = vpop.f32.mrb[80].mxu1 }
0x5911   :  { %v5660_v12 = vadd.f32 %v6711_v34, %v5659_v41  ;;  %v7772_v18 = vpop.f32.mrb[81].mxu1 }
0x5912   :  { %v6761_v18 = vld [vmem:[%s10273_s22 + $0xe8] sm:$0xff] }
0x5913   :  { %v5665_v17 = vmax.f32 %v5660_v12, 0.0  ;;  %v6760_v12 = vld [vmem:[%s10273_s22 + $0xe0] sm:$0xff] }
0x5915   :  { %v5672_v0 = vmul.f32 %v6714_v20, %v5665_v17  ;;  %v8225_v20 = vpack.c.bf16 %v6761_v18, %v6760_v12  ;;  %v6762_v17 = vld [vmem:[%s10273_s22 + $0xf0] sm:$0xff] }
0x5917   :  { %v5673_v27 = vadd.f32 %v5672_v0, %v5576_v32  ;;  %v8222_v32 = vpack.c.bf16 %v6754_v3, %v6753_v49  ;;  %v6763_v0 = vld [vmem:[%s10273_s22 + $0xf8] sm:$0xff] }
0x5919   :  { %7782 = vmatmul.mubr.msk.f32.vlgmr.msra.gmra.mrb[62].mxu0 %vm520_vm3, %v5673_v27 }
0x591a   :  { %7803 = vmatprep.mubr.msk.f32.mxu0 %vm8742_vm2, %v8743_v61  ;;  %8208 = vmatpush3.bf16.msra.mxu0 %v8207_v14 }
0x591b   :  { %8209 = vmatprep.subr.bf16.mxu0 %v8741_v23 }
0x591e   :  { %8211 = vmatpush3.bf16.msra.mxu0 %v8210_v45 }
0x591f   :  { %8218 = vmatprep.subr.bf16.mxu0 %v8741_v23 }
0x59ec   :  { %v5756_v9 = vpop.f32.mrb[62].mxu0 }
0x59ed   :  { %v5757_v29 = vadd.f32 %v6720_v47, %v5756_v9  ;;  %v7783_v11 = vpop.f32.mrb[63].mxu0 }
0x59ee   :  { %v6770_v11 = vld [vmem:[%s10273_s22 + $0x108] sm:$0xff] }
0x59ef   :  { %v5762_v13 = vmax.f32 %v5757_v29, 0.0  ;;  %v6769_v29 = vld [vmem:[%s10273_s22 + $0x100] sm:$0xff] }
0x59f1   :  { %v5769_v63 = vmul.f32 %v6723_v31, %v5762_v13  ;;  %v8231_v31 = vpack.c.bf16 %v6770_v11, %v6769_v29  ;;  %v6771_v13 = vld [vmem:[%s10273_s22 + $0x110] sm:$0xff] }
0x59f3   :  { %v5770_v58 = vadd.f32 %v5769_v63, %v5673_v27  ;;  %v8228_v27 = vpack.c.bf16 %v6763_v0, %v6762_v17  ;;  %v6772_v63 = vld [vmem:[%s10273_s22 + $0x118] sm:$0xff] }
0x59f5   :  { %7793 = vmatmul.mubr.msk.f32.vlgmr.msra.gmra.mrb[82].mxu1 %vm520_vm3, %v5770_v58 }
0x59f6   :  { %7814 = vmatprep.mubr.msk.f32.mxu1 %vm8742_vm2, %v8743_v61  ;;  %8214 = vmatpush3.bf16.msra.mxu1 %v8213_v44 }
0x59f7   :  { %8215 = vmatprep.subr.bf16.mxu1 %v8741_v23 }
0x59fa   :  { %8217 = vmatpush3.bf16.msra.mxu1 %v8216_v46 }
0x59fb   :  { %8224 = vmatprep.subr.bf16.mxu1 %v8741_v23 }
0x5ac8   :  { %v5853_v38 = vpop.f32.mrb[82].mxu1 }
0x5ac9   :  { %v5854_v25 = vadd.f32 %v6729_v22, %v5853_v38  ;;  %v7794_v40 = vpop.f32.mrb[83].mxu1 }
0x5aca   :  { %v6779_v40 = vld [vmem:[%s10273_s22 + $0x128] sm:$0xff] }
0x5acb   :  { %v5859_v16 = vmax.f32 %v5854_v25, 0.0  ;;  %v6778_v25 = vld [vmem:[%s10273_s22 + $0x120] sm:$0xff] }
0x5acd   :  { %v5866_v19 = vmul.f32 %v6732_v8, %v5859_v16  ;;  %v8237_v8 = vpack.c.bf16 %v6779_v40, %v6778_v25  ;;  %v6780_v16 = vld [vmem:[%s10273_s22 + $0x130] sm:$0xff] }
0x5acf   :  { %v5867_v5 = vadd.f32 %v5866_v19, %v5770_v58  ;;  %v8234_v58 = vpack.c.bf16 %v6772_v63, %v6771_v13 }
0x5ad1   :  { %7804 = vmatmul.mubr.msk.f32.vlgmr.msra.gmra.mrb[64].mxu0 %vm520_vm3, %v5867_v5 }
0x5ad2   :  { %7825 = vmatprep.mubr.msk.f32.mxu0 %vm8742_vm2, %v8743_v61  ;;  %8220 = vmatpush3.bf16.msra.mxu0 %v8219_v1 }
0x5ad3   :  { %8221 = vmatprep.subr.bf16.mxu0 %v8741_v23 }
0x5ad6   :  { %8223 = vmatpush3.bf16.msra.mxu0 %v8222_v32 }
0x5ad7   :  { %8230 = vmatprep.subr.bf16.mxu0 %v8741_v23 }
0x5ba4   :  { %v5950_v51 = vpop.f32.mrb[64].mxu0 }
0x5ba5   :  { %v5951_v52 = vadd.f32 %v6738_v48, %v5950_v51  ;;  %v7805_v53 = vpop.f32.mrb[65].mxu0  ;;  %v6450_v51 = vld [vmem:[%s10276_s25] sm:$0xff] }
0x5ba7   :  { %v5956_v55 = vmax.f32 %v5951_v52, 0.0  ;;  %v6451_v52 = vld [vmem:[%s10276_s25 + $0x8] sm:$0xff] }
0x5ba8   :  { %v8243_v53 = vpack.c.bf16 %v6451_v52, %v6450_v51 }
0x5ba9   :  { %v5963_v39 = vmul.f32 %v6741_v54, %v5956_v55  ;;  %v6452_v54 = vld [vmem:[%s10276_s25 + $0x10] sm:$0xff]  ;;  %v6453_v55 = vld [vmem:[%s10276_s25 + $0x18] sm:$0xff] }
0x5bab   :  { %v5964_v59 = vadd.f32 %v5963_v39, %v5867_v5  ;;  %v6774_v5 = vld [vmem:[%s10274_s23 + $0x8] ss:$0 sm:$0xff]  ;;  %v8246_v39 = vpack.c.bf16 %v6453_v55, %v6452_v54 }
0x5bad   :  { %7815 = vmatmul.mubr.msk.f32.vlgmr.msra.gmra.mrb[84].mxu1 %vm520_vm3, %v5964_v59 }
0x5bae   :  { %7836 = vmatprep.mubr.msk.f32.mxu1 %vm8742_vm2, %v8743_v61  ;;  %8226 = vmatpush3.bf16.msra.mxu1 %v8225_v20 }
0x5baf   :  { %8227 = vmatprep.subr.bf16.mxu1 %v8741_v23 }
0x5bb2   :  { %8229 = vmatpush3.bf16.msra.mxu1 %v8228_v27 }
0x5bb3   :  { %8236 = vmatprep.subr.bf16.mxu1 %v8741_v23 }
0x5c80   :  { %v6047_v7 = vpop.f32.mrb[84].mxu1 }
0x5c81   :  { %v6048_v4 = vadd.f32 %v6747_v6, %v6047_v7  ;;  %v7816_v15 = vpop.f32.mrb[85].mxu1  ;;  %v6787_v6 = vld [vmem:[%s10277_s26] ss:$0 sm:$0xff] }
0x5c83   :  { %v6053_v56 = vmax.f32 %v6048_v4, 0.0 }
0x5c85   :  { %v6060_v34 = vmul.f32 %v6750_v10, %v6053_v56 }
0x5c87   :  { %v6061_v41 = vadd.f32 %v6060_v34, %v5964_v59  ;;  %v6783_v59 = vld [vmem:[%s10274_s23 + $0x9] ss:$0 sm:$0xff] }
0x5c89   :  { %7826 = vmatmul.mubr.msk.f32.vlgmr.msra.gmra.mrb[66].mxu0 %vm520_vm3, %v6061_v41 }
0x5c8a   :  { %7847 = vmatprep.mubr.msk.f32.mxu0 %vm8742_vm2, %v8743_v61  ;;  %8232 = vmatpush3.bf16.msra.mxu0 %v8231_v31 }
0x5c8b   :  { %8233 = vmatprep.subr.bf16.mxu0 %v8741_v23 }
0x5c8e   :  { %8235 = vmatpush3.bf16.msra.mxu0 %v8234_v58 }
0x5c8f   :  { %8242 = vmatprep.subr.bf16.mxu0 %v8741_v23 }
0x5d5c   :  { %v6144_v2 = vpop.f32.mrb[66].mxu0 }
0x5d5d   :  { %v6145_v24 = vadd.f32 %v6756_v36, %v6144_v2  ;;  %v7827_v60 = vpop.f32.mrb[67].mxu0 }
0x5d5f   :  { %v6150_v28 = vmax.f32 %v6145_v24, 0.0 }
0x5d61   :  { %v6157_v47 = vmul.f32 %v6759_v43, %v6150_v28 }
0x5d63   :  { %v6158_v9 = vadd.f32 %v6157_v47, %v6061_v41 }
0x5d65   :  { %7837 = vmatmul.mubr.msk.f32.vlgmr.msra.gmra.mrb[86].mxu1 %vm520_vm3, %v6158_v9 }
0x5d66   :  { %7858 = vmatprep.mubr.msk.f32.mxu1 %vm8742_vm2, %v8743_v61  ;;  %8238 = vmatpush3.bf16.msra.mxu1 %v8237_v8 }
0x5d67   :  { %8239 = vmatprep.subr.bf16.mxu1 %v8741_v23 }
0x5e38   :  { %v6241_v21 = vpop.f32.mrb[86].mxu1 }
0x5e39   :  { %v6242_v14 = vadd.f32 %v6765_v33, %v6241_v21  ;;  %v7838_v35 = vpop.f32.mrb[87].mxu1 }
0x5e3b   :  { %v6247_v45 = vmax.f32 %v6242_v14, 0.0 }
0x5e3d   :  { %v6254_v22 = vmul.f32 %v6768_v37, %v6247_v45 }
0x5e3f   :  { %v6255_v38 = vadd.f32 %v6254_v22, %v6158_v9 }
0x5e41   :  { %7848 = vmatmul.mubr.msk.f32.vlgmr.msra.gmra.mrb[68].mxu0 %vm520_vm3, %v6255_v38 }
0x5e42   :  { %7869 = vmatprep.mubr.msk.f32.mxu0 %vm8742_vm2, %v8743_v61  ;;  %v6781_v61 = vld [vmem:[%s10273_s22 + $0x138] sm:$0xff]  ;;  %8244 = vmatpush3.bf16.msra.mxu0 %v8243_v53 }
0x5e43   :  { %v8240_v19 = vpack.c.bf16 %v6781_v61, %v6780_v16  ;;  %8245 = vmatprep.subr.bf16.mxu0 %v8741_v23  ;;  %v6786_v23 = vld [vmem:[%s10275_s24 + $0x9] ss:$0 sm:$0xff] }
0x5e45   :  { %8241 = vmatpush3.bf16.msra.mxu1 %v8240_v19 }
0x5e46   :  { %8247 = vmatpush3.bf16.msra.mxu0 %v8246_v39 }
0x5f14   :  { %v6338_v50 = vpop.f32.mrb[68].mxu0 }
0x5f15   :  { %v6339_v42 = vadd.f32 %v6774_v5, %v6338_v50  ;;  %v7849_v44 = vpop.f32.mrb[69].mxu0 }
0x5f17   :  { %v6344_v26 = vmax.f32 %v6339_v42, 0.0 }
0x5f19   :  { %v6351_v46 = vmul.f32 %v6777_v30, %v6344_v26 }
0x5f1b   :  { %v6352_v48 = vadd.f32 %v6351_v46, %v6255_v38 }
0x5f1d   :  { %7859 = vmatmul.mubr.msk.f32.vlgmr.msra.gmra.mrb[88].mxu1 %vm520_vm3, %v6352_v48 }
0x5ff0   :  { %v6435_v57 = vpop.f32.mrb[88].mxu1 }
0x5ff1   :  { %v6436_v62 = vadd.f32 %v6783_v59, %v6435_v57  ;;  %v7860_v1 = vpop.f32.mrb[89].mxu1 }
0x5ff3   :  { %v6441_v49 = vmax.f32 %v6436_v62, 0.0 }
0x5ff5   :  { %v6448_v3 = vmul.f32 %v6786_v23, %v6441_v49 }
0x5ff7   :  { %v6449_v32 = vadd.f32 %v6448_v3, %v6352_v48 }
0x5ff9   :  { %7870 = vmatmul.mubr.msk.f32.vlgmr.msra.gmra.mrb[70].mxu0 %vm520_vm3, %v6449_v32 }
0x60cc   :  { %v6530_v7 = vpop.f32.mrb[70].mxu0 }
0x60cd   :  { %v6531_v4 = vadd.f32 %v6787_v6, %v6530_v7  ;;  %v7871_v15 = vpop.f32.mrb[71].mxu0 }
0x60cf   :  { %6534 = vst.msk [vmem:[%s10278_s27] sm:$0xff] %vm209_vm0, %v6531_v4 }
0x60d0   :  { %6539 = vsyncpa [#allocation4], 1 }
0x60d1   :  { %6540 = vsyncpa [#allocation6], 1 }
0x60d2   :  { %6541 = vsyncpa [#allocation9], 1 }
0x60d3   :  { %6542 = vsyncpa [#allocation12], 1 }
0x60d4   :  { %6543 = vsyncpa [#allocation15], 1 }

</bundles_post_ra>
